<compile_context>
chip_gen: v5e
topology: v5e:2x2
jax: 0.10.0
libtpu: 0.0.40
codegen_flags: <defaults>
</compile_context>

<pallas_src>
import functools

import jax
import jax.numpy as jnp
from jax.experimental import pallas as pl
from jax.experimental.pallas import tpu as pltpu


def _tree_sum(terms):
    """Pairwise (balanced) sum of a list of arrays -> better VALU ILP."""
    terms = list(terms)
    while len(terms) > 1:
        nxt = []
        for i in range(0, len(terms) - 1, 2):
            nxt.append(terms[i] + terms[i + 1])
        if len(terms) % 2:
            nxt.append(terms[-1])
        terms = nxt
    return terms[0]


def _conv_encoder_kernel(TH, K, C, W,
                         x_ref, wpre_ref, w1_ref, b1_ref, w2_ref, b2_ref,
                         out_ref):
    """One (batch, H-tile) grid step.  All activations are lane-packed (rows, W*C)."""
    WC = W * C
    pad = K // 2

    t = pl.program_id(1)
    base = t * TH
    if TH % 8 == 0:
        base = pl.multiple_of(base, 8)

    # One row-window load per grid step; kh taps are static slices of it.
    window = x_ref[0, pl.ds(base, TH + K - 1), :].astype(jnp.float32)  # (TH+K-1, WC)
    wp = wpre_ref[...].astype(jnp.float32)                             # (K, K, WC)

    rows = [window[kh:kh + TH, :] for kh in range(K)]                  # K x (TH, WC)
    resid = rows[pad]          # interior rows of the padded slab == residual input

    # Depthwise KxK conv.  BN scale and width-boundary zeros are folded into the
    # packed filter; the filter is pre-rolled per kw, so we reduce over kh first
    # (VPU only) and then do a single lane rotation per kw (6 XLU rolls total).
    rolled = []
    for kw in range(K):
        temp = _tree_sum([rows[kh] * wp[kh, kw, :] for kh in range(K)])
        d = (kw - pad) * C                       # lane shift of this kw tap
        if d != 0:
            temp = pltpu.roll(temp, (-d) % WC, axis=1)
        rolled.append(temp)
    acc = _tree_sum(rolled)                      # (TH, WC) conv * BN-scale

    # Pointwise MLP as block-diagonal lane-packed matmuls (MXU).
    # b1 already contains the folded BN bias; w2/b2 carry gamma and the 1/6.
    h = jnp.dot(acc, w1_ref[...], preferred_element_type=jnp.float32) + b1_ref[...]
    p = h * jnp.clip(h + 3.0, 0.0, 6.0)          # Hardswish numerator (1/6 folded)
    z = jnp.dot(p, w2_ref[...], preferred_element_type=jnp.float32) + b2_ref[...]

    # Residual add (drop_path == Identity since drop_path=0.0).
    out_ref[0] = (resid + z).astype(out_ref.dtype)


@functools.partial(jax.jit, static_argnames=("kernel_size", "tile_h"))
def conv_encoder_bn_hs(x, dww, bn_scale, bn_bias, w1, b1, w2, b2, gamma,
                       *, kernel_size=7, tile_h=None):
    """x: (B, C, H, W) NCHW, matching the PyTorch module's input convention."""
    B, C, H, W = x.shape
    K = kernel_size
    pad = K // 2
    E = w1.shape[1]
    WC, WE = W * C, W * E

    if WC % 128 != 0 or WC > 512:
        # TODO(synk): add a W-tiled block-diagonal weight path for large W*C so
        # the kron weights do not blow past v7x's 64 MiB VMEM at real shapes.
        raise NotImplementedError("lane-packed path needs W*C % 128 == 0 and W*C <= 512")

    # Tile height: full H by default (bigger MXU LHS, fewer grid steps).  A
    # smaller multiple-of-8 tile_h can be passed for very tall feature maps.
    if tile_h is None or not (H % tile_h == 0 and tile_h % 8 == 0):
        TH = H
    else:
        TH = tile_h
    nH = H // TH

    f32 = jnp.float32
    scale = bn_scale.reshape(-1).astype(f32)          # (C,)
    bias = bn_bias.reshape(-1).astype(f32)            # (C,)
    g = gamma.reshape(-1).astype(f32)                 # (C,)

    # --- fold BN scale + width-boundary zeros into the packed depthwise filter.
    dwwp = dww.astype(f32) * scale[None, None, :]     # (K, K, C)
    dwwp = jnp.tile(dwwp, (1, 1, W))                  # (K, K, W*C), lane j = w*C + c
    w_of_lane = jnp.arange(WC) // C                   # (WC,)
    kw_off = jnp.arange(K)[:, None] - pad             # (K, 1)
    valid = ((w_of_lane[None, :] + kw_off >= 0) &
             (w_of_lane[None, :] + kw_off < W))       # (K, WC) validity at output lane
    dwwp = dwwp * valid[None, :, :].astype(f32)
    # Pre-roll the weights by +d_kw so the kernel reduces over kh first and then
    # does one lane roll per kw (wrap-around still killed by the zeroed lanes).
    w_pre = jnp.stack(
        [jnp.roll(dwwp[:, kw, :], (kw - pad) * C, axis=-1) for kw in range(K)],
        axis=1)                                       # (K, K, WC)

    # --- fold BN bias into b1; Hardswish 1/6 and layer-scale gamma into w2/b2;
    #     build block-diagonal lane-packed matmul weights.
    w1f = w1.astype(f32)                              # (C, E)
    b1f = bias @ w1f + b1.reshape(-1).astype(f32)     # (E,)
    w2f = w2.astype(f32) * (g / 6.0)[None, :]         # (E, C)
    b2f = b2.reshape(-1).astype(f32) * g              # (C,)
    eye_w = jnp.eye(W, dtype=f32)
    w1_blk = jnp.kron(eye_w, w1f)                     # (W*C, W*E)
    w2_blk = jnp.kron(eye_w, w2f)                     # (W*E, W*C)
    b1_blk = jnp.tile(b1f, W)[None, :]                # (1, W*E)
    b2_blk = jnp.tile(b2f, W)[None, :]                # (1, W*C)

    # --- single lane-packed input: NCHW -> NHWC -> (B, H, W*C), pad H only.
    # (The pad fuses with the mandatory NCHW->NHWC relayout in XLA.)
    x_pk = jnp.transpose(x, (0, 2, 3, 1)).reshape(B, H, WC)
    xpad = jnp.pad(x_pk, ((0, 0), (pad, pad), (0, 0)))   # (B, H+2*pad, W*C)
    Hp = H + 2 * pad

    kernel = functools.partial(_conv_encoder_kernel, TH, K, C, W)

    # Honest cost: depthwise MACs + the block-diagonal MXU flops actually run.
    cost = pl.CostEstimate(
        flops=2 * B * H * W * C * K * K + 4 * B * H * WC * WE,
        transcendentals=0,
        bytes_accessed=4 * (xpad.size + B * H * WC + w_pre.size
                            + w1_blk.size + w2_blk.size + b1_blk.size + b2_blk.size),
    )

    # VMEM budget from actual buffer sizes (constants single-buffered).
    itemsize = 4
    const_bytes = (w_pre.size + w1_blk.size + w2_blk.size
                   + b1_blk.size + b2_blk.size) * itemsize
    stream_bytes = 2 * (Hp * WC + TH * WC) * itemsize     # double-buffered in/out
    vmem_limit = int(min(max(2 * (const_bytes + stream_bytes), 4 << 20), 32 << 20))

    out_pk = pl.pallas_call(
        kernel,
        out_shape=jax.ShapeDtypeStruct((B, H, WC), x.dtype),
        grid=(B, nH),
        in_specs=[
            # padded image: resident across the H-tiles of one batch element
            pl.BlockSpec((1, Hp, WC), lambda b, t: (b, 0, 0)),
            # grid-invariant constants: single-buffered
            pl.BlockSpec((K, K, WC), lambda b, t: (0, 0, 0),
                         pipeline_mode=pl.Buffered(1)),      # pre-rolled dw filter
            pl.BlockSpec((WC, WE), lambda b, t: (0, 0),
                         pipeline_mode=pl.Buffered(1)),       # pwconv1 (block-diag)
            pl.BlockSpec((1, WE), lambda b, t: (0, 0),
                         pipeline_mode=pl.Buffered(1)),       # pwconv1 bias (+BN bias)
            pl.BlockSpec((WE, WC), lambda b, t: (0, 0),
                         pipeline_mode=pl.Buffered(1)),       # pwconv2 (block-diag)
            pl.BlockSpec((1, WC), lambda b, t: (0, 0),
                         pipeline_mode=pl.Buffered(1)),       # pwconv2 bias (*gamma)
        ],
        out_specs=pl.BlockSpec((1, TH, WC), lambda b, t: (b, t, 0)),
        compiler_params=pltpu.CompilerParams(
            dimension_semantics=("parallel", "parallel"),
            vmem_limit_bytes=vmem_limit,
        ),
        cost_estimate=cost,
    )(xpad, w_pre, w1_blk, b1_blk, w2_blk, b2_blk)

    out_nhwc = out_pk.reshape(B, H, W, C)
    return jnp.transpose(out_nhwc, (0, 3, 1, 2))      # NHWC -> NCHW


def _reference(x, dww, bn_scale, bn_bias, w1, b1, w2, b2, gamma, kernel_size=7):
    """Pure-JAX reference following the PyTorch forward exactly (eval-mode BN)."""
    B, C, H, W = x.shape
    K = kernel_size
    x_nhwc = jnp.transpose(x, (0, 2, 3, 1)).astype(jnp.float32)
    rhs = dww.reshape(K, K, 1, C).astype(jnp.float32)             # HWIO, groups=C
    y = jax.lax.conv_general_dilated(
        x_nhwc, rhs, window_strides=(1, 1), padding="SAME",
        dimension_numbers=("NHWC", "HWIO", "NHWC"), feature_group_count=C)
    y = y * bn_scale[0] + bn_bias[0]
    h = y @ w1 + b1[0]
    h = h * jnp.clip(h + 3.0, 0.0, 6.0) / 6.0
    z = h @ w2 + b2[0]
    z = z * gamma[0]
    return x + jnp.transpose(z, (0, 3, 1, 2))


if __name__ == "__main__":
    dim, K, expan = 8, 7, 4
    E = expan * dim
    B, H, W = 2, 16, 16                     # W * dim = 128 -> lane-dense packing

    key = jax.random.PRNGKey(0)
    ks = jax.random.split(key, 10)

    x = jax.random.normal(ks[0], (B, dim, H, W), jnp.float32)

    # Depthwise conv weight; dww[kh, kw, c] == torch weight[c, 0, kh, kw].
    dww = jax.random.normal(ks[1], (K, K, dim), jnp.float32) * 0.1

    # BatchNorm2d params (eval mode), folded to per-channel scale/bias.
    # TODO(synk): training-mode BatchNorm (batch statistics + running-stat
    # update) is not implemented; only inference-mode BN is fused.
    eps = 1e-5
    bn_w = jax.random.uniform(ks[2], (dim,), minval=0.5, maxval=1.5)
    bn_b = jax.random.normal(ks[3], (dim,)) * 0.1
    run_mean = jax.random.normal(ks[4], (dim,)) * 0.1
    run_var = jax.random.uniform(ks[5], (dim,), minval=0.5, maxval=1.5)
    inv_std = bn_w / jnp.sqrt(run_var + eps)
    bn_scale = inv_std.reshape(1, dim).astype(jnp.float32)
    bn_bias = (bn_b - run_mean * inv_std).reshape(1, dim).astype(jnp.float32)

    # pwconv1 / pwconv2 (stored transposed: x @ W^T in torch == x @ w1 here).
    w1 = jax.random.normal(ks[6], (dim, E), jnp.float32) * (dim ** -0.5)
    b1 = jax.random.normal(ks[7], (1, E), jnp.float32) * 0.05
    w2 = jax.random.normal(ks[8], (E, dim), jnp.float32) * (E ** -0.5)
    b2 = jax.random.normal(ks[9], (1, dim), jnp.float32) * 0.05

    # layer_scale_init_value * ones(dim), as in __init__.
    gamma = jnp.full((1, dim), 1e-6, jnp.float32)

    out = conv_encoder_bn_hs(x, dww, bn_scale, bn_bias, w1, b1, w2, b2, gamma,
                             kernel_size=K)
    out = jax.block_until_ready(out)

    ref = _reference(x, dww, bn_scale, bn_bias, w1, b1, w2, b2, gamma, K)
    assert out.shape == (B, dim, H, W) and out.dtype == x.dtype
    assert jnp.allclose(out, ref, rtol=1e-4, atol=1e-4), "mismatch vs reference"

    print("KERNEL_OK")
</pallas_src>

<mosaic_0001>
module attributes {stable_mosaic.version = 11 : i64} {
  func.func @_conv_encoder_kernel(%arg0: i32, %arg1: i32, %arg2: memref<1x22x128xf32, #tpu.memory_space<vmem>>, %arg3: memref<7x7x128xf32, #tpu.memory_space<vmem>>, %arg4: memref<128x512xf32, #tpu.memory_space<vmem>>, %arg5: memref<1x512xf32, #tpu.memory_space<vmem>>, %arg6: memref<512x128xf32, #tpu.memory_space<vmem>>, %arg7: memref<1x128xf32, #tpu.memory_space<vmem>>, %arg8: memref<1x16x128xf32, #tpu.memory_space<vmem>>) attributes {dimension_semantics = [#tpu.dimension_semantics<parallel>, #tpu.dimension_semantics<parallel>], iteration_bounds = array<i64: 2, 1>, scalar_prefetch = 0 : i64, scratch_operands = 0 : i64, tpu.core_type = #tpu.core_type<tc>, window_params = [{transform_indices = @transform_0, window_bounds = array<i64: 1, 22, 128>}, {pipeline_mode = #tpu.pipeline_mode<synchronous>, transform_indices = @transform_1, window_bounds = array<i64: 7, 7, 128>}, {pipeline_mode = #tpu.pipeline_mode<synchronous>, transform_indices = @transform_2, window_bounds = array<i64: 128, 512>}, {pipeline_mode = #tpu.pipeline_mode<synchronous>, transform_indices = @transform_3, window_bounds = array<i64: 1, 512>}, {pipeline_mode = #tpu.pipeline_mode<synchronous>, transform_indices = @transform_4, window_bounds = array<i64: 512, 128>}, {pipeline_mode = #tpu.pipeline_mode<synchronous>, transform_indices = @transform_5, window_bounds = array<i64: 1, 128>}, {transform_indices = @transform_6, window_bounds = array<i64: 1, 16, 128>}]} {
    %c16_i32 = arith.constant 16 : i32
    %0 = arith.muli %arg1, %c16_i32 : i32
    %1 = tpu.assume_multiple %0, 8 : i32
    %c0 = arith.constant 0 : index
    %2 = arith.index_cast %1 : i32 to index
    %c0_0 = arith.constant 0 : index
    %3 = vector.load %arg2[%c0, %2, %c0_0] : memref<1x22x128xf32, #tpu.memory_space<vmem>>, vector<1x22x128xf32>
    %4 = vector.shape_cast %3 : vector<1x22x128xf32> to vector<22x128xf32>
    %c0_1 = arith.constant 0 : index
    %c0_2 = arith.constant 0 : index
    %c0_3 = arith.constant 0 : index
    %5 = vector.load %arg3[%c0_1, %c0_2, %c0_3] : memref<7x7x128xf32, #tpu.memory_space<vmem>>, vector<7x7x128xf32>
    %6 = vector.extract_strided_slice %4 {offsets = [0, 0], sizes = [16, 128], strides = [1, 1]} : vector<22x128xf32> to vector<16x128xf32>
    %7 = vector.extract_strided_slice %4 {offsets = [1, 0], sizes = [16, 128], strides = [1, 1]} : vector<22x128xf32> to vector<16x128xf32>
    %8 = vector.extract_strided_slice %4 {offsets = [2, 0], sizes = [16, 128], strides = [1, 1]} : vector<22x128xf32> to vector<16x128xf32>
    %9 = vector.extract_strided_slice %4 {offsets = [3, 0], sizes = [16, 128], strides = [1, 1]} : vector<22x128xf32> to vector<16x128xf32>
    %10 = vector.extract_strided_slice %4 {offsets = [4, 0], sizes = [16, 128], strides = [1, 1]} : vector<22x128xf32> to vector<16x128xf32>
    %11 = vector.extract_strided_slice %4 {offsets = [5, 0], sizes = [16, 128], strides = [1, 1]} : vector<22x128xf32> to vector<16x128xf32>
    %12 = vector.extract_strided_slice %4 {offsets = [6, 0], sizes = [16, 128], strides = [1, 1]} : vector<22x128xf32> to vector<16x128xf32>
    %13 = vector.extract_strided_slice %5 {offsets = [0, 0, 0], sizes = [1, 1, 128], strides = [1, 1, 1]} : vector<7x7x128xf32> to vector<1x1x128xf32>
    %14 = vector.shape_cast %13 : vector<1x1x128xf32> to vector<128xf32>
    %15 = vector.shape_cast %14 : vector<128xf32> to vector<1x128xf32>
    %16 = vector.broadcast %15 : vector<1x128xf32> to vector<16x128xf32>
    %17 = arith.mulf %6, %16 : vector<16x128xf32>
    %18 = vector.extract_strided_slice %5 {offsets = [1, 0, 0], sizes = [1, 1, 128], strides = [1, 1, 1]} : vector<7x7x128xf32> to vector<1x1x128xf32>
    %19 = vector.shape_cast %18 : vector<1x1x128xf32> to vector<128xf32>
    %20 = vector.shape_cast %19 : vector<128xf32> to vector<1x128xf32>
    %21 = vector.broadcast %20 : vector<1x128xf32> to vector<16x128xf32>
    %22 = arith.mulf %7, %21 : vector<16x128xf32>
    %23 = vector.extract_strided_slice %5 {offsets = [2, 0, 0], sizes = [1, 1, 128], strides = [1, 1, 1]} : vector<7x7x128xf32> to vector<1x1x128xf32>
    %24 = vector.shape_cast %23 : vector<1x1x128xf32> to vector<128xf32>
    %25 = vector.shape_cast %24 : vector<128xf32> to vector<1x128xf32>
    %26 = vector.broadcast %25 : vector<1x128xf32> to vector<16x128xf32>
    %27 = arith.mulf %8, %26 : vector<16x128xf32>
    %28 = vector.extract_strided_slice %5 {offsets = [3, 0, 0], sizes = [1, 1, 128], strides = [1, 1, 1]} : vector<7x7x128xf32> to vector<1x1x128xf32>
    %29 = vector.shape_cast %28 : vector<1x1x128xf32> to vector<128xf32>
    %30 = vector.shape_cast %29 : vector<128xf32> to vector<1x128xf32>
    %31 = vector.broadcast %30 : vector<1x128xf32> to vector<16x128xf32>
    %32 = arith.mulf %9, %31 : vector<16x128xf32>
    %33 = vector.extract_strided_slice %5 {offsets = [4, 0, 0], sizes = [1, 1, 128], strides = [1, 1, 1]} : vector<7x7x128xf32> to vector<1x1x128xf32>
    %34 = vector.shape_cast %33 : vector<1x1x128xf32> to vector<128xf32>
    %35 = vector.shape_cast %34 : vector<128xf32> to vector<1x128xf32>
    %36 = vector.broadcast %35 : vector<1x128xf32> to vector<16x128xf32>
    %37 = arith.mulf %10, %36 : vector<16x128xf32>
    %38 = vector.extract_strided_slice %5 {offsets = [5, 0, 0], sizes = [1, 1, 128], strides = [1, 1, 1]} : vector<7x7x128xf32> to vector<1x1x128xf32>
    %39 = vector.shape_cast %38 : vector<1x1x128xf32> to vector<128xf32>
    %40 = vector.shape_cast %39 : vector<128xf32> to vector<1x128xf32>
    %41 = vector.broadcast %40 : vector<1x128xf32> to vector<16x128xf32>
    %42 = arith.mulf %11, %41 : vector<16x128xf32>
    %43 = vector.extract_strided_slice %5 {offsets = [6, 0, 0], sizes = [1, 1, 128], strides = [1, 1, 1]} : vector<7x7x128xf32> to vector<1x1x128xf32>
    %44 = vector.shape_cast %43 : vector<1x1x128xf32> to vector<128xf32>
    %45 = vector.shape_cast %44 : vector<128xf32> to vector<1x128xf32>
    %46 = vector.broadcast %45 : vector<1x128xf32> to vector<16x128xf32>
    %47 = arith.mulf %12, %46 : vector<16x128xf32>
    %48 = arith.addf %17, %22 : vector<16x128xf32>
    %49 = arith.addf %27, %32 : vector<16x128xf32>
    %50 = arith.addf %37, %42 : vector<16x128xf32>
    %51 = arith.addf %48, %49 : vector<16x128xf32>
    %52 = arith.addf %50, %47 : vector<16x128xf32>
    %53 = arith.addf %51, %52 : vector<16x128xf32>
    %c24_i32 = arith.constant 24 : i32
    %54 = tpu.dynamic_rotate %53 by %c24_i32 dim 1 : vector<16x128xf32>, i32 -> vector<16x128xf32>
    %55 = vector.extract_strided_slice %5 {offsets = [0, 1, 0], sizes = [1, 1, 128], strides = [1, 1, 1]} : vector<7x7x128xf32> to vector<1x1x128xf32>
    %56 = vector.shape_cast %55 : vector<1x1x128xf32> to vector<128xf32>
    %57 = vector.shape_cast %56 : vector<128xf32> to vector<1x128xf32>
    %58 = vector.broadcast %57 : vector<1x128xf32> to vector<16x128xf32>
    %59 = arith.mulf %6, %58 : vector<16x128xf32>
    %60 = vector.extract_strided_slice %5 {offsets = [1, 1, 0], sizes = [1, 1, 128], strides = [1, 1, 1]} : vector<7x7x128xf32> to vector<1x1x128xf32>
    %61 = vector.shape_cast %60 : vector<1x1x128xf32> to vector<128xf32>
    %62 = vector.shape_cast %61 : vector<128xf32> to vector<1x128xf32>
    %63 = vector.broadcast %62 : vector<1x128xf32> to vector<16x128xf32>
    %64 = arith.mulf %7, %63 : vector<16x128xf32>
    %65 = vector.extract_strided_slice %5 {offsets = [2, 1, 0], sizes = [1, 1, 128], strides = [1, 1, 1]} : vector<7x7x128xf32> to vector<1x1x128xf32>
    %66 = vector.shape_cast %65 : vector<1x1x128xf32> to vector<128xf32>
    %67 = vector.shape_cast %66 : vector<128xf32> to vector<1x128xf32>
    %68 = vector.broadcast %67 : vector<1x128xf32> to vector<16x128xf32>
    %69 = arith.mulf %8, %68 : vector<16x128xf32>
    %70 = vector.extract_strided_slice %5 {offsets = [3, 1, 0], sizes = [1, 1, 128], strides = [1, 1, 1]} : vector<7x7x128xf32> to vector<1x1x128xf32>
    %71 = vector.shape_cast %70 : vector<1x1x128xf32> to vector<128xf32>
    %72 = vector.shape_cast %71 : vector<128xf32> to vector<1x128xf32>
    %73 = vector.broadcast %72 : vector<1x128xf32> to vector<16x128xf32>
    %74 = arith.mulf %9, %73 : vector<16x128xf32>
    %75 = vector.extract_strided_slice %5 {offsets = [4, 1, 0], sizes = [1, 1, 128], strides = [1, 1, 1]} : vector<7x7x128xf32> to vector<1x1x128xf32>
    %76 = vector.shape_cast %75 : vector<1x1x128xf32> to vector<128xf32>
    %77 = vector.shape_cast %76 : vector<128xf32> to vector<1x128xf32>
    %78 = vector.broadcast %77 : vector<1x128xf32> to vector<16x128xf32>
    %79 = arith.mulf %10, %78 : vector<16x128xf32>
    %80 = vector.extract_strided_slice %5 {offsets = [5, 1, 0], sizes = [1, 1, 128], strides = [1, 1, 1]} : vector<7x7x128xf32> to vector<1x1x128xf32>
    %81 = vector.shape_cast %80 : vector<1x1x128xf32> to vector<128xf32>
    %82 = vector.shape_cast %81 : vector<128xf32> to vector<1x128xf32>
    %83 = vector.broadcast %82 : vector<1x128xf32> to vector<16x128xf32>
    %84 = arith.mulf %11, %83 : vector<16x128xf32>
    %85 = vector.extract_strided_slice %5 {offsets = [6, 1, 0], sizes = [1, 1, 128], strides = [1, 1, 1]} : vector<7x7x128xf32> to vector<1x1x128xf32>
    %86 = vector.shape_cast %85 : vector<1x1x128xf32> to vector<128xf32>
    %87 = vector.shape_cast %86 : vector<128xf32> to vector<1x128xf32>
    %88 = vector.broadcast %87 : vector<1x128xf32> to vector<16x128xf32>
    %89 = arith.mulf %12, %88 : vector<16x128xf32>
    %90 = arith.addf %59, %64 : vector<16x128xf32>
    %91 = arith.addf %69, %74 : vector<16x128xf32>
    %92 = arith.addf %79, %84 : vector<16x128xf32>
    %93 = arith.addf %90, %91 : vector<16x128xf32>
    %94 = arith.addf %92, %89 : vector<16x128xf32>
    %95 = arith.addf %93, %94 : vector<16x128xf32>
    %c16_i32_4 = arith.constant 16 : i32
    %96 = tpu.dynamic_rotate %95 by %c16_i32_4 dim 1 : vector<16x128xf32>, i32 -> vector<16x128xf32>
    %97 = vector.extract_strided_slice %5 {offsets = [0, 2, 0], sizes = [1, 1, 128], strides = [1, 1, 1]} : vector<7x7x128xf32> to vector<1x1x128xf32>
    %98 = vector.shape_cast %97 : vector<1x1x128xf32> to vector<128xf32>
    %99 = vector.shape_cast %98 : vector<128xf32> to vector<1x128xf32>
    %100 = vector.broadcast %99 : vector<1x128xf32> to vector<16x128xf32>
    %101 = arith.mulf %6, %100 : vector<16x128xf32>
    %102 = vector.extract_strided_slice %5 {offsets = [1, 2, 0], sizes = [1, 1, 128], strides = [1, 1, 1]} : vector<7x7x128xf32> to vector<1x1x128xf32>
    %103 = vector.shape_cast %102 : vector<1x1x128xf32> to vector<128xf32>
    %104 = vector.shape_cast %103 : vector<128xf32> to vector<1x128xf32>
    %105 = vector.broadcast %104 : vector<1x128xf32> to vector<16x128xf32>
    %106 = arith.mulf %7, %105 : vector<16x128xf32>
    %107 = vector.extract_strided_slice %5 {offsets = [2, 2, 0], sizes = [1, 1, 128], strides = [1, 1, 1]} : vector<7x7x128xf32> to vector<1x1x128xf32>
    %108 = vector.shape_cast %107 : vector<1x1x128xf32> to vector<128xf32>
    %109 = vector.shape_cast %108 : vector<128xf32> to vector<1x128xf32>
    %110 = vector.broadcast %109 : vector<1x128xf32> to vector<16x128xf32>
    %111 = arith.mulf %8, %110 : vector<16x128xf32>
    %112 = vector.extract_strided_slice %5 {offsets = [3, 2, 0], sizes = [1, 1, 128], strides = [1, 1, 1]} : vector<7x7x128xf32> to vector<1x1x128xf32>
    %113 = vector.shape_cast %112 : vector<1x1x128xf32> to vector<128xf32>
    %114 = vector.shape_cast %113 : vector<128xf32> to vector<1x128xf32>
    %115 = vector.broadcast %114 : vector<1x128xf32> to vector<16x128xf32>
    %116 = arith.mulf %9, %115 : vector<16x128xf32>
    %117 = vector.extract_strided_slice %5 {offsets = [4, 2, 0], sizes = [1, 1, 128], strides = [1, 1, 1]} : vector<7x7x128xf32> to vector<1x1x128xf32>
    %118 = vector.shape_cast %117 : vector<1x1x128xf32> to vector<128xf32>
    %119 = vector.shape_cast %118 : vector<128xf32> to vector<1x128xf32>
    %120 = vector.broadcast %119 : vector<1x128xf32> to vector<16x128xf32>
    %121 = arith.mulf %10, %120 : vector<16x128xf32>
    %122 = vector.extract_strided_slice %5 {offsets = [5, 2, 0], sizes = [1, 1, 128], strides = [1, 1, 1]} : vector<7x7x128xf32> to vector<1x1x128xf32>
    %123 = vector.shape_cast %122 : vector<1x1x128xf32> to vector<128xf32>
    %124 = vector.shape_cast %123 : vector<128xf32> to vector<1x128xf32>
    %125 = vector.broadcast %124 : vector<1x128xf32> to vector<16x128xf32>
    %126 = arith.mulf %11, %125 : vector<16x128xf32>
    %127 = vector.extract_strided_slice %5 {offsets = [6, 2, 0], sizes = [1, 1, 128], strides = [1, 1, 1]} : vector<7x7x128xf32> to vector<1x1x128xf32>
    %128 = vector.shape_cast %127 : vector<1x1x128xf32> to vector<128xf32>
    %129 = vector.shape_cast %128 : vector<128xf32> to vector<1x128xf32>
    %130 = vector.broadcast %129 : vector<1x128xf32> to vector<16x128xf32>
    %131 = arith.mulf %12, %130 : vector<16x128xf32>
    %132 = arith.addf %101, %106 : vector<16x128xf32>
    %133 = arith.addf %111, %116 : vector<16x128xf32>
    %134 = arith.addf %121, %126 : vector<16x128xf32>
    %135 = arith.addf %132, %133 : vector<16x128xf32>
    %136 = arith.addf %134, %131 : vector<16x128xf32>
    %137 = arith.addf %135, %136 : vector<16x128xf32>
    %c8_i32 = arith.constant 8 : i32
    %138 = tpu.dynamic_rotate %137 by %c8_i32 dim 1 : vector<16x128xf32>, i32 -> vector<16x128xf32>
    %139 = vector.extract_strided_slice %5 {offsets = [0, 3, 0], sizes = [1, 1, 128], strides = [1, 1, 1]} : vector<7x7x128xf32> to vector<1x1x128xf32>
    %140 = vector.shape_cast %139 : vector<1x1x128xf32> to vector<128xf32>
    %141 = vector.shape_cast %140 : vector<128xf32> to vector<1x128xf32>
    %142 = vector.broadcast %141 : vector<1x128xf32> to vector<16x128xf32>
    %143 = arith.mulf %6, %142 : vector<16x128xf32>
    %144 = vector.extract_strided_slice %5 {offsets = [1, 3, 0], sizes = [1, 1, 128], strides = [1, 1, 1]} : vector<7x7x128xf32> to vector<1x1x128xf32>
    %145 = vector.shape_cast %144 : vector<1x1x128xf32> to vector<128xf32>
    %146 = vector.shape_cast %145 : vector<128xf32> to vector<1x128xf32>
    %147 = vector.broadcast %146 : vector<1x128xf32> to vector<16x128xf32>
    %148 = arith.mulf %7, %147 : vector<16x128xf32>
    %149 = vector.extract_strided_slice %5 {offsets = [2, 3, 0], sizes = [1, 1, 128], strides = [1, 1, 1]} : vector<7x7x128xf32> to vector<1x1x128xf32>
    %150 = vector.shape_cast %149 : vector<1x1x128xf32> to vector<128xf32>
    %151 = vector.shape_cast %150 : vector<128xf32> to vector<1x128xf32>
    %152 = vector.broadcast %151 : vector<1x128xf32> to vector<16x128xf32>
    %153 = arith.mulf %8, %152 : vector<16x128xf32>
    %154 = vector.extract_strided_slice %5 {offsets = [3, 3, 0], sizes = [1, 1, 128], strides = [1, 1, 1]} : vector<7x7x128xf32> to vector<1x1x128xf32>
    %155 = vector.shape_cast %154 : vector<1x1x128xf32> to vector<128xf32>
    %156 = vector.shape_cast %155 : vector<128xf32> to vector<1x128xf32>
    %157 = vector.broadcast %156 : vector<1x128xf32> to vector<16x128xf32>
    %158 = arith.mulf %9, %157 : vector<16x128xf32>
    %159 = vector.extract_strided_slice %5 {offsets = [4, 3, 0], sizes = [1, 1, 128], strides = [1, 1, 1]} : vector<7x7x128xf32> to vector<1x1x128xf32>
    %160 = vector.shape_cast %159 : vector<1x1x128xf32> to vector<128xf32>
    %161 = vector.shape_cast %160 : vector<128xf32> to vector<1x128xf32>
    %162 = vector.broadcast %161 : vector<1x128xf32> to vector<16x128xf32>
    %163 = arith.mulf %10, %162 : vector<16x128xf32>
    %164 = vector.extract_strided_slice %5 {offsets = [5, 3, 0], sizes = [1, 1, 128], strides = [1, 1, 1]} : vector<7x7x128xf32> to vector<1x1x128xf32>
    %165 = vector.shape_cast %164 : vector<1x1x128xf32> to vector<128xf32>
    %166 = vector.shape_cast %165 : vector<128xf32> to vector<1x128xf32>
    %167 = vector.broadcast %166 : vector<1x128xf32> to vector<16x128xf32>
    %168 = arith.mulf %11, %167 : vector<16x128xf32>
    %169 = vector.extract_strided_slice %5 {offsets = [6, 3, 0], sizes = [1, 1, 128], strides = [1, 1, 1]} : vector<7x7x128xf32> to vector<1x1x128xf32>
    %170 = vector.shape_cast %169 : vector<1x1x128xf32> to vector<128xf32>
    %171 = vector.shape_cast %170 : vector<128xf32> to vector<1x128xf32>
    %172 = vector.broadcast %171 : vector<1x128xf32> to vector<16x128xf32>
    %173 = arith.mulf %12, %172 : vector<16x128xf32>
    %174 = arith.addf %143, %148 : vector<16x128xf32>
    %175 = arith.addf %153, %158 : vector<16x128xf32>
    %176 = arith.addf %163, %168 : vector<16x128xf32>
    %177 = arith.addf %174, %175 : vector<16x128xf32>
    %178 = arith.addf %176, %173 : vector<16x128xf32>
    %179 = arith.addf %177, %178 : vector<16x128xf32>
    %180 = vector.extract_strided_slice %5 {offsets = [0, 4, 0], sizes = [1, 1, 128], strides = [1, 1, 1]} : vector<7x7x128xf32> to vector<1x1x128xf32>
    %181 = vector.shape_cast %180 : vector<1x1x128xf32> to vector<128xf32>
    %182 = vector.shape_cast %181 : vector<128xf32> to vector<1x128xf32>
    %183 = vector.broadcast %182 : vector<1x128xf32> to vector<16x128xf32>
    %184 = arith.mulf %6, %183 : vector<16x128xf32>
    %185 = vector.extract_strided_slice %5 {offsets = [1, 4, 0], sizes = [1, 1, 128], strides = [1, 1, 1]} : vector<7x7x128xf32> to vector<1x1x128xf32>
    %186 = vector.shape_cast %185 : vector<1x1x128xf32> to vector<128xf32>
    %187 = vector.shape_cast %186 : vector<128xf32> to vector<1x128xf32>
    %188 = vector.broadcast %187 : vector<1x128xf32> to vector<16x128xf32>
    %189 = arith.mulf %7, %188 : vector<16x128xf32>
    %190 = vector.extract_strided_slice %5 {offsets = [2, 4, 0], sizes = [1, 1, 128], strides = [1, 1, 1]} : vector<7x7x128xf32> to vector<1x1x128xf32>
    %191 = vector.shape_cast %190 : vector<1x1x128xf32> to vector<128xf32>
    %192 = vector.shape_cast %191 : vector<128xf32> to vector<1x128xf32>
    %193 = vector.broadcast %192 : vector<1x128xf32> to vector<16x128xf32>
    %194 = arith.mulf %8, %193 : vector<16x128xf32>
    %195 = vector.extract_strided_slice %5 {offsets = [3, 4, 0], sizes = [1, 1, 128], strides = [1, 1, 1]} : vector<7x7x128xf32> to vector<1x1x128xf32>
    %196 = vector.shape_cast %195 : vector<1x1x128xf32> to vector<128xf32>
    %197 = vector.shape_cast %196 : vector<128xf32> to vector<1x128xf32>
    %198 = vector.broadcast %197 : vector<1x128xf32> to vector<16x128xf32>
    %199 = arith.mulf %9, %198 : vector<16x128xf32>
    %200 = vector.extract_strided_slice %5 {offsets = [4, 4, 0], sizes = [1, 1, 128], strides = [1, 1, 1]} : vector<7x7x128xf32> to vector<1x1x128xf32>
    %201 = vector.shape_cast %200 : vector<1x1x128xf32> to vector<128xf32>
    %202 = vector.shape_cast %201 : vector<128xf32> to vector<1x128xf32>
    %203 = vector.broadcast %202 : vector<1x128xf32> to vector<16x128xf32>
    %204 = arith.mulf %10, %203 : vector<16x128xf32>
    %205 = vector.extract_strided_slice %5 {offsets = [5, 4, 0], sizes = [1, 1, 128], strides = [1, 1, 1]} : vector<7x7x128xf32> to vector<1x1x128xf32>
    %206 = vector.shape_cast %205 : vector<1x1x128xf32> to vector<128xf32>
    %207 = vector.shape_cast %206 : vector<128xf32> to vector<1x128xf32>
    %208 = vector.broadcast %207 : vector<1x128xf32> to vector<16x128xf32>
    %209 = arith.mulf %11, %208 : vector<16x128xf32>
    %210 = vector.extract_strided_slice %5 {offsets = [6, 4, 0], sizes = [1, 1, 128], strides = [1, 1, 1]} : vector<7x7x128xf32> to vector<1x1x128xf32>
    %211 = vector.shape_cast %210 : vector<1x1x128xf32> to vector<128xf32>
    %212 = vector.shape_cast %211 : vector<128xf32> to vector<1x128xf32>
    %213 = vector.broadcast %212 : vector<1x128xf32> to vector<16x128xf32>
    %214 = arith.mulf %12, %213 : vector<16x128xf32>
    %215 = arith.addf %184, %189 : vector<16x128xf32>
    %216 = arith.addf %194, %199 : vector<16x128xf32>
    %217 = arith.addf %204, %209 : vector<16x128xf32>
    %218 = arith.addf %215, %216 : vector<16x128xf32>
    %219 = arith.addf %217, %214 : vector<16x128xf32>
    %220 = arith.addf %218, %219 : vector<16x128xf32>
    %c120_i32 = arith.constant 120 : i32
    %221 = tpu.dynamic_rotate %220 by %c120_i32 dim 1 : vector<16x128xf32>, i32 -> vector<16x128xf32>
    %222 = vector.extract_strided_slice %5 {offsets = [0, 5, 0], sizes = [1, 1, 128], strides = [1, 1, 1]} : vector<7x7x128xf32> to vector<1x1x128xf32>
    %223 = vector.shape_cast %222 : vector<1x1x128xf32> to vector<128xf32>
    %224 = vector.shape_cast %223 : vector<128xf32> to vector<1x128xf32>
    %225 = vector.broadcast %224 : vector<1x128xf32> to vector<16x128xf32>
    %226 = arith.mulf %6, %225 : vector<16x128xf32>
    %227 = vector.extract_strided_slice %5 {offsets = [1, 5, 0], sizes = [1, 1, 128], strides = [1, 1, 1]} : vector<7x7x128xf32> to vector<1x1x128xf32>
    %228 = vector.shape_cast %227 : vector<1x1x128xf32> to vector<128xf32>
    %229 = vector.shape_cast %228 : vector<128xf32> to vector<1x128xf32>
    %230 = vector.broadcast %229 : vector<1x128xf32> to vector<16x128xf32>
    %231 = arith.mulf %7, %230 : vector<16x128xf32>
    %232 = vector.extract_strided_slice %5 {offsets = [2, 5, 0], sizes = [1, 1, 128], strides = [1, 1, 1]} : vector<7x7x128xf32> to vector<1x1x128xf32>
    %233 = vector.shape_cast %232 : vector<1x1x128xf32> to vector<128xf32>
    %234 = vector.shape_cast %233 : vector<128xf32> to vector<1x128xf32>
    %235 = vector.broadcast %234 : vector<1x128xf32> to vector<16x128xf32>
    %236 = arith.mulf %8, %235 : vector<16x128xf32>
    %237 = vector.extract_strided_slice %5 {offsets = [3, 5, 0], sizes = [1, 1, 128], strides = [1, 1, 1]} : vector<7x7x128xf32> to vector<1x1x128xf32>
    %238 = vector.shape_cast %237 : vector<1x1x128xf32> to vector<128xf32>
    %239 = vector.shape_cast %238 : vector<128xf32> to vector<1x128xf32>
    %240 = vector.broadcast %239 : vector<1x128xf32> to vector<16x128xf32>
    %241 = arith.mulf %9, %240 : vector<16x128xf32>
    %242 = vector.extract_strided_slice %5 {offsets = [4, 5, 0], sizes = [1, 1, 128], strides = [1, 1, 1]} : vector<7x7x128xf32> to vector<1x1x128xf32>
    %243 = vector.shape_cast %242 : vector<1x1x128xf32> to vector<128xf32>
    %244 = vector.shape_cast %243 : vector<128xf32> to vector<1x128xf32>
    %245 = vector.broadcast %244 : vector<1x128xf32> to vector<16x128xf32>
    %246 = arith.mulf %10, %245 : vector<16x128xf32>
    %247 = vector.extract_strided_slice %5 {offsets = [5, 5, 0], sizes = [1, 1, 128], strides = [1, 1, 1]} : vector<7x7x128xf32> to vector<1x1x128xf32>
    %248 = vector.shape_cast %247 : vector<1x1x128xf32> to vector<128xf32>
    %249 = vector.shape_cast %248 : vector<128xf32> to vector<1x128xf32>
    %250 = vector.broadcast %249 : vector<1x128xf32> to vector<16x128xf32>
    %251 = arith.mulf %11, %250 : vector<16x128xf32>
    %252 = vector.extract_strided_slice %5 {offsets = [6, 5, 0], sizes = [1, 1, 128], strides = [1, 1, 1]} : vector<7x7x128xf32> to vector<1x1x128xf32>
    %253 = vector.shape_cast %252 : vector<1x1x128xf32> to vector<128xf32>
    %254 = vector.shape_cast %253 : vector<128xf32> to vector<1x128xf32>
    %255 = vector.broadcast %254 : vector<1x128xf32> to vector<16x128xf32>
    %256 = arith.mulf %12, %255 : vector<16x128xf32>
    %257 = arith.addf %226, %231 : vector<16x128xf32>
    %258 = arith.addf %236, %241 : vector<16x128xf32>
    %259 = arith.addf %246, %251 : vector<16x128xf32>
    %260 = arith.addf %257, %258 : vector<16x128xf32>
    %261 = arith.addf %259, %256 : vector<16x128xf32>
    %262 = arith.addf %260, %261 : vector<16x128xf32>
    %c112_i32 = arith.constant 112 : i32
    %263 = tpu.dynamic_rotate %262 by %c112_i32 dim 1 : vector<16x128xf32>, i32 -> vector<16x128xf32>
    %264 = vector.extract_strided_slice %5 {offsets = [0, 6, 0], sizes = [1, 1, 128], strides = [1, 1, 1]} : vector<7x7x128xf32> to vector<1x1x128xf32>
    %265 = vector.shape_cast %264 : vector<1x1x128xf32> to vector<128xf32>
    %266 = vector.shape_cast %265 : vector<128xf32> to vector<1x128xf32>
    %267 = vector.broadcast %266 : vector<1x128xf32> to vector<16x128xf32>
    %268 = arith.mulf %6, %267 : vector<16x128xf32>
    %269 = vector.extract_strided_slice %5 {offsets = [1, 6, 0], sizes = [1, 1, 128], strides = [1, 1, 1]} : vector<7x7x128xf32> to vector<1x1x128xf32>
    %270 = vector.shape_cast %269 : vector<1x1x128xf32> to vector<128xf32>
    %271 = vector.shape_cast %270 : vector<128xf32> to vector<1x128xf32>
    %272 = vector.broadcast %271 : vector<1x128xf32> to vector<16x128xf32>
    %273 = arith.mulf %7, %272 : vector<16x128xf32>
    %274 = vector.extract_strided_slice %5 {offsets = [2, 6, 0], sizes = [1, 1, 128], strides = [1, 1, 1]} : vector<7x7x128xf32> to vector<1x1x128xf32>
    %275 = vector.shape_cast %274 : vector<1x1x128xf32> to vector<128xf32>
    %276 = vector.shape_cast %275 : vector<128xf32> to vector<1x128xf32>
    %277 = vector.broadcast %276 : vector<1x128xf32> to vector<16x128xf32>
    %278 = arith.mulf %8, %277 : vector<16x128xf32>
    %279 = vector.extract_strided_slice %5 {offsets = [3, 6, 0], sizes = [1, 1, 128], strides = [1, 1, 1]} : vector<7x7x128xf32> to vector<1x1x128xf32>
    %280 = vector.shape_cast %279 : vector<1x1x128xf32> to vector<128xf32>
    %281 = vector.shape_cast %280 : vector<128xf32> to vector<1x128xf32>
    %282 = vector.broadcast %281 : vector<1x128xf32> to vector<16x128xf32>
    %283 = arith.mulf %9, %282 : vector<16x128xf32>
    %284 = vector.extract_strided_slice %5 {offsets = [4, 6, 0], sizes = [1, 1, 128], strides = [1, 1, 1]} : vector<7x7x128xf32> to vector<1x1x128xf32>
    %285 = vector.shape_cast %284 : vector<1x1x128xf32> to vector<128xf32>
    %286 = vector.shape_cast %285 : vector<128xf32> to vector<1x128xf32>
    %287 = vector.broadcast %286 : vector<1x128xf32> to vector<16x128xf32>
    %288 = arith.mulf %10, %287 : vector<16x128xf32>
    %289 = vector.extract_strided_slice %5 {offsets = [5, 6, 0], sizes = [1, 1, 128], strides = [1, 1, 1]} : vector<7x7x128xf32> to vector<1x1x128xf32>
    %290 = vector.shape_cast %289 : vector<1x1x128xf32> to vector<128xf32>
    %291 = vector.shape_cast %290 : vector<128xf32> to vector<1x128xf32>
    %292 = vector.broadcast %291 : vector<1x128xf32> to vector<16x128xf32>
    %293 = arith.mulf %11, %292 : vector<16x128xf32>
    %294 = vector.extract_strided_slice %5 {offsets = [6, 6, 0], sizes = [1, 1, 128], strides = [1, 1, 1]} : vector<7x7x128xf32> to vector<1x1x128xf32>
    %295 = vector.shape_cast %294 : vector<1x1x128xf32> to vector<128xf32>
    %296 = vector.shape_cast %295 : vector<128xf32> to vector<1x128xf32>
    %297 = vector.broadcast %296 : vector<1x128xf32> to vector<16x128xf32>
    %298 = arith.mulf %12, %297 : vector<16x128xf32>
    %299 = arith.addf %268, %273 : vector<16x128xf32>
    %300 = arith.addf %278, %283 : vector<16x128xf32>
    %301 = arith.addf %288, %293 : vector<16x128xf32>
    %302 = arith.addf %299, %300 : vector<16x128xf32>
    %303 = arith.addf %301, %298 : vector<16x128xf32>
    %304 = arith.addf %302, %303 : vector<16x128xf32>
    %c104_i32 = arith.constant 104 : i32
    %305 = tpu.dynamic_rotate %304 by %c104_i32 dim 1 : vector<16x128xf32>, i32 -> vector<16x128xf32>
    %306 = arith.addf %54, %96 : vector<16x128xf32>
    %307 = arith.addf %138, %179 : vector<16x128xf32>
    %308 = arith.addf %221, %263 : vector<16x128xf32>
    %309 = arith.addf %306, %307 : vector<16x128xf32>
    %310 = arith.addf %308, %305 : vector<16x128xf32>
    %311 = arith.addf %309, %310 : vector<16x128xf32>
    %c0_5 = arith.constant 0 : index
    %c0_6 = arith.constant 0 : index
    %312 = vector.load %arg4[%c0_5, %c0_6] : memref<128x512xf32, #tpu.memory_space<vmem>>, vector<128x512xf32>
    %cst = arith.constant dense<0.000000e+00> : vector<16x512xf32>
    %313 = tpu.matmul %311, %312, %cst {dimension_numbers = #tpu.dot_dimension_numbers<[1], [0], [0], [1], [0, 0, 1, 1], [], []>} : vector<16x128xf32>, vector<128x512xf32>, vector<16x512xf32> -> vector<16x512xf32>
    %c0_7 = arith.constant 0 : index
    %c0_8 = arith.constant 0 : index
    %314 = vector.load %arg5[%c0_7, %c0_8] : memref<1x512xf32, #tpu.memory_space<vmem>>, vector<1x512xf32>
    %315 = vector.broadcast %314 : vector<1x512xf32> to vector<16x512xf32>
    %316 = arith.addf %313, %315 : vector<16x512xf32>
    %cst_9 = arith.constant 3.000000e+00 : f32
    %317 = vector.broadcast %cst_9 : f32 to vector<16x512xf32>
    %318 = arith.addf %316, %317 : vector<16x512xf32>
    %cst_10 = arith.constant 0.000000e+00 : f32
    %cst_11 = arith.constant 6.000000e+00 : f32
    %319 = vector.broadcast %cst_10 : f32 to vector<16x512xf32>
    %320 = arith.maximumf %319, %318 : vector<16x512xf32>
    %321 = vector.broadcast %cst_11 : f32 to vector<16x512xf32>
    %322 = arith.minimumf %321, %320 : vector<16x512xf32>
    %323 = arith.mulf %316, %322 : vector<16x512xf32>
    %c0_12 = arith.constant 0 : index
    %c0_13 = arith.constant 0 : index
    %324 = vector.load %arg6[%c0_12, %c0_13] : memref<512x128xf32, #tpu.memory_space<vmem>>, vector<512x128xf32>
    %cst_14 = arith.constant dense<0.000000e+00> : vector<16x128xf32>
    %325 = tpu.matmul %323, %324, %cst_14 {dimension_numbers = #tpu.dot_dimension_numbers<[1], [0], [0], [1], [0, 0, 1, 1], [], []>} : vector<16x512xf32>, vector<512x128xf32>, vector<16x128xf32> -> vector<16x128xf32>
    %c0_15 = arith.constant 0 : index
    %c0_16 = arith.constant 0 : index
    %326 = vector.load %arg7[%c0_15, %c0_16] : memref<1x128xf32, #tpu.memory_space<vmem>>, vector<1x128xf32>
    %327 = vector.broadcast %326 : vector<1x128xf32> to vector<16x128xf32>
    %328 = arith.addf %325, %327 : vector<16x128xf32>
    %329 = arith.addf %9, %328 : vector<16x128xf32>
    %c0_17 = arith.constant 0 : index
    %c0_18 = arith.constant 0 : index
    %c0_19 = arith.constant 0 : index
    %330 = vector.load %arg8[%c0_17, %c0_18, %c0_19] : memref<1x16x128xf32, #tpu.memory_space<vmem>>, vector<1x16x128xf32>
    %331 = vector.shape_cast %330 : vector<1x16x128xf32> to vector<16x128xf32>
    %332 = vector.shape_cast %329 : vector<16x128xf32> to vector<1x16x128xf32>
    tpu.vector_store %arg8[%c0_17, %c0_18, %c0_19], %332 {strides = array<i32>} : memref<1x16x128xf32, #tpu.memory_space<vmem>>, vector<1x16x128xf32>,
    return
  }
  func.func @transform_0(%arg0: i32, %arg1: i32) -> (i32, i32, i32) {
    %c0_i32 = arith.constant 0 : i32
    %c0_i32_0 = arith.constant 0 : i32
    %c0_i32_1 = arith.constant 0 : i32
    return %arg0, %c0_i32, %c0_i32_0 : i32, i32, i32
  }
  func.func @transform_1(%arg0: i32, %arg1: i32) -> (i32, i32, i32) {
    %c0_i32 = arith.constant 0 : i32
    %c0_i32_0 = arith.constant 0 : i32
    %c0_i32_1 = arith.constant 0 : i32
    %c0_i32_2 = arith.constant 0 : i32
    return %c0_i32, %c0_i32_0, %c0_i32_1 : i32, i32, i32
  }
  func.func @transform_2(%arg0: i32, %arg1: i32) -> (i32, i32) {
    %c0_i32 = arith.constant 0 : i32
    %c0_i32_0 = arith.constant 0 : i32
    %c0_i32_1 = arith.constant 0 : i32
    return %c0_i32, %c0_i32_0 : i32, i32
  }
  func.func @transform_3(%arg0: i32, %arg1: i32) -> (i32, i32) {
    %c0_i32 = arith.constant 0 : i32
    %c0_i32_0 = arith.constant 0 : i32
    %c0_i32_1 = arith.constant 0 : i32
    return %c0_i32, %c0_i32_0 : i32, i32
  }
  func.func @transform_4(%arg0: i32, %arg1: i32) -> (i32, i32) {
    %c0_i32 = arith.constant 0 : i32
    %c0_i32_0 = arith.constant 0 : i32
    %c0_i32_1 = arith.constant 0 : i32
    return %c0_i32, %c0_i32_0 : i32, i32
  }
  func.func @transform_5(%arg0: i32, %arg1: i32) -> (i32, i32) {
    %c0_i32 = arith.constant 0 : i32
    %c0_i32_0 = arith.constant 0 : i32
    %c0_i32_1 = arith.constant 0 : i32
    return %c0_i32, %c0_i32_0 : i32, i32
  }
  func.func @transform_6(%arg0: i32, %arg1: i32) -> (i32, i32, i32) {
    %c0_i32 = arith.constant 0 : i32
    %c0_i32_0 = arith.constant 0 : i32
    return %arg0, %arg1, %c0_i32 : i32, i32, i32
  }
}

</mosaic_0001>

<bundles_post_ra>
// kernel: tile.19
= control target key start
LH: loop header
LB: loop body
LE: loop exit
PB: predicated region body
PF: predicated region fallthrough
CT: control target
= control target key end

     0   :  { %vm6_vm0 = vcmask 1043458   ;;  %s190_s6 = smov 3  ;;  %vm10_vm1 = vcmask 1045508   ;;  %vm14_vm2 = vcmask 1047558   ;;  %s193_s9 = smov 12  ;;  %vm274_vm3 = vcmask 1044484   ;;  %s5749_s0 = inlined_call_operand.vmem [shape: f32[7,7,16,8], index: 0, kind: input, shape index: {}]   ;;  %s5750_s1 = inlined_call_operand.vmem [shape: f32[7,7,128], index: 1, kind: output, shape index: {}]  }
   0x1   :  { %v2569_v0 = vld [vmem:[%s5749_s0 + $0x8f] ss:$16 sm:%s190_s6]   ;;  %s198_s10 = smov 48  ;;  %s203_s15 = smov 192  ;;  %vm279_vm4 = vcmask 1046533   ;;  %vm283_vm5 = vcmask 1047559  }
   0x2   :  { %v2570_v1 = vld [vmem:[%s5749_s0 + $0x8f] ss:$16 sm:%s193_s9]   ;;  %s141_s16 = smov 3  ;;  %s144_s21 = smov 12  ;;  %vm16_vm6 = vcmask 64512   ;;  %vm160_vm7 = vcmask 1048512  }
   0x3   :  { %v2571_v2 = vld [vmem:[%s5749_s0 + $0x8f] ss:$16 sm:%s198_s10]   ;;  %v196_v3 = vsel %vm6_vm0, %v2570_v1, %v2569_v0  ;;  %s149_s22 = smov 48  ;;  %s154_s27 = smov 192  ;;  %vm319_vm8 = vcmask 982912   ;;  %vm478_vm9 = vcmask 917312  }
   0x4   :  { %v2572_v4 = vld [vmem:[%s5749_s0 + $0x8f] ss:$16 sm:%s203_s15]   ;;  %v201_v6 = vsel %vm10_vm1, %v2571_v2, %v196_v3  ;;  %s215_s28 = smov 3  ;;  %s218_s4 = smov 12  ;;  %vm637_vm10 = vcmask 851712   ;;  %vm796_vm11 = vcmask 786112  }
   0x5   :  { %v2558_v5 = vld [vmem:[%s5749_s0 + $0xf] ss:$16 sm:%s141_s16]   ;;  %v206_v9 = vsel %vm14_vm2, %v2572_v4, %v201_v6  ;;  %s223_s5 = smov 48  ;;  %s3143_s6 = smov 120   ;;  %vm955_vm12 = vcmask 720512   ;;  %vm1114_vm13 = vcmask 654912  }
   0x6   :  { %v2559_v7 = vld [vmem:[%s5749_s0 + $0xf] ss:$16 sm:%s144_s21]   ;;  %207 = vrot.lane.b32.xlu1 %v206_v9, %s3143_s6  ;;  %s228_s9 = smov 192  ;;  %s165_s10 = smov 3  ;;  %vm1273_vm14 = vcmask 589312   ;;  %vm1432_vm15 = vcmask 523712  }
   0x7   :  { %v2560_v8 = vld [vmem:[%s5749_s0 + $0xf] ss:$16 sm:%s149_s22]   ;;  %v147_v10 = vsel %vm6_vm0, %v2559_v7, %v2558_v5  ;;  %s168_s15 = smov 12  ;;  %s173_s16 = smov 48 }
   0x8   :  { %v2561_v11 = vld [vmem:[%s5749_s0 + $0xf] ss:$16 sm:%s154_s27]   ;;  %v152_v13 = vsel %vm10_vm1, %v2560_v8, %v147_v10  ;;  %s178_s19 = smov 192  ;;  %s300_s20 = smov 3  ;;  %v2627_v10 = vld [vmem:[%s5749_s0 + $0x30a] sm:$0x10]  }
   0x9   :  { %v2575_v12 = vld [vmem:[%s5749_s0 + $0x24f] ss:$16 sm:%s215_s28]   ;;  %v157_v15 = vsel %vm14_vm2, %v2561_v11, %v152_v13  ;;  %s303_s25 = smov 12  ;;  %s308_s26 = smov 48  ;;  %v2596_v25 = vld [vmem:[%s5749_s0 + $0xe] ss:$16 sm:%s300_s20]  }
   0xa   :  { %v2576_v14 = vld [vmem:[%s5749_s0 + $0x24f] ss:$16 sm:%s218_s4]   ;;  %158 = vrot.lane.b32.xlu0 %v157_v15, %s3143_s6  ;;  %s240_s4 = smov 3  ;;  %s248_s11 = smov 48 }
   0xb   :  { %v221_v16 = vsel %vm6_vm0, %v2576_v14, %v2575_v12  ;;  %v2577_v17 = vld [vmem:[%s5749_s0 + $0x24f] ss:$16 sm:%s223_s5]   ;;  %v2597_v28 = vld [vmem:[%s5749_s0 + $0xe] ss:$16 sm:%s303_s25]   ;;  %s243_s5 = smov 12  ;;  %s253_s12 = smov 192 }
   0xc   :  { %v2578_v18 = vld [vmem:[%s5749_s0 + $0x24f] ss:$16 sm:%s228_s9]   ;;  %v226_v19 = vsel %vm10_vm1, %v2577_v17, %v221_v16  ;;  %v2598_v29 = vld [vmem:[%s5749_s0 + $0xe] ss:$16 sm:%s308_s26]   ;;  %v306_v32 = vsel %vm6_vm0, %v2597_v28, %v2596_v25  ;;  %s313_s13 = smov 192  ;;  %s374_s20 = smov 3 }
   0xd   :  { %v2563_v20 = vld [vmem:[%s5749_s0 + $0x1cf] ss:$16 sm:%s165_s10]   ;;  %v231_v26 = vsel %vm14_vm2, %v2578_v18, %v226_v19  ;;  %s377_s21 = smov 12  ;;  %s3255_s22 = smov 48  ;;  %v311_v38 = vsel %vm10_vm1, %v2598_v29, %v306_v32  ;;  %v2599_v39 = vld [vmem:[%s5749_s0 + $0xe] ss:$16 sm:%s313_s13]  }
   0xe   :  { %v2564_v21 = vld [vmem:[%s5749_s0 + $0x1cf] ss:$16 sm:%s168_s15]   ;;  %232 = vrot.lane.b32.xlu1 %v231_v26, %s3143_s6  ;;  %s349_s25 = smov 3  ;;  %s352_s26 = smov 12  ;;  %v316_v44 = vsel %vm14_vm2, %v2599_v39, %v311_v38  ;;  %v2632_v19 = vld [vmem:[%s5749_s0 + $0x1be] sm:$0x1]  }
   0xf   :  { %v2565_v22 = vld [vmem:[%s5749_s0 + $0x1cf] ss:$16 sm:%s173_s16]   ;;  %v171_v23 = vsel %vm6_vm0, %v2564_v21, %v2563_v20  ;;  %s265_s27 = smov 3  ;;  %s268_s28 = smov 12  ;;  %v2613_v42 = vld [vmem:[%s5749_s0 + $0x24e] ss:$16 sm:%s374_s20]  }
  0x10   :  { %v2566_v24 = vld [vmem:[%s5749_s0 + $0x1cf] ss:$16 sm:%s178_s19]   ;;  %v176_v27 = vsel %vm10_vm1, %v2565_v22, %v171_v23  ;;  %v2614_v43 = vld [vmem:[%s5749_s0 + $0x24e] ss:$16 sm:%s377_s21]   ;;  %s387_s7 = smov 192  ;;  %s277_s8 = smov 96 }
  0x11   :  { %v2581_v30 = vld [vmem:[%s5749_s0 + $0x10f] ss:$16 sm:%s240_s4]   ;;  %v181_v31 = vsel %vm14_vm2, %v2566_v24, %v176_v27  ;;  %v2607_v46 = vld [vmem:[%s5749_s0 + $0x8e] ss:$16 sm:%s349_s25]   ;;  %s357_s15 = smov 48  ;;  %s424_s18 = smov 3  ;;  %v380_v51 = vsel %vm6_vm0, %v2614_v43, %v2613_v42 }
  0x12   :  { %v2582_v33 = vld [vmem:[%s5749_s0 + $0x10f] ss:$16 sm:%s243_s5]   ;;  %182 = vrot.lane.b32.xlu0 %v181_v31, %s3143_s6  ;;  %s427_s24 = smov 12  ;;  %s324_s25 = smov 3  ;;  %v2629_v20 = vld [vmem:[%s5749_s0 + $0x1a7] sm:$0x80]  }
  0x13   :  { %v2583_v34 = vld [vmem:[%s5749_s0 + $0x10f] ss:$16 sm:%s248_s11]   ;;  %v246_v35 = vsel %vm6_vm0, %v2582_v33, %v2581_v30  ;;  %v2608_v47 = vld [vmem:[%s5749_s0 + $0x8e] ss:$16 sm:%s352_s26]   ;;  %s327_s29 = smov 12  ;;  %s3144_s30 = smov 112  }
  0x14   :  { %v2584_v36 = vld [vmem:[%s5749_s0 + $0x10f] ss:$16 sm:%s253_s12]   ;;  %v251_v37 = vsel %vm10_vm1, %v2583_v34, %v246_v35  ;;  %v2615_v52 = vld [vmem:[%s5749_s0 + $0x24e] ss:$16 sm:%s3255_s22]   ;;  %v355_v58 = vsel %vm6_vm0, %v2608_v47, %v2607_v46  ;;  %s337_s17 = smov 192  ;;  %s436_s21 = smov 96 }
  0x15   :  { %v256_v40 = vsel %vm14_vm2, %v2584_v36, %v251_v37  ;;  %v2589_v41 = vld [vmem:[%s5749_s0 + $0x30b] sm:$0x10]   ;;  %v2594_v45 = vld [vmem:[%s5749_s0 + $0x1bf] sm:$0x1]   ;;  %v2616_v55 = vld [vmem:[%s5749_s0 + $0x24e] ss:$16 sm:%s387_s7]   ;;  %v385_v63 = vsel %vm10_vm1, %v2615_v52, %v380_v51 }
  0x16   :  { %257 = vrot.lane.b32.xlu2 %v256_v40, %s3143_s6  ;;  %v2591_v48 = vld [vmem:[%s5749_s0 + $0x1a8] sm:$0x80]   ;;  %317 = vrot.lane.b32.xlu1 %v316_v44, %s3144_s30  ;;  %s332_s7 = smov 48  ;;  %v390_v6 = vsel %vm14_vm2, %v2616_v55, %v385_v63  ;;  %s402_s22 = smov 12 }
  0x17   :  { %v2587_v49 = vld [vmem:[%s5749_s0 + $0x2cf] ss:$16 sm:%s265_s27]   ;;  %v2609_v56 = vld [vmem:[%s5749_s0 + $0x8e] ss:$16 sm:%s357_s15]   ;;  %s399_s27 = smov 3  ;;  %s508_s3 = smov 3 }
  0x18   :  { %v2588_v50 = vld [vmem:[%s5749_s0 + $0x2cf] ss:$16 sm:%s268_s28]   ;;  %v2625_v60 = vld [vmem:[%s5749_s0 + $0x2ce] ss:$16 sm:%s424_s18]   ;;  %v360_v4 = vsel %vm10_vm1, %v2609_v56, %v355_v58  ;;  %s407_s28 = smov 48  ;;  %s511_s4 = smov 12 }
  0x19   :  { %v271_v53 = vsel %vm6_vm0, %v2588_v50, %v2587_v49  ;;  %v2590_v54 = vld [vmem:[%s5749_s0 + $0x13f] ss:$16 sm:%s277_s8]   ;;  %s362_s8 = smov 192  ;;  %v2626_v61 = vld [vmem:[%s5749_s0 + $0x2ce] ss:$16 sm:%s427_s24]   ;;  %s516_s10 = smov 48 }
  0x1a   :  { %v275_v57 = vsel %vm274_vm3, %v2589_v41, %v271_v53  ;;  %v2601_v62 = vld [vmem:[%s5749_s0 + $0x1ce] ss:$16 sm:%s324_s25]   ;;  %294 = vrot.lane.b32.xlu0 %v2594_v45, %s3143_s6  ;;  %v430_v9 = vsel %vm6_vm0, %v2626_v61, %v2625_v60  ;;  %s412_s13 = smov 192  ;;  %s486_s18 = smov 12  ;;  %v2665_v45 = vld [vmem:[%s5749_s0 + $0x309] sm:$0x10]  }
  0x1b   :  { %v280_v59 = vsel %vm279_vm4, %v2590_v54, %v275_v57  ;;  %v2602_v1 = vld [vmem:[%s5749_s0 + $0x1ce] ss:$16 sm:%s327_s29]   ;;  %v434_v14 = vsel %vm274_vm3, %v2627_v10, %v430_v9  ;;  %v2645_v22 = vld [vmem:[%s5749_s0 + $0x8d] ss:$16 sm:%s508_s3]   ;;  %s491_s24 = smov 48  ;;  %s459_s25 = smov 3 }
  0x1c   :  { %v284_v0 = vsel %vm283_vm5, %v2591_v48, %v280_v59  ;;  %v330_v2 = vsel %vm6_vm0, %v2602_v1, %v2601_v62  ;;  %v2603_v3 = vld [vmem:[%s5749_s0 + $0x1ce] ss:$16 sm:%s332_s7]   ;;  %v2646_v23 = vld [vmem:[%s5749_s0 + $0x8d] ss:$16 sm:%s511_s4]   ;;  %s462_s2 = smov 12  ;;  %s586_s9 = smov 12 }
  0x1d   :  { %v2610_v5 = vld [vmem:[%s5749_s0 + $0x8e] ss:$16 sm:%s362_s8]   ;;  %v335_v7 = vsel %vm10_vm1, %v2603_v3, %v330_v2  ;;  %v2647_v24 = vld [vmem:[%s5749_s0 + $0x8d] ss:$16 sm:%s516_s10]   ;;  %s583_s8 = smov 3  ;;  %v514_v30 = vsel %vm6_vm0, %v2646_v23, %v2645_v22  ;;  %s467_s14 = smov 48 }
  0x1e   :  { %285 = vrot.lane.b32.xlu2 %v284_v0, %s3143_s6  ;;  %v2604_v8 = vld [vmem:[%s5749_s0 + $0x1ce] ss:$16 sm:%s337_s17]   ;;  %v365_v11 = vsel %vm14_vm2, %v2610_v5, %v360_v4  ;;  %391 = vrot.lane.b32.xlu1 %v390_v6, %s3144_s30  ;;  %s483_s6 = smov 3  ;;  %v519_v39 = vsel %vm10_vm1, %v2647_v24, %v514_v30  ;;  %s533_s4 = smov 3 }
  0x1f   :  { %v2628_v12 = vld [vmem:[%s5749_s0 + $0x13e] ss:$16 sm:%s436_s21]   ;;  %v340_v13 = vsel %vm14_vm2, %v2604_v8, %v335_v7  ;;  %v2639_v27 = vld [vmem:[%s5749_s0 + $0x1cd] ss:$16 sm:%s483_s6]   ;;  %s536_s5 = smov 12  ;;  %s566_s15 = smov 48 }
  0x20   :  { %v2619_v15 = vld [vmem:[%s5749_s0 + $0x10e] ss:$16 sm:%s399_s27]   ;;  %v439_v21 = vsel %vm279_vm4, %v2628_v12, %v434_v14  ;;  %v2640_v28 = vld [vmem:[%s5749_s0 + $0x1cd] ss:$16 sm:%s486_s18]   ;;  %s496_s18 = smov 192  ;;  %s472_s27 = smov 192 }
  0x21   :  { %v2620_v16 = vld [vmem:[%s5749_s0 + $0x10e] ss:$16 sm:%s402_s22]   ;;  %s521_s22 = smov 192  ;;  %v443_v29 = vsel %vm283_vm5, %v2629_v20, %v439_v21  ;;  %v2641_v31 = vld [vmem:[%s5749_s0 + $0x1cd] ss:$16 sm:%s491_s24]   ;;  %v489_v36 = vsel %vm6_vm0, %v2640_v28, %v2639_v27  ;;  %s595_s24 = smov 96 }
  0x22   :  { %366 = vrot.lane.b32.xlu0 %v365_v11, %s3144_s30  ;;  %v405_v17 = vsel %vm6_vm0, %v2620_v16, %v2619_v15  ;;  %v2621_v18 = vld [vmem:[%s5749_s0 + $0x10e] ss:$16 sm:%s407_s28]   ;;  %v494_v42 = vsel %vm10_vm1, %v2641_v31, %v489_v36  ;;  %s541_s19 = smov 48  ;;  %s3145_s20 = smov 104   ;;  %v2667_v60 = vld [vmem:[%s5749_s0 + $0x1a6] sm:$0x80]  }
  0x23   :  { %v410_v25 = vsel %vm10_vm1, %v2621_v18, %v405_v17  ;;  %v2622_v26 = vld [vmem:[%s5749_s0 + $0x10e] ss:$16 sm:%s412_s13]   ;;  %v2634_v32 = vld [vmem:[%s5749_s0 + $0xd] ss:$16 sm:%s459_s25]   ;;  %s571_s21 = smov 192  ;;  %s642_s25 = smov 3 }
  0x24   :  { %v2648_v33 = vld [vmem:[%s5749_s0 + $0x8d] ss:$16 sm:%s521_s22]   ;;  %v415_v34 = vsel %vm14_vm2, %v2622_v26, %v410_v25  ;;  %s561_s22 = smov 12  ;;  %s645_s26 = smov 12  ;;  %v2677_v1 = vld [vmem:[%s5749_s0 + $0x1cc] ss:$16 sm:%s642_s25]  }
  0x25   :  { %v2635_v35 = vld [vmem:[%s5749_s0 + $0xd] ss:$16 sm:%s462_s2]   ;;  %v524_v46 = vsel %vm14_vm2, %v2648_v33, %v519_v39  ;;  %s546_s29 = smov 192  ;;  %v2678_v2 = vld [vmem:[%s5749_s0 + $0x1cc] ss:$16 sm:%s645_s26]   ;;  %s650_s11 = smov 48 }
  0x26   :  { %341 = vrot.lane.b32.xlu2 %v340_v13, %s3144_s30  ;;  %453 = vrot.lane.b32.xlu1 %v2632_v19, %s3144_s30  ;;  %v2663_v37 = vld [vmem:[%s5749_s0 + $0x2cd] ss:$16 sm:%s583_s8]   ;;  %v465_v40 = vsel %vm6_vm0, %v2635_v35, %v2634_v32  ;;  %s626_s6 = smov 48  ;;  %v648_v9 = vsel %vm6_vm0, %v2678_v2, %v2677_v1  ;;  %s631_s23 = smov 192 }
  0x27   :  { %v2664_v38 = vld [vmem:[%s5749_s0 + $0x2cd] ss:$16 sm:%s586_s9]   ;;  %v2679_v10 = vld [vmem:[%s5749_s0 + $0x1cc] ss:$16 sm:%s650_s11]   ;;  %s717_s26 = smov 3  ;;  %s725_s28 = smov 48 }
  0x28   :  { %v2636_v41 = vld [vmem:[%s5749_s0 + $0xd] ss:$16 sm:%s467_s14]   ;;  %v589_v44 = vsel %vm6_vm0, %v2664_v38, %v2663_v37  ;;  %v2674_v13 = vld [vmem:[%s5749_s0 + $0xc] ss:$16 sm:%s626_s6]   ;;  %v653_v14 = vsel %vm10_vm1, %v2679_v10, %v648_v9  ;;  %s692_s3 = smov 3  ;;  %s667_s10 = smov 3 }
  0x29   :  { %v2642_v43 = vld [vmem:[%s5749_s0 + $0x1cd] ss:$16 sm:%s496_s18]   ;;  %v470_v48 = vsel %vm10_vm1, %v2636_v41, %v465_v40  ;;  %v593_v53 = vsel %vm274_vm3, %v2665_v45, %v589_v44  ;;  %v2675_v16 = vld [vmem:[%s5749_s0 + $0xc] ss:$16 sm:%s631_s23]   ;;  %s670_s11 = smov 12  ;;  %s730_s14 = smov 192 }
  0x2a   :  { %444 = vrot.lane.b32.xlu0 %v443_v29, %s3144_s30  ;;  %v2666_v47 = vld [vmem:[%s5749_s0 + $0x13d] ss:$16 sm:%s595_s24]   ;;  %v499_v52 = vsel %vm14_vm2, %v2642_v43, %v494_v42  ;;  %s700_s18 = smov 48  ;;  %s742_s7 = smov 3 }
  0x2b   :  { %v2637_v49 = vld [vmem:[%s5749_s0 + $0xd] ss:$16 sm:%s472_s27]   ;;  %v598_v59 = vsel %vm279_vm4, %v2666_v47, %v593_v53  ;;  %s720_s27 = smov 12  ;;  %v2695_v18 = vld [vmem:[%s5749_s0 + $0x10c] ss:$16 sm:%s717_s26]   ;;  %s745_s8 = smov 12 }
  0x2c   :  { %v2658_v51 = vld [vmem:[%s5749_s0 + $0x10d] ss:$16 sm:%s561_s22]   ;;  %v475_v56 = vsel %vm14_vm2, %v2637_v49, %v470_v48  ;;  %v602_v3 = vsel %vm283_vm5, %v2667_v60, %v598_v59  ;;  %v2696_v19 = vld [vmem:[%s5749_s0 + $0x10c] ss:$16 sm:%s720_s27]   ;;  %s675_s27 = smov 48  ;;  %s785_s17 = smov 48 }
  0x2d   :  { %v2651_v54 = vld [vmem:[%s5749_s0 + $0x24d] ss:$16 sm:%s533_s4]   ;;  %s618_s4 = smov 3  ;;  %v2697_v21 = vld [vmem:[%s5749_s0 + $0x10c] ss:$16 sm:%s725_s28]   ;;  %v723_v25 = vsel %vm6_vm0, %v2696_v19, %v2695_v18  ;;  %s790_s25 = smov 192 }
  0x2e   :  { %416 = vrot.lane.b32.xlu2 %v415_v34, %s3144_s30  ;;  %s558_s30 = smov 3  ;;  %v2652_v55 = vld [vmem:[%s5749_s0 + $0x24d] ss:$16 sm:%s536_s5]   ;;  %525 = vrot.lane.b32.xlu1 %v524_v46, %s3145_s20  ;;  %s621_s5 = smov 12  ;;  %v728_v32 = vsel %vm10_vm1, %v2697_v21, %v723_v25 }
  0x2f   :  { %v2657_v50 = vld [vmem:[%s5749_s0 + $0x10d] ss:$16 sm:%s558_s30]   ;;  %v539_v61 = vsel %vm6_vm0, %v2652_v55, %v2651_v54  ;;  %v2672_v6 = vld [vmem:[%s5749_s0 + $0xc] ss:$16 sm:%s618_s4]   ;;  %s695_s4 = smov 12  ;;  %s3146_s30 = smov 96  }
  0x30   :  { %v564_v57 = vsel %vm6_vm0, %v2658_v51, %v2657_v50  ;;  %v2659_v58 = vld [vmem:[%s5749_s0 + $0x10d] ss:$16 sm:%s566_s15]   ;;  %v2673_v7 = vld [vmem:[%s5749_s0 + $0xc] ss:$16 sm:%s621_s5]   ;;  %s680_s15 = smov 192  ;;  %s854_s5 = smov 12 }
  0x31   :  { %v2653_v62 = vld [vmem:[%s5749_s0 + $0x24d] ss:$16 sm:%s541_s19]   ;;  %v569_v0 = vsel %vm10_vm1, %v2659_v58, %v564_v57  ;;  %v624_v12 = vsel %vm6_vm0, %v2673_v7, %v2672_v6  ;;  %v2689_v22 = vld [vmem:[%s5749_s0 + $0x24c] ss:$16 sm:%s692_s3]   ;;  %s705_s19 = smov 192  ;;  %s829_s12 = smov 12 }
  0x32   :  { %500 = vrot.lane.b32.xlu0 %v499_v52, %s3145_s20  ;;  %v2660_v63 = vld [vmem:[%s5749_s0 + $0x10d] ss:$16 sm:%s571_s21]   ;;  %v544_v4 = vsel %vm10_vm1, %v2653_v62, %v539_v61  ;;  %s655_s21 = smov 192  ;;  %v629_v17 = vsel %vm10_vm1, %v2674_v13, %v624_v12  ;;  %v2703_v48 = vld [vmem:[%s5749_s0 + $0x308] sm:$0x10]   ;;  %s801_s16 = smov 3 }
  0x33   :  { %v2654_v5 = vld [vmem:[%s5749_s0 + $0x24d] ss:$16 sm:%s546_s29]   ;;  %v574_v8 = vsel %vm14_vm2, %v2660_v63, %v569_v0  ;;  %v2680_v15 = vld [vmem:[%s5749_s0 + $0x1cc] ss:$16 sm:%s655_s21]   ;;  %v634_v24 = vsel %vm14_vm2, %v2675_v16, %v629_v17  ;;  %s777_s21 = smov 3  ;;  %s780_s29 = smov 12 }
  0x34   :  { %v549_v11 = vsel %vm14_vm2, %v2654_v5, %v544_v4  ;;  %v658_v20 = vsel %vm14_vm2, %v2680_v15, %v653_v14  ;;  %v2690_v23 = vld [vmem:[%s5749_s0 + $0x24c] ss:$16 sm:%s695_s4]   ;;  %v2670_v28 = vld [vmem:[%s5749_s0 + $0x1bd] sm:$0x1]   ;;  %s851_s4 = smov 3  ;;  %s834_s23 = smov 48 }
  0x35   :  { %v2683_v26 = vld [vmem:[%s5749_s0 + $0x8c] ss:$16 sm:%s667_s10]   ;;  %v698_v30 = vsel %vm6_vm0, %v2690_v23, %v2689_v22  ;;  %v2710_v34 = vld [vmem:[%s5749_s0 + $0xb] ss:$16 sm:%s777_s21]   ;;  %s3604_s24 = smov 192  ;;  %s901_s2 = smov 3 }
  0x36   :  { %476 = vrot.lane.b32.xlu2 %v475_v56, %s3145_s20  ;;  %603 = vrot.lane.b32.xlu1 %v602_v3, %s3145_s20  ;;  %v2684_v27 = vld [vmem:[%s5749_s0 + $0x8c] ss:$16 sm:%s670_s11]   ;;  %s826_s11 = smov 3  ;;  %s904_s3 = smov 12 }
  0x37   :  { %v2698_v29 = vld [vmem:[%s5749_s0 + $0x10c] ss:$16 sm:%s730_s14]   ;;  %v673_v35 = vsel %vm6_vm0, %v2684_v27, %v2683_v26  ;;  %v2711_v37 = vld [vmem:[%s5749_s0 + $0xb] ss:$16 sm:%s780_s29]   ;;  %s754_s29 = smov 96  ;;  %s3651_s26 = smov 3 }
  0x38   :  { %v2691_v31 = vld [vmem:[%s5749_s0 + $0x24c] ss:$16 sm:%s700_s18]   ;;  %v733_v41 = vsel %vm14_vm2, %v2698_v29, %v728_v32  ;;  %v783_v45 = vsel %vm6_vm0, %v2711_v37, %v2710_v34  ;;  %v2712_v46 = vld [vmem:[%s5749_s0 + $0xb] ss:$16 sm:%s785_s17]   ;;  %s804_s17 = smov 12  ;;  %s3639_s18 = smov 12 }
  0x39   :  { %v2692_v33 = vld [vmem:[%s5749_s0 + $0x24c] ss:$16 sm:%s705_s19]   ;;  %v703_v38 = vsel %vm10_vm1, %v2691_v31, %v698_v30  ;;  %v2713_v50 = vld [vmem:[%s5749_s0 + $0xb] ss:$16 sm:%s790_s25]   ;;  %v788_v51 = vsel %vm10_vm1, %v2712_v46, %v783_v45  ;;  %s3641_s19 = smov 48  ;;  %s3649_s25 = smov 192 }
  0x3a   :  { %575 = vrot.lane.b32.xlu0 %v574_v8, %s3145_s20  ;;  %v2685_v36 = vld [vmem:[%s5749_s0 + $0x8c] ss:$16 sm:%s675_s27]   ;;  %v708_v44 = vsel %vm14_vm2, %v2692_v33, %v703_v38  ;;  %v793_v56 = vsel %vm14_vm2, %v2713_v50, %v788_v51  ;;  %s3657_s22 = smov 12  ;;  %s3659_s28 = smov 48  ;;  %v2741_v17 = vld [vmem:[%s5749_s0 + $0x307] sm:$0x10]  }
  0x3b   :  { %v2701_v39 = vld [vmem:[%s5749_s0 + $0x2cc] ss:$16 sm:%s742_s7]   ;;  %v678_v42 = vsel %vm10_vm1, %v2685_v36, %v673_v35  ;;  %s859_s7 = smov 48  ;;  %v2727_v54 = vld [vmem:[%s5749_s0 + $0x24b] ss:$16 sm:%s851_s4]   ;;  %s3617_s4 = smov 96 }
  0x3c   :  { %v2702_v40 = vld [vmem:[%s5749_s0 + $0x2cc] ss:$16 sm:%s745_s8]   ;;  %s864_s8 = smov 192  ;;  %v2728_v55 = vld [vmem:[%s5749_s0 + $0x24b] ss:$16 sm:%s854_s5]   ;;  %s884_s9 = smov 48 }
  0x3d   :  { %v2686_v43 = vld [vmem:[%s5749_s0 + $0x8c] ss:$16 sm:%s680_s15]   ;;  %v748_v47 = vsel %vm6_vm0, %v2702_v40, %v2701_v39  ;;  %v2729_v58 = vld [vmem:[%s5749_s0 + $0x24b] ss:$16 sm:%s859_s7]   ;;  %v857_v63 = vsel %vm6_vm0, %v2728_v55, %v2727_v54  ;;  %s3630_s15 = smov 3  ;;  %s3671_s10 = smov 192 }
  0x3e   :  { %550 = vrot.lane.b32.xlu2 %v549_v11, %s3145_s20  ;;  %659 = vrot.lane.b32.xlu1 %v658_v20, %s3146_s30  ;;  %v683_v49 = vsel %vm14_vm2, %v2686_v43, %v678_v42  ;;  %v752_v52 = vsel %vm274_vm3, %v2703_v48, %v748_v47  ;;  %v2704_v53 = vld [vmem:[%s5749_s0 + $0x13c] ss:$16 sm:%s754_s29]   ;;  %v862_v7 = vsel %vm10_vm1, %v2729_v58, %v857_v63  ;;  %s3677_s14 = smov 3  ;;  %s3686_s21 = smov 3 }
  0x3f   :  { %v2708_v57 = vld [vmem:[%s5749_s0 + $0x1bc] sm:$0x1]   ;;  %v757_v59 = vsel %vm279_vm4, %v2704_v53, %v752_v52  ;;  %v2705_v60 = vld [vmem:[%s5749_s0 + $0x1a5] sm:$0x80]   ;;  %v2721_v61 = vld [vmem:[%s5749_s0 + $0x8b] ss:$16 sm:%s826_s11]  }
  0x40   :  { %v2722_v62 = vld [vmem:[%s5749_s0 + $0x8b] ss:$16 sm:%s829_s12]   ;;  %s809_s11 = smov 48  ;;  %s3147_s12 = smov 88   ;;  %v761_v3 = vsel %vm283_vm5, %v2705_v60, %v757_v59  ;;  %v2759_v26 = vld [vmem:[%s5749_s0 + $0x8a] ss:$16 sm:%s3630_s15]  }
  0x41   :  { %v2715_v0 = vld [vmem:[%s5749_s0 + $0x1cb] ss:$16 sm:%s801_s16]   ;;  %v832_v4 = vsel %vm6_vm0, %v2722_v62, %v2721_v61  ;;  %s52_s29 = smov 48  ;;  %v2760_v27 = vld [vmem:[%s5749_s0 + $0x8a] ss:$16 sm:%s3639_s18]   ;;  %s24_s16 = smov 12 }
  0x42   :  { %635 = vrot.lane.b32.xlu0 %v634_v24, %s3146_s30  ;;  %v2716_v1 = vld [vmem:[%s5749_s0 + $0x1cb] ss:$16 sm:%s804_s17]   ;;  %s29_s17 = smov 48  ;;  %v991_v51 = vsel %vm6_vm0, %v2760_v27, %v2759_v26  ;;  %s12_s18 = smov 192 }
  0x43   :  { %v2730_v2 = vld [vmem:[%s5749_s0 + $0x24b] ss:$16 sm:%s864_s8]   ;;  %s814_s8 = smov 192  ;;  %v807_v8 = vsel %vm6_vm0, %v2716_v1, %v2715_v0  ;;  %v2534_v34 = vld [vmem:[%s5749_s0 + $0x100] ss:$16 sm:%s52_s29]   ;;  %s34_s29 = smov 192 }
  0x44   :  { %v2723_v5 = vld [vmem:[%s5749_s0 + $0x8b] ss:$16 sm:%s834_s23]   ;;  %v867_v13 = vsel %vm14_vm2, %v2730_v2, %v862_v7  ;;  %s47_s23 = smov 12  ;;  %v2753_v36 = vld [vmem:[%s5749_s0 + $0x1ca] ss:$16 sm:%s3651_s26]   ;;  %s3826_s7 = smov 48 }
  0x45   :  { %v2739_v6 = vld [vmem:[%s5749_s0 + $0x2cb] ss:$16 sm:%s901_s2]   ;;  %v837_v11 = vsel %vm10_vm1, %v2723_v5, %v832_v4  ;;  %v2533_v29 = vld [vmem:[%s5749_s0 + $0x100] ss:$16 sm:%s47_s23]   ;;  %s3802_s23 = smov 96  ;;  %s3812_s2 = smov 3 }
  0x46   :  { %612 = vrot.lane.b32.xlu2 %v2670_v28, %s3145_s20  ;;  %734 = vrot.lane.b32.xlu1 %v733_v41, %s3146_s30  ;;  %v2717_v9 = vld [vmem:[%s5749_s0 + $0x1cb] ss:$16 sm:%s809_s11]   ;;  %s949_s11 = smov 192  ;;  %s1010_s6 = smov 3 }
  0x47   :  { %v2740_v10 = vld [vmem:[%s5749_s0 + $0x2cb] ss:$16 sm:%s904_s3]   ;;  %s879_s3 = smov 12  ;;  %v812_v14 = vsel %vm10_vm1, %v2717_v9, %v807_v8  ;;  %v2754_v37 = vld [vmem:[%s5749_s0 + $0x1ca] ss:$16 sm:%s3657_s22]   ;;  %s1063_s22 = smov 12 }
  0x48   :  { %v2724_v12 = vld [vmem:[%s5749_s0 + $0x8b] ss:$16 sm:%s3604_s24]   ;;  %s876_s24 = smov 3  ;;  %v907_v16 = vsel %vm6_vm0, %v2740_v10, %v2739_v6  ;;  %v2761_v41 = vld [vmem:[%s5749_s0 + $0x8a] ss:$16 sm:%s3641_s19]   ;;  %v966_v62 = vsel %vm6_vm0, %v2754_v37, %v2753_v36  ;;  %s1018_s15 = smov 48 }
  0x49   :  { %v2718_v15 = vld [vmem:[%s5749_s0 + $0x1cb] ss:$16 sm:%s814_s8]   ;;  %s44_s8 = smov 3  ;;  %v842_v18 = vsel %vm14_vm2, %v2724_v12, %v837_v11  ;;  %v911_v23 = vsel %vm274_vm3, %v2741_v17, %v907_v16  ;;  %v2748_v43 = vld [vmem:[%s5749_s0 + $0xa] ss:$16 sm:%s3686_s21]   ;;  %v996_v1 = vsel %vm10_vm1, %v2761_v41, %v991_v51  ;;  %s80_s5 = smov 192 }
  0x4a   :  { %709 = vrot.lane.b32.xlu0 %v708_v44, %s3146_s30  ;;  %v2733_v19 = vld [vmem:[%s5749_s0 + $0x10b] ss:$16 sm:%s876_s24]   ;;  %v817_v22 = vsel %vm14_vm2, %v2718_v15, %v812_v14  ;;  %v2779_v5 = vld [vmem:[%s5749_s0 + $0x306] sm:$0x10]   ;;  %s116_s20 = smov 12  ;;  %s121_s21 = smov 48 }
  0x4b   :  { %v2734_v20 = vld [vmem:[%s5749_s0 + $0x10b] ss:$16 sm:%s879_s3]   ;;  %s57_s3 = smov 192  ;;  %v2532_v25 = vld [vmem:[%s5749_s0 + $0x100] ss:$16 sm:%s44_s8]   ;;  %s3843_s8 = smov 3 }
  0x4c   :  { %v2742_v21 = vld [vmem:[%s5749_s0 + $0x13b] ss:$16 sm:%s3617_s4]   ;;  %s3694_s4 = smov 12  ;;  %v882_v28 = vsel %vm6_vm0, %v2734_v20, %v2733_v19  ;;  %v50_v33 = vsel %vm6_vm0, %v2533_v29, %v2532_v25  ;;  %v2535_v39 = vld [vmem:[%s5749_s0 + $0x100] ss:$16 sm:%s57_s3]   ;;  %s1098_s3 = smov 12 }
  0x4d   :  { %v2735_v24 = vld [vmem:[%s5749_s0 + $0x10b] ss:$16 sm:%s884_s9]   ;;  %s21_s9 = smov 3  ;;  %v916_v35 = vsel %vm279_vm4, %v2742_v21, %v911_v23  ;;  %v55_v38 = vsel %vm10_vm1, %v2534_v34, %v50_v33  ;;  %v2749_v44 = vld [vmem:[%s5749_s0 + $0xa] ss:$16 sm:%s3694_s4]   ;;  %s944_s4 = smov 48 }
  0x4e   :  { %684 = vrot.lane.b32.xlu2 %v683_v49, %s3146_s30  ;;  %794 = vrot.lane.b32.xlu1 %v793_v56, %s3147_s12  ;;  %v2746_v30 = vld [vmem:[%s5749_s0 + $0x1bb] sm:$0x1]   ;;  %v2743_v31 = vld [vmem:[%s5749_s0 + $0x1a4] sm:$0x80]   ;;  %v887_v42 = vsel %vm10_vm1, %v2735_v24, %v882_v28  ;;  %v60_v45 = vsel %vm14_vm2, %v2535_v39, %v55_v38  ;;  %v942_v2 = vsel %vm6_vm0, %v2749_v44, %v2748_v43  ;;  %s98_s27 = smov 48  ;;  %s103_s26 = smov 192 }
  0x4f   :  { %v2736_v32 = vld [vmem:[%s5749_s0 + $0x10b] ss:$16 sm:%s3671_s10]   ;;  %v2526_v40 = vld [vmem:[%s5749_s0 + $0x80] ss:$16 sm:%s21_s9]   ;;  %s2_s9 = smov 3  ;;  %v920_v50 = vsel %vm283_vm5, %v2743_v31, %v916_v35  ;;  %s126_s10 = smov 192 }
  0x50   :  { %v2527_v46 = vld [vmem:[%s5749_s0 + $0x80] ss:$16 sm:%s24_s16]   ;;  %2536 = vst.msk [vmem:[%s5750_s1 + $0x12] sm:$0x1f] %vm16_vm6, %v60_v45   ;;  %v892_v58 = vsel %vm14_vm2, %v2736_v32, %v887_v42  ;;  %s3814_s16 = smov 12  ;;  %s1182_s24 = smov 192 }
  0x51   :  { %v2528_v47 = vld [vmem:[%s5749_s0 + $0x80] ss:$16 sm:%s29_s17]   ;;  %s4_s17 = smov 12  ;;  %v27_v48 = vsel %vm6_vm0, %v2527_v46, %v2526_v40  ;;  %v2755_v52 = vld [vmem:[%s5749_s0 + $0x1ca] ss:$16 sm:%s3659_s28]   ;;  %s113_s28 = smov 3 }
  0x52   :  { %771 = vrot.lane.b32.xlu0 %v2708_v57, %s3146_s30  ;;  %v2529_v49 = vld [vmem:[%s5749_s0 + $0x80] ss:$16 sm:%s34_s29]   ;;  %s8_s29 = smov 48  ;;  %2537 = vst.msk [vmem:[%s5750_s1 + $0x13] sm:$0xe0] %vm16_vm6, %v60_v45   ;;  %v32_v55 = vsel %vm10_vm1, %v2528_v47, %v27_v48  ;;  %v971_v7 = vsel %vm10_vm1, %v2755_v52, %v966_v62  ;;  %s1328_s19 = smov 3 }
  0x53   :  { %v2777_v53 = vld [vmem:[%s5749_s0 + $0x2ca] ss:$16 sm:%s3677_s14]   ;;  %v3_v56 = vld [vmem:[%s5749_s0] ss:$16 sm:%s2_s9]   ;;  %v37_v60 = vsel %vm14_vm2, %v2529_v49, %v32_v55  ;;  %s3841_s14 = smov 192  ;;  %s1013_s9 = smov 12 }
  0x54   :  { %v2778_v54 = vld [vmem:[%s5749_s0 + $0x2ca] ss:$16 sm:%s1063_s22]   ;;  %v5_v61 = vld [vmem:[%s5749_s0] ss:$16 sm:%s4_s17]   ;;  %s3148_s22 = smov 80   ;;  %s1194_s17 = smov 3 }
  0x55   :  { %v2762_v57 = vld [vmem:[%s5749_s0 + $0x8a] ss:$16 sm:%s3649_s25]   ;;  %s973_s25 = smov 192  ;;  %2530 = vst.msk [vmem:[%s5750_s1 + $0x9] sm:$0x3f] %vm16_vm6, %v37_v60   ;;  %v7_v63 = vsel %vm6_vm0, %v5_v61, %v3_v56  ;;  %v1066_v9 = vsel %vm6_vm0, %v2778_v54, %v2777_v53  ;;  %s1353_s13 = smov 3 }
  0x56   :  { %762 = vrot.lane.b32.xlu2 %v761_v3, %s3146_s30  ;;  %868 = vrot.lane.b32.xlu1 %v867_v13, %s3147_s12  ;;  %v2750_v59 = vld [vmem:[%s5749_s0 + $0xa] ss:$16 sm:%s944_s4]   ;;  %v1001_v10 = vsel %vm14_vm2, %v2762_v57, %v996_v1  ;;  %s4129_s30 = smov 192  ;;  %s1303_s4 = smov 3 }
  0x57   :  { %v9_v0 = vld [vmem:[%s5749_s0] ss:$16 sm:%s8_s29]   ;;  %2531 = vst.msk [vmem:[%s5750_s1 + $0xa] sm:$0xc0] %vm16_vm6, %v37_v60   ;;  %v947_v12 = vsel %vm10_vm1, %v2750_v59, %v942_v2  ;;  %s3883_s29 = smov 3 }
  0x58   :  { %v11_v3 = vsel %vm10_vm1, %v9_v0, %v7_v63  ;;  %v13_v4 = vld [vmem:[%s5749_s0] ss:$16 sm:%s12_s18]   ;;  %v2756_v8 = vld [vmem:[%s5749_s0 + $0x1ca] ss:$16 sm:%s973_s25]   ;;  %s1023_s18 = smov 192  ;;  %s70_s25 = smov 12 }
  0x59   :  { %v15_v6 = vsel %vm14_vm2, %v13_v4, %v11_v3  ;;  %v2780_v11 = vld [vmem:[%s5749_s0 + $0x13a] ss:$16 sm:%s3802_s23]   ;;  %v2556_v14 = vld [vmem:[%s5749_s0 + $0x300] sm:$0x1]   ;;  %v976_v17 = vsel %vm14_vm2, %v2756_v8, %v971_v7  ;;  %s1202_s23 = smov 48 }
  0x5a   :  { %843 = vrot.lane.b32.xlu0 %v842_v18, %s3147_s12  ;;  %17 = vst.msk [vmem:[%s5750_s1] sm:$0x7f] %vm16_vm6, %v15_v6   ;;  %v2751_v13 = vld [vmem:[%s5749_s0 + $0xa] ss:$16 sm:%s949_s11]   ;;  %s3879_s11 = smov 48  ;;  %v1070_v18 = vsel %vm274_vm3, %v2779_v5, %v1066_v9 }
  0x5b   :  { %2525 = vst.msk [vmem:[%s5750_s1 + $0x1] sm:$0x80] %vm16_vm6, %v15_v6   ;;  %v2771_v15 = vld [vmem:[%s5749_s0 + $0x10a] ss:$16 sm:%s3812_s2]   ;;  %v952_v21 = vsel %vm14_vm2, %v2751_v13, %v947_v12  ;;  %v1075_v24 = vsel %vm279_vm4, %v2780_v11, %v1070_v18  ;;  %s75_s2 = smov 48 }
  0x5c   :  { %v2772_v16 = vld [vmem:[%s5749_s0 + $0x10a] ss:$16 sm:%s3814_s16]   ;;  %s1122_s16 = smov 12  ;;  %2557 = vst.msk [vmem:[%s5750_s1 + $0x36] sm:$0x1] %vm16_vm6, %v2556_v14  }
  0x5d   :  { %v2765_v19 = vld [vmem:[%s5749_s0 + $0x24a] ss:$16 sm:%s1010_s6]   ;;  %v2791_v27 = vld [vmem:[%s5749_s0 + $0x1c9] ss:$16 sm:%s3843_s8]   ;;  %s4161_s6 = smov 12  ;;  %s2052_s8 = smov 12 }
  0x5e   :  { %818 = vrot.lane.b32.xlu2 %v817_v22, %s3147_s12  ;;  %930 = vrot.lane.b32.xlu1 %v2746_v30, %s3147_s12  ;;  %v2766_v20 = vld [vmem:[%s5749_s0 + $0x24a] ss:$16 sm:%s1013_s9]   ;;  %v1041_v22 = vsel %vm6_vm0, %v2772_v16, %v2771_v15  ;;  %s1152_s9 = smov 48 }
  0x5f   :  { %v2773_v23 = vld [vmem:[%s5749_s0 + $0x10a] ss:$16 sm:%s3826_s7]   ;;  %s67_s7 = smov 3  ;;  %v2792_v28 = vld [vmem:[%s5749_s0 + $0x1c9] ss:$16 sm:%s1122_s16]   ;;  %v1016_v29 = vsel %vm6_vm0, %v2766_v20, %v2765_v19  ;;  %s3923_s16 = smov 192 }
  0x60   :  { %v2781_v25 = vld [vmem:[%s5749_s0 + $0x1a3] sm:$0x80]   ;;  %v1046_v32 = vsel %vm10_vm1, %v2773_v23, %v1041_v22  ;;  %v2786_v33 = vld [vmem:[%s5749_s0 + $0x9] ss:$16 sm:%s3883_s29]   ;;  %v1125_v47 = vsel %vm6_vm0, %v2792_v28, %v2791_v27  ;;  %v2784_v16 = vld [vmem:[%s5749_s0 + $0x1ba] sm:$0x1]  }
  0x61   :  { %v2774_v26 = vld [vmem:[%s5749_s0 + $0x10a] ss:$16 sm:%s3841_s14]   ;;  %v2787_v34 = vld [vmem:[%s5749_s0 + $0x9] ss:$16 sm:%s1098_s3]   ;;  %s1103_s3 = smov 48  ;;  %v1079_v37 = vsel %vm283_vm5, %v2781_v25, %v1075_v24  ;;  %s1219_s14 = smov 3 }
  0x62   :  { %921 = vrot.lane.b32.xlu0 %v920_v50, %s3147_s12  ;;  %v2767_v30 = vld [vmem:[%s5749_s0 + $0x24a] ss:$16 sm:%s1018_s15]   ;;  %v1051_v46 = vsel %vm14_vm2, %v2774_v26, %v1046_v32  ;;  %s1197_s15 = smov 12  ;;  %v1101_v55 = vsel %vm6_vm0, %v2787_v34, %v2786_v33  ;;  %s1818_s29 = smov 192 }
  0x63   :  { %v2768_v31 = vld [vmem:[%s5749_s0 + $0x24a] ss:$16 sm:%s1023_s18]   ;;  %v2538_v35 = vld [vmem:[%s5749_s0 + $0x180] ss:$16 sm:%s67_s7]   ;;  %v1021_v40 = vsel %vm10_vm1, %v2767_v30, %v1016_v29  ;;  %s1331_s7 = smov 12  ;;  %s1537_s18 = smov 3 }
  0x64   :  { %v2539_v36 = vld [vmem:[%s5749_s0 + $0x180] ss:$16 sm:%s70_s25]   ;;  %v2793_v38 = vld [vmem:[%s5749_s0 + $0x1c9] ss:$16 sm:%s3879_s11]   ;;  %s3947_s11 = smov 192  ;;  %v1026_v52 = vsel %vm14_vm2, %v2768_v31, %v1021_v40  ;;  %s93_s25 = smov 12 }
  0x65   :  { %v73_v41 = vsel %vm6_vm0, %v2539_v36, %v2538_v35  ;;  %v2540_v42 = vld [vmem:[%s5749_s0 + $0x180] ss:$16 sm:%s75_s2]   ;;  %v2788_v48 = vld [vmem:[%s5749_s0 + $0x9] ss:$16 sm:%s1103_s3]   ;;  %s90_s3 = smov 3  ;;  %s1609_s2 = smov 192 }
  0x66   :  { %893 = vrot.lane.b32.xlu2 %v892_v58, %s3147_s12  ;;  %1002 = vrot.lane.b32.xlu1 %v1001_v10, %s3148_s22  ;;  %v2541_v43 = vld [vmem:[%s5749_s0 + $0x180] ss:$16 sm:%s80_s5]   ;;  %v78_v44 = vsel %vm10_vm1, %v2540_v42, %v73_v41  ;;  %v1130_v58 = vsel %vm10_vm1, %v2793_v38, %v1125_v47  ;;  %s1169_s5 = smov 3  ;;  %s1172_s12 = smov 12  ;;  %v1106_v1 = vsel %vm10_vm1, %v2788_v48, %v1101_v55 }
  0x67   :  { %v2550_v45 = vld [vmem:[%s5749_s0 + $0x280] ss:$16 sm:%s113_s28]   ;;  %v83_v49 = vsel %vm14_vm2, %v2541_v43, %v78_v44  ;;  %v2794_v51 = vld [vmem:[%s5749_s0 + $0x1c9] ss:$16 sm:%s3923_s16]   ;;  %s1254_s28 = smov 3  ;;  %s3150_s16 = smov 64  }
  0x68   :  { %v2551_v50 = vld [vmem:[%s5749_s0 + $0x280] ss:$16 sm:%s116_s20]   ;;  %2542 = vst.msk [vmem:[%s5750_s1 + $0x1b] sm:$0xf] %vm16_vm6, %v83_v49   ;;  %s1177_s20 = smov 48  ;;  %v1135_v4 = vsel %vm14_vm2, %v2794_v51, %v1130_v58 }
  0x69   :  { %v119_v53 = vsel %vm6_vm0, %v2551_v50, %v2550_v45  ;;  %v2552_v54 = vld [vmem:[%s5749_s0 + $0x280] ss:$16 sm:%s121_s21]   ;;  %2543 = vst.msk [vmem:[%s5750_s1 + $0x1c] sm:$0xf0] %vm16_vm6, %v83_v49   ;;  %s4127_s21 = smov 48 }
  0x6a   :  { %977 = vrot.lane.b32.xlu0 %v976_v17, %s3148_s22  ;;  %v124_v56 = vsel %vm10_vm1, %v2552_v54, %v119_v53  ;;  %v2553_v57 = vld [vmem:[%s5749_s0 + $0x280] ss:$16 sm:%s126_s10]   ;;  %v2817_v42 = vld [vmem:[%s5749_s0 + $0x305] sm:$0x10]   ;;  %s1580_s10 = smov 48 }
  0x6b   :  { %v2789_v59 = vld [vmem:[%s5749_s0 + $0x9] ss:$16 sm:%s3947_s11]   ;;  %v129_v62 = vsel %vm14_vm2, %v2553_v57, %v124_v56  ;;  %v2544_v63 = vld [vmem:[%s5749_s0 + $0x200] ss:$16 sm:%s90_s3]   ;;  %s1157_s11 = smov 192  ;;  %s1267_s3 = smov 192 }
  0x6c   :  { %v2809_v60 = vld [vmem:[%s5749_s0 + $0x109] ss:$16 sm:%s1194_s17]   ;;  %2555 = vst.msk [vmem:[%s5750_s1 + $0x2e] sm:$0xfc] %vm16_vm6, %v129_v62   ;;  %s1144_s17 = smov 3  ;;  %v1111_v12 = vsel %vm14_vm2, %v2789_v59, %v1106_v1 }
  0x6d   :  { %v2810_v61 = vld [vmem:[%s5749_s0 + $0x109] ss:$16 sm:%s1197_s15]   ;;  %v2545_v0 = vld [vmem:[%s5749_s0 + $0x200] ss:$16 sm:%s93_s25]   ;;  %s3149_s15 = smov 72   ;;  %s1257_s25 = smov 12 }
  0x6e   :  { %953 = vrot.lane.b32.xlu2 %v952_v21, %s3148_s22  ;;  %1080 = vrot.lane.b32.xlu1 %v1079_v37, %s3148_s22  ;;  %2554 = vst.msk [vmem:[%s5750_s1 + $0x2d] sm:$0x3] %vm16_vm6, %v129_v62   ;;  %v96_v2 = vsel %vm6_vm0, %v2545_v0, %v2544_v63  ;;  %v1200_v13 = vsel %vm6_vm0, %v2810_v61, %v2809_v60  ;;  %v2819_v51 = vld [vmem:[%s5749_s0 + $0x1a2] sm:$0x80]  }
  0x6f   :  { %v2546_v3 = vld [vmem:[%s5749_s0 + $0x200] ss:$16 sm:%s98_s27]   ;;  %v2811_v5 = vld [vmem:[%s5749_s0 + $0x109] ss:$16 sm:%s1202_s23]   ;;  %s1207_s23 = smov 192  ;;  %s1621_s27 = smov 3 }
  0x70   :  { %v258_v39 = vpop.permute.xlu2 %257   ;;  %v2803_v6 = vld [vmem:[%s5749_s0 + $0x249] ss:$16 sm:%s1169_s5]   ;;  %v101_v8 = vsel %vm10_vm1, %v2546_v3, %v96_v2  ;;  %v2547_v9 = vld [vmem:[%s5749_s0 + $0x200] ss:$16 sm:%s103_s26]   ;;  %v1205_v20 = vsel %vm10_vm1, %v2811_v5, %v1200_v13  ;;  %s4146_s5 = smov 48  ;;  %s1440_s26 = smov 12 }
  0x71   :  { %2585 = vst.msk [vmem:[%s5750_s1 + $0x12] sm:$0x1f] %vm160_vm7, %v258_v39   ;;  %v2804_v10 = vld [vmem:[%s5749_s0 + $0x249] ss:$16 sm:%s1172_s12]   ;;  %v106_v11 = vsel %vm14_vm2, %v2547_v9, %v101_v8  ;;  %s1147_s12 = smov 12 }
  0x72   :  { %2586 = vst.msk [vmem:[%s5750_s1 + $0x13] sm:$0xe0] %vm160_vm7, %v258_v39   ;;  %1052 = vrot.lane.b32.xlu0 %v1051_v46, %s3148_s22  ;;  %v2805_v14 = vld [vmem:[%s5749_s0 + $0x249] ss:$16 sm:%s1177_s20]   ;;  %v1175_v17 = vsel %vm6_vm0, %v2804_v10, %v2803_v6  ;;  %s4159_s20 = smov 3 }
  0x73   :  { %v2812_v15 = vld [vmem:[%s5749_s0 + $0x109] ss:$16 sm:%s1207_s23]   ;;  %2549 = vst.msk [vmem:[%s5750_s1 + $0x25] sm:$0xf8] %vm16_vm6, %v106_v11   ;;  %v1180_v27 = vsel %vm10_vm1, %v2805_v14, %v1175_v17  ;;  %v2855_v14 = vld [vmem:[%s5749_s0 + $0x304] sm:$0x10]  }
  0x74   :  { %2548 = vst.msk [vmem:[%s5750_s1 + $0x24] sm:$0x7] %vm16_vm6, %v106_v11   ;;  %v2797_v18 = vld [vmem:[%s5749_s0 + $0x89] ss:$16 sm:%s1144_s17]   ;;  %v1210_v29 = vsel %vm14_vm2, %v2812_v15, %v1205_v20  ;;  %s1465_s17 = smov 12  ;;  %s1898_s23 = smov 48 }
  0x75   :  { %v2806_v21 = vld [vmem:[%s5749_s0 + $0x249] ss:$16 sm:%s1182_s24]   ;;  %v2824_v22 = vld [vmem:[%s5749_s0 + $0x8] ss:$16 sm:%s1254_s28]   ;;  %s4136_s24 = smov 12  ;;  %s1231_s28 = smov 96 }
  0x76   :  { %1027 = vrot.lane.b32.xlu2 %v1026_v52, %s3148_s22  ;;  %1136 = vrot.lane.b32.xlu1 %v1135_v4, %s3149_s15  ;;  %v2798_v23 = vld [vmem:[%s5749_s0 + $0x89] ss:$16 sm:%s1147_s12]   ;;  %s1262_s12 = smov 48  ;;  %v1185_v33 = vsel %vm14_vm2, %v2806_v21, %v1180_v27 }
  0x77   :  { %v1150_v24 = vsel %vm6_vm0, %v2798_v23, %v2797_v18  ;;  %v2799_v25 = vld [vmem:[%s5749_s0 + $0x89] ss:$16 sm:%s1152_s9]   ;;  %v2825_v28 = vld [vmem:[%s5749_s0 + $0x8] ss:$16 sm:%s1257_s25]   ;;  %s1361_s9 = smov 48  ;;  %s1572_s25 = smov 3 }
  0x78   :  { %v286_v7 = vpop.permute.xlu2 %285   ;;  %v208_v19 = vpop.permute.xlu1 %207   ;;  %v1155_v31 = vsel %vm10_vm1, %v2799_v25, %v1150_v24  ;;  %v2800_v32 = vld [vmem:[%s5749_s0 + $0x89] ss:$16 sm:%s1157_s11]   ;;  %v1260_v34 = vsel %vm6_vm0, %v2825_v28, %v2824_v22  ;;  %v2826_v35 = vld [vmem:[%s5749_s0 + $0x8] ss:$16 sm:%s1262_s12]   ;;  %s1222_s11 = smov 12  ;;  %s1596_s12 = smov 3 }
  0x79   :  { %2592 = vst.msk [vmem:[%s5750_s1 + $0x32] sm:$0x1f] %vm160_vm7, %v286_v7   ;;  %v1160_v36 = vsel %vm14_vm2, %v2800_v32, %v1155_v31  ;;  %v2827_v37 = vld [vmem:[%s5749_s0 + $0x8] ss:$16 sm:%s1267_s3]   ;;  %v1265_v39 = vsel %vm10_vm1, %v2826_v35, %v1260_v34  ;;  %v2822_v52 = vld [vmem:[%s5749_s0 + $0x1b9] sm:$0x1]  }
  0x7a   :  { %2593 = vst.msk [vmem:[%s5750_s1 + $0x16] sm:$0xe0] %vm160_vm7, %v286_v7   ;;  %1112 = vrot.lane.b32.xlu0 %v1111_v12, %s3149_s15  ;;  %v2841_v40 = vld [vmem:[%s5749_s0 + $0x248] ss:$16 sm:%s1328_s19]   ;;  %v1270_v47 = vsel %vm14_vm2, %v2827_v37, %v1265_v39  ;;  %s1366_s19 = smov 192  ;;  %s1540_s3 = smov 12 }
  0x7b   :  { %2573 = vst.msk [vmem:[%s5750_s1 + $0x9] sm:$0x3f] %vm160_vm7, %v208_v19   ;;  %v2842_v41 = vld [vmem:[%s5749_s0 + $0x248] ss:$16 sm:%s1331_s7]   ;;  %s1421_s7 = smov 48 }
  0x7c   :  { %2574 = vst.msk [vmem:[%s5750_s1 + $0xa] sm:$0xc0] %vm160_vm7, %v208_v19   ;;  %v159_v26 = vpop.permute.xlu0 %158   ;;  %v2815_v43 = vld [vmem:[%s5749_s0 + $0x2c9] ss:$16 sm:%s1219_s14]   ;;  %v1334_v55 = vsel %vm6_vm0, %v2842_v41, %v2841_v40  ;;  %s1316_s14 = smov 192 }
  0x7d   :  { %161 = vst.msk [vmem:[%s5750_s1] sm:$0x7f] %vm160_vm7, %v159_v26   ;;  %v2835_v45 = vld [vmem:[%s5749_s0 + $0x88] ss:$16 sm:%s1303_s4]   ;;  %s1278_s4 = smov 3 }
  0x7e   :  { %1089 = vrot.lane.b32.xlu2 %v2784_v16, %s3148_s22  ;;  %2562 = vst.msk [vmem:[%s5750_s1 + $0x1] sm:$0x80] %vm160_vm7, %v159_v26   ;;  %1211 = vrot.lane.b32.xlu1 %v1210_v29, %s3149_s15  ;;  %s1437_s22 = smov 3  ;;  %v2857_v24 = vld [vmem:[%s5749_s0 + $0x1a1] sm:$0x80]  }
  0x7f   :  { %v2816_v46 = vld [vmem:[%s5749_s0 + $0x2c9] ss:$16 sm:%s1222_s11]   ;;  %v2836_v53 = vld [vmem:[%s5749_s0 + $0x88] ss:$16 sm:%s4136_s24]   ;;  %s4295_s24 = smov 48  ;;  %s1520_s11 = smov 48 }
  0x80   :  { %v342_v30 = vpop.permute.xlu2 %341   ;;  %v233_v38 = vpop.permute.xlu1 %232   ;;  %v1225_v49 = vsel %vm6_vm0, %v2816_v46, %v2815_v43  ;;  %v2818_v50 = vld [vmem:[%s5749_s0 + $0x139] ss:$16 sm:%s1231_s28]   ;;  %v2843_v56 = vld [vmem:[%s5749_s0 + $0x248] ss:$16 sm:%s4127_s21]   ;;  %s1281_s21 = smov 12  ;;  %v1309_v61 = vsel %vm6_vm0, %v2836_v53, %v2835_v45  ;;  %s1291_s28 = smov 192 }
  0x81   :  { %2579 = vst.msk [vmem:[%s5750_s1 + $0x29] sm:$0x3f] %vm160_vm7, %v233_v38   ;;  %v1229_v54 = vsel %vm274_vm3, %v2817_v42, %v1225_v49  ;;  %v2844_v58 = vld [vmem:[%s5749_s0 + $0x248] ss:$16 sm:%s4129_s30]   ;;  %v1339_v2 = vsel %vm10_vm1, %v2843_v56, %v1334_v55  ;;  %v2893_v46 = vld [vmem:[%s5749_s0 + $0x303] sm:$0x10]  }
  0x82   :  { %1186 = vrot.lane.b32.xlu0 %v1185_v33, %s3149_s15  ;;  %2580 = vst.msk [vmem:[%s5750_s1 + $0x2a] sm:$0xc0] %vm160_vm7, %v233_v38   ;;  %v1234_v57 = vsel %vm279_vm4, %v2818_v50, %v1229_v54  ;;  %v2837_v59 = vld [vmem:[%s5749_s0 + $0x88] ss:$16 sm:%s4146_s5]   ;;  %s1286_s5 = smov 48  ;;  %v1344_v9 = vsel %vm14_vm2, %v2844_v58, %v1339_v2  ;;  %s1649_s30 = smov 12 }
  0x83   :  { %v1238_v60 = vsel %vm283_vm5, %v2819_v51, %v1234_v57  ;;  %v2853_v62 = vld [vmem:[%s5749_s0 + $0x2c8] ss:$16 sm:%s4159_s20]   ;;  %v1314_v7 = vsel %vm10_vm1, %v2837_v59, %v1309_v61  ;;  %s1462_s20 = smov 3  ;;  %v2874_v21 = vld [vmem:[%s5749_s0 + $0x87] ss:$16 sm:%s1465_s17]   ;;  %s1515_s17 = smov 12 }
  0x84   :  { %v183_v44 = vpop.permute.xlu0 %182   ;;  %v2854_v63 = vld [vmem:[%s5749_s0 + $0x2c8] ss:$16 sm:%s4161_s6]   ;;  %s1470_s6 = smov 48  ;;  %v2873_v20 = vld [vmem:[%s5749_s0 + $0x87] ss:$16 sm:%s1462_s20]   ;;  %s1512_s20 = smov 3 }
  0x85   :  { %2567 = vst.msk [vmem:[%s5750_s1 + $0x20] sm:$0x7f] %vm160_vm7, %v183_v44   ;;  %v2829_v0 = vld [vmem:[%s5749_s0 + $0x1c8] ss:$16 sm:%s1278_s4]   ;;  %v1384_v13 = vsel %vm6_vm0, %v2854_v63, %v2853_v62  ;;  %v1468_v35 = vsel %vm6_vm0, %v2874_v21, %v2873_v20  ;;  %s1674_s4 = smov 12 }
  0x86   :  { %1161 = vrot.lane.b32.xlu2 %v1160_v36, %s3149_s15  ;;  %2568 = vst.msk [vmem:[%s5750_s1 + $0x21] sm:$0x80] %vm160_vm7, %v183_v44   ;;  %1271 = vrot.lane.b32.xlu1 %v1270_v47, %s3150_s16  ;;  %v1388_v17 = vsel %vm274_vm3, %v2855_v14, %v1384_v13  ;;  %v2860_v28 = vld [vmem:[%s5749_s0 + $0x1b8] sm:$0x1]  }
  0x87   :  { %2605 = vst.msk [vmem:[%s5750_s1 + $0x20] sm:$0x7f] %vm319_vm8, %v342_v30   ;;  %v2830_v3 = vld [vmem:[%s5749_s0 + $0x1c8] ss:$16 sm:%s1281_s21]   ;;  %s1475_s21 = smov 192 }
  0x88   :  { %v417_v48 = vpop.permute.xlu2 %416   ;;  %2606 = vst.msk [vmem:[%s5750_s1 + $0x21] sm:$0x80] %vm319_vm8, %v342_v30   ;;  %v318_v1 = vpop.permute.xlu1 %317   ;;  %v1284_v4 = vsel %vm6_vm0, %v2830_v3, %v2829_v0  ;;  %v2831_v5 = vld [vmem:[%s5749_s0 + $0x1c8] ss:$16 sm:%s1286_s5]   ;;  %s1575_s5 = smov 12 }
  0x89   :  { %2623 = vst.msk [vmem:[%s5750_s1 + $0x12] sm:$0x1f] %vm319_vm8, %v417_v48   ;;  %v2838_v8 = vld [vmem:[%s5749_s0 + $0x88] ss:$16 sm:%s1316_s14]   ;;  %v1289_v11 = vsel %vm10_vm1, %v2831_v5, %v1284_v4  ;;  %s1390_s14 = smov 96 }
  0x8a   :  { %1248 = vrot.lane.b32.xlu0 %v2822_v52, %s3149_s15  ;;  %2624 = vst.msk [vmem:[%s5750_s1 + $0x13] sm:$0xe0] %vm319_vm8, %v417_v48   ;;  %v2832_v12 = vld [vmem:[%s5749_s0 + $0x1c8] ss:$16 sm:%s1291_s28]   ;;  %v1319_v15 = vsel %vm14_vm2, %v2838_v8, %v1314_v7  ;;  %s1487_s28 = smov 3 }
  0x8b   :  { %320 = vst.msk [vmem:[%s5750_s1] sm:$0x7f] %vm319_vm8, %v318_v1   ;;  %v1294_v16 = vsel %vm14_vm2, %v2832_v12, %v1289_v11  ;;  %v2856_v18 = vld [vmem:[%s5749_s0 + $0x138] ss:$16 sm:%s1390_s14]   ;;  %s1426_s14 = smov 192 }
  0x8c   :  { %2600 = vst.msk [vmem:[%s5750_s1 + $0x1] sm:$0x80] %vm319_vm8, %v318_v1   ;;  %v295_v6 = vpop.permute.xlu0 %294   ;;  %v1393_v23 = vsel %vm279_vm4, %v2856_v18, %v1388_v17  ;;  %v2867_v25 = vld [vmem:[%s5749_s0 + $0x1c7] ss:$16 sm:%s1437_s22]   ;;  %s1793_s22 = smov 192 }
  0x8d   :  { %2595 = vst.msk [vmem:[%s5750_s1 + $0x1e] sm:$0x1] %vm160_vm7, %v295_v6   ;;  %v2868_v26 = vld [vmem:[%s5749_s0 + $0x1c7] ss:$16 sm:%s1440_s26]   ;;  %v1397_v34 = vsel %vm283_vm5, %v2857_v24, %v1393_v23  ;;  %s1783_s26 = smov 12 }
  0x8e   :  { %1239 = vrot.lane.b32.xlu2 %v1238_v60, %s3149_s15  ;;  %1345 = vrot.lane.b32.xlu1 %v1344_v9, %s3150_s16  ;;  %s1356_s15 = smov 12  ;;  %v2847_v27 = vld [vmem:[%s5749_s0 + $0x108] ss:$16 sm:%s1353_s13]   ;;  %v1443_v40 = vsel %vm6_vm0, %v2868_v26, %v2867_v25  ;;  %s1413_s13 = smov 3 }
  0x8f   :  { %v2875_v29 = vld [vmem:[%s5749_s0 + $0x87] ss:$16 sm:%s1470_s6]   ;;  %v2848_v31 = vld [vmem:[%s5749_s0 + $0x108] ss:$16 sm:%s1356_s15]   ;;  %s1549_s6 = smov 96  ;;  %s1731_s15 = smov 3 }
  0x90   :  { %v477_v10 = vpop.permute.xlu2 %476   ;;  %v392_v19 = vpop.permute.xlu1 %391   ;;  %v1359_v32 = vsel %vm6_vm0, %v2848_v31, %v2847_v27  ;;  %v2849_v33 = vld [vmem:[%s5749_s0 + $0x108] ss:$16 sm:%s1361_s9]   ;;  %v2869_v38 = vld [vmem:[%s5749_s0 + $0x1c7] ss:$16 sm:%s4295_s24]   ;;  %s1450_s24 = smov 192  ;;  %v1473_v44 = vsel %vm10_vm1, %v2875_v29, %v1468_v35  ;;  %s1768_s9 = smov 192 }
  0x91   :  { %479 = vst.msk [vmem:[%s5750_s1] sm:$0x7f] %vm478_vm9, %v477_v10   ;;  %v1364_v36 = vsel %vm10_vm1, %v2849_v33, %v1359_v32  ;;  %v2850_v37 = vld [vmem:[%s5749_s0 + $0x108] ss:$16 sm:%s1366_s19]   ;;  %v1448_v49 = vsel %vm10_vm1, %v2869_v38, %v1443_v40  ;;  %v2895_v5 = vld [vmem:[%s5749_s0 + $0x1a0] sm:$0x80]  }
  0x92   :  { %2638 = vst.msk [vmem:[%s5750_s1 + $0x1] sm:$0x80] %vm478_vm9, %v477_v10   ;;  %1320 = vrot.lane.b32.xlu0 %v1319_v15, %s3150_s16  ;;  %v1369_v39 = vsel %vm14_vm2, %v2850_v37, %v1364_v36  ;;  %v2891_v41 = vld [vmem:[%s5749_s0 + $0x2c7] ss:$16 sm:%s1537_s18]   ;;  %s1490_s18 = smov 12  ;;  %s1500_s19 = smov 192 }
  0x93   :  { %2617 = vst.msk [vmem:[%s5750_s1 + $0x29] sm:$0x3f] %vm319_vm8, %v392_v19   ;;  %v2892_v42 = vld [vmem:[%s5749_s0 + $0x2c7] ss:$16 sm:%s1540_s3]   ;;  %s1495_s3 = smov 48 }
  0x94   :  { %2618 = vst.msk [vmem:[%s5750_s1 + $0x2a] sm:$0xc0] %vm319_vm8, %v392_v19   ;;  %v367_v22 = vpop.permute.xlu0 %366   ;;  %v2876_v45 = vld [vmem:[%s5749_s0 + $0x87] ss:$16 sm:%s1475_s21]   ;;  %v1543_v50 = vsel %vm6_vm0, %v2892_v42, %v2891_v41  ;;  %s1734_s21 = smov 12 }
  0x95   :  { %2611 = vst.msk [vmem:[%s5750_s1 + $0x9] sm:$0x3f] %vm319_vm8, %v367_v22   ;;  %v2870_v47 = vld [vmem:[%s5749_s0 + $0x1c7] ss:$16 sm:%s1450_s24]   ;;  %v1478_v53 = vsel %vm14_vm2, %v2876_v45, %v1473_v44  ;;  %v1547_v59 = vsel %vm274_vm3, %v2893_v46, %v1543_v50  ;;  %s1684_s24 = smov 192 }
  0x96   :  { %1295 = vrot.lane.b32.xlu2 %v1294_v16, %s3150_s16  ;;  %2612 = vst.msk [vmem:[%s5750_s1 + $0xa] sm:$0xc0] %vm319_vm8, %v367_v22   ;;  %1407 = vrot.lane.b32.xlu1 %v2860_v28, %s3150_s16  ;;  %v1453_v58 = vsel %vm14_vm2, %v2870_v47, %v1448_v49 }
  0x97   :  { %v2885_v51 = vld [vmem:[%s5749_s0 + $0x107] ss:$16 sm:%s1512_s20]   ;;  %v2905_v7 = vld [vmem:[%s5749_s0 + $0x1c6] ss:$16 sm:%s1596_s12]   ;;  %s1947_s20 = smov 48  ;;  %s1992_s12 = smov 12 }
  0x98   :  { %v551_v30 = vpop.permute.xlu2 %550   ;;  %v454_v43 = vpop.permute.xlu1 %453   ;;  %v2886_v52 = vld [vmem:[%s5749_s0 + $0x107] ss:$16 sm:%s1515_s17]   ;;  %s1525_s17 = smov 192  ;;  %v2900_v13 = vld [vmem:[%s5749_s0 + $0x6] ss:$16 sm:%s1572_s25]   ;;  %s1646_s25 = smov 3 }
  0x99   :  { %2655 = vst.msk [vmem:[%s5750_s1 + $0x29] sm:$0x3f] %vm478_vm9, %v551_v30   ;;  %v2894_v54 = vld [vmem:[%s5749_s0 + $0x137] ss:$16 sm:%s1549_s6]   ;;  %s3151_s6 = smov 56   ;;  %v1518_v0 = vsel %vm6_vm0, %v2886_v52, %v2885_v51 }
  0x9a   :  { %2656 = vst.msk [vmem:[%s5750_s1 + $0x2a] sm:$0xc0] %vm478_vm9, %v551_v30   ;;  %1398 = vrot.lane.b32.xlu0 %v1397_v34, %s3150_s16  ;;  %v2862_v56 = vld [vmem:[%s5749_s0 + $0x7] ss:$16 sm:%s1413_s13]   ;;  %v1552_v4 = vsel %vm279_vm4, %v2894_v54, %v1547_v59  ;;  %s1629_s13 = smov 48 }
  0x9b   :  { %2633 = vst.msk [vmem:[%s5750_s1 + $0x1e] sm:$0x1] %vm319_vm8, %v454_v43   ;;  %v2864_v61 = vld [vmem:[%s5749_s0 + $0x7] ss:$16 sm:%s1421_s7]   ;;  %s1604_s7 = smov 48  ;;  %v1556_v11 = vsel %vm283_vm5, %v2895_v5, %v1552_v4 }
  0x9c   :  { %v445_v48 = vpop.permute.xlu0 %444   ;;  %v2865_v63 = vld [vmem:[%s5749_s0 + $0x7] ss:$16 sm:%s1426_s14]   ;;  %v2907_v12 = vld [vmem:[%s5749_s0 + $0x1c6] ss:$16 sm:%s1604_s7]   ;;  %s1585_s7 = smov 192  ;;  %s1942_s14 = smov 12 }
  0x9d   :  { %2630 = vst.msk [vmem:[%s5750_s1 + $0x32] sm:$0x1f] %vm319_vm8, %v445_v48   ;;  %v2887_v1 = vld [vmem:[%s5749_s0 + $0x107] ss:$16 sm:%s1520_s11]   ;;  %s1671_s11 = smov 3 }
  0x9e   :  { %1370 = vrot.lane.b32.xlu2 %v1369_v39, %s3150_s16  ;;  %s1416_s16 = smov 12  ;;  %2631 = vst.msk [vmem:[%s5750_s1 + $0x16] sm:$0xe0] %vm319_vm8, %v445_v48   ;;  %1479 = vrot.lane.b32.xlu1 %v1478_v53, %s3151_s6  ;;  %v1523_v9 = vsel %vm10_vm1, %v2887_v1, %v1518_v0  ;;  %v2898_v48 = vld [vmem:[%s5749_s0 + $0x1b7] sm:$0x1]  }
  0x9f   :  { %v2863_v57 = vld [vmem:[%s5749_s0 + $0x7] ss:$16 sm:%s1416_s16]   ;;  %s1599_s16 = smov 12  ;;  %v2901_v15 = vld [vmem:[%s5749_s0 + $0x6] ss:$16 sm:%s1575_s5]   ;;  %s1939_s5 = smov 3 }
  0xa0   :  { %v613_v55 = vpop.permute.xlu2 %612   ;;  %v1419_v60 = vsel %vm6_vm0, %v2863_v57, %v2862_v56  ;;  %v526_v3 = vpop.permute.xlu1 %525   ;;  %v2888_v6 = vld [vmem:[%s5749_s0 + $0x107] ss:$16 sm:%s1525_s17]   ;;  %v2906_v10 = vld [vmem:[%s5749_s0 + $0x1c6] ss:$16 sm:%s1599_s16]   ;;  %v1578_v21 = vsel %vm6_vm0, %v2901_v15, %v2900_v13  ;;  %s1624_s17 = smov 12  ;;  %s1634_s16 = smov 192 }
  0xa1   :  { %2671 = vst.msk [vmem:[%s5750_s1 + $0x1e] sm:$0x1] %vm478_vm9, %v613_v55   ;;  %v1424_v62 = vsel %vm10_vm1, %v2864_v61, %v1419_v60  ;;  %v1528_v16 = vsel %vm14_vm2, %v2888_v6, %v1523_v9  ;;  %v1602_v17 = vsel %vm6_vm0, %v2906_v10, %v2905_v7  ;;  %v2902_v18 = vld [vmem:[%s5749_s0 + $0x6] ss:$16 sm:%s1580_s10]   ;;  %s1780_s10 = smov 3 }
  0xa2   :  { %v1429_v2 = vsel %vm14_vm2, %v2865_v63, %v1424_v62  ;;  %1454 = vrot.lane.b32.xlu0 %v1453_v58, %s3151_s6  ;;  %2649 = vst.msk [vmem:[%s5750_s1 + $0x9] sm:$0x3f] %vm478_vm9, %v526_v3   ;;  %v2908_v19 = vld [vmem:[%s5749_s0 + $0x1c6] ss:$16 sm:%s1609_s2]   ;;  %v1607_v25 = vsel %vm10_vm1, %v2907_v12, %v1602_v17  ;;  %v1583_v32 = vsel %vm10_vm1, %v2902_v18, %v1578_v21  ;;  %s3152_s2 = smov 48  }
  0xa3   :  { %2650 = vst.msk [vmem:[%s5750_s1 + $0xa] sm:$0xc0] %vm478_vm9, %v526_v3   ;;  %v2879_v20 = vld [vmem:[%s5749_s0 + $0x247] ss:$16 sm:%s1487_s28]   ;;  %v1612_v35 = vsel %vm14_vm2, %v2908_v19, %v1607_v25  ;;  %v2931_v12 = vld [vmem:[%s5749_s0 + $0x302] sm:$0x10]  }
  0xa4   :  { %v501_v8 = vpop.permute.xlu0 %500   ;;  %v2880_v22 = vld [vmem:[%s5749_s0 + $0x247] ss:$16 sm:%s1490_s18]   ;;  %v2903_v26 = vld [vmem:[%s5749_s0 + $0x6] ss:$16 sm:%s1585_s7]   ;;  %s1679_s18 = smov 48  ;;  %s1858_s7 = smov 12 }
  0xa5   :  { %2643 = vst.msk [vmem:[%s5750_s1 + $0x20] sm:$0x7f] %vm478_vm9, %v501_v8   ;;  %v2881_v23 = vld [vmem:[%s5749_s0 + $0x247] ss:$16 sm:%s1495_s3]   ;;  %v1493_v27 = vsel %vm6_vm0, %v2880_v22, %v2879_v20  ;;  %v1588_v38 = vsel %vm14_vm2, %v2903_v26, %v1583_v32  ;;  %v2933_v25 = vld [vmem:[%s5749_s0 + $0x19f] sm:$0x80]  }
  0xa6   :  { %1430 = vrot.lane.b32.xlu2 %v1429_v2, %s3151_s6  ;;  %2644 = vst.msk [vmem:[%s5750_s1 + $0x21] sm:$0x80] %vm478_vm9, %v501_v8   ;;  %1557 = vrot.lane.b32.xlu1 %v1556_v11, %s3151_s6  ;;  %v1498_v29 = vsel %vm10_vm1, %v2881_v23, %v1493_v27  ;;  %v2936_v8 = vld [vmem:[%s5749_s0 + $0x1b6] sm:$0x1]   ;;  %s2026_s28 = smov 96  ;;  %s1890_s3 = smov 3 }
  0xa7   :  { %v2882_v28 = vld [vmem:[%s5749_s0 + $0x247] ss:$16 sm:%s1500_s19]   ;;  %v2923_v30 = vld [vmem:[%s5749_s0 + $0x106] ss:$16 sm:%s1671_s11]   ;;  %s1654_s11 = smov 48  ;;  %s1739_s19 = smov 48 }
  0xa8   :  { %v685_v14 = vpop.permute.xlu2 %684   ;;  %v604_v24 = vpop.permute.xlu1 %603   ;;  %v1503_v33 = vsel %vm14_vm2, %v2882_v28, %v1498_v29  ;;  %v2924_v34 = vld [vmem:[%s5749_s0 + $0x106] ss:$16 sm:%s1674_s4]   ;;  %s1659_s4 = smov 192  ;;  %v2938_v49 = vld [vmem:[%s5749_s0 + $0x5] ss:$16 sm:%s1731_s15]   ;;  %s1922_s15 = smov 48 }
  0xa9   :  { %2687 = vst.msk [vmem:[%s5750_s1 + $0x9] sm:$0x3f] %vm637_vm10, %v685_v14   ;;  %v2925_v37 = vld [vmem:[%s5749_s0 + $0x106] ss:$16 sm:%s1679_s18]   ;;  %v1677_v39 = vsel %vm6_vm0, %v2924_v34, %v2923_v30  ;;  %s1744_s18 = smov 192 }
  0xaa   :  { %2688 = vst.msk [vmem:[%s5750_s1 + $0xa] sm:$0xc0] %vm637_vm10, %v685_v14   ;;  %1529 = vrot.lane.b32.xlu0 %v1528_v16, %s3151_s6  ;;  %v2917_v40 = vld [vmem:[%s5749_s0 + $0x246] ss:$16 sm:%s1646_s25]   ;;  %v1682_v46 = vsel %vm10_vm1, %v2925_v37, %v1677_v39  ;;  %s2017_s25 = smov 12 }
  0xab   :  { %2668 = vst.msk [vmem:[%s5750_s1 + $0x32] sm:$0x1f] %vm478_vm9, %v604_v24   ;;  %v2918_v41 = vld [vmem:[%s5749_s0 + $0x246] ss:$16 sm:%s1649_s30]   ;;  %s1696_s30 = smov 3 }
  0xac   :  { %2669 = vst.msk [vmem:[%s5750_s1 + $0x16] sm:$0xe0] %vm478_vm9, %v604_v24   ;;  %v576_v31 = vpop.permute.xlu0 %575   ;;  %v2926_v42 = vld [vmem:[%s5749_s0 + $0x106] ss:$16 sm:%s1684_s24]   ;;  %v1652_v43 = vsel %vm6_vm0, %v2918_v41, %v2917_v40  ;;  %s1805_s24 = smov 3 }
  0xad   :  { %2661 = vst.msk [vmem:[%s5750_s1 + $0x12] sm:$0x1f] %vm478_vm9, %v576_v31   ;;  %v2919_v44 = vld [vmem:[%s5749_s0 + $0x246] ss:$16 sm:%s1654_s11]   ;;  %v1687_v53 = vsel %vm14_vm2, %v2926_v42, %v1682_v46  ;;  %v2969_v34 = vld [vmem:[%s5749_s0 + $0x301] sm:$0x10]  }
  0xae   :  { %1504 = vrot.lane.b32.xlu2 %v1503_v33, %s3151_s6  ;;  %2662 = vst.msk [vmem:[%s5750_s1 + $0x13] sm:$0xe0] %vm478_vm9, %v576_v31   ;;  %1613 = vrot.lane.b32.xlu1 %v1612_v35, %s3152_s2  ;;  %v1657_v51 = vsel %vm10_vm1, %v2919_v44, %v1652_v43  ;;  %s1833_s11 = smov 12 }
  0xaf   :  { %v2920_v47 = vld [vmem:[%s5749_s0 + $0x246] ss:$16 sm:%s1659_s4]   ;;  %v2939_v52 = vld [vmem:[%s5749_s0 + $0x5] ss:$16 sm:%s1734_s21]   ;;  %s1708_s4 = smov 96  ;;  %s1893_s21 = smov 12 }
  0xb0   :  { %v763_v36 = vpop.permute.xlu2 %762   ;;  %v660_v45 = vpop.permute.xlu1 %659   ;;  %v2940_v54 = vld [vmem:[%s5749_s0 + $0x5] ss:$16 sm:%s1739_s19]   ;;  %v2911_v56 = vld [vmem:[%s5749_s0 + $0x86] ss:$16 sm:%s1621_s27]   ;;  %v1662_v57 = vsel %vm14_vm2, %v2920_v47, %v1657_v51  ;;  %v1737_v58 = vsel %vm6_vm0, %v2939_v52, %v2938_v49  ;;  %s1808_s27 = smov 12  ;;  %s1699_s19 = smov 12 }
  0xb1   :  { %2706 = vst.msk [vmem:[%s5750_s1 + $0x32] sm:$0x1f] %vm637_vm10, %v763_v36   ;;  %v2912_v59 = vld [vmem:[%s5749_s0 + $0x86] ss:$16 sm:%s1624_s17]   ;;  %v1742_v1 = vsel %vm10_vm1, %v2940_v54, %v1737_v58  ;;  %s4761_s17 = smov 192 }
  0xb2   :  { %2707 = vst.msk [vmem:[%s5750_s1 + $0x16] sm:$0xe0] %vm637_vm10, %v763_v36   ;;  %1589 = vrot.lane.b32.xlu0 %v1588_v38, %s3152_s2  ;;  %v1627_v60 = vsel %vm6_vm0, %v2912_v59, %v2911_v56  ;;  %v2913_v61 = vld [vmem:[%s5749_s0 + $0x86] ss:$16 sm:%s1629_s13]   ;;  %s1838_s13 = smov 48 }
  0xb3   :  { %2681 = vst.msk [vmem:[%s5750_s1 + $0x20] sm:$0x7f] %vm637_vm10, %v660_v45   ;;  %v1632_v62 = vsel %vm10_vm1, %v2913_v61, %v1627_v60  ;;  %v2914_v63 = vld [vmem:[%s5749_s0 + $0x86] ss:$16 sm:%s1634_s16]   ;;  %s1788_s16 = smov 48 }
  0xb4   :  { %2682 = vst.msk [vmem:[%s5750_s1 + $0x21] sm:$0x80] %vm637_vm10, %v660_v45   ;;  %v636_v50 = vpop.permute.xlu0 %635   ;;  %v2941_v2 = vld [vmem:[%s5749_s0 + $0x5] ss:$16 sm:%s1744_s18]   ;;  %v1637_v3 = vsel %vm14_vm2, %v2914_v63, %v1632_v62  ;;  %s2111_s18 = smov 192 }
  0xb5   :  { %638 = vst.msk [vmem:[%s5750_s1] sm:$0x7f] %vm637_vm10, %v636_v50   ;;  %v2955_v4 = vld [vmem:[%s5749_s0 + $0x245] ss:$16 sm:%s1805_s24]   ;;  %v1747_v7 = vsel %vm14_vm2, %v2941_v2, %v1742_v1  ;;  %s3154_s24 = smov 32  }
  0xb6   :  { %1566 = vrot.lane.b32.xlu2 %v2898_v48, %s3151_s6  ;;  %2676 = vst.msk [vmem:[%s5750_s1 + $0x1] sm:$0x80] %vm637_vm10, %v636_v50   ;;  %1688 = vrot.lane.b32.xlu1 %v1687_v53, %s3152_s2  ;;  %s1813_s6 = smov 48  ;;  %v2971_v51 = vld [vmem:[%s5749_s0 + $0x19e] sm:$0x80]  }
  0xb7   :  { %v2956_v6 = vld [vmem:[%s5749_s0 + $0x245] ss:$16 sm:%s1808_s27]   ;;  %v2929_v17 = vld [vmem:[%s5749_s0 + $0x2c6] ss:$16 sm:%s1696_s30]   ;;  %s2081_s30 = smov 48  ;;  %s1977_s27 = smov 192 }
  0xb8   :  { %v819_v55 = vpop.permute.xlu2 %818   ;;  %v735_v0 = vpop.permute.xlu1 %734   ;;  %v2949_v9 = vld [vmem:[%s5749_s0 + $0x85] ss:$16 sm:%s1780_s10]   ;;  %v1811_v13 = vsel %vm6_vm0, %v2956_v6, %v2955_v4  ;;  %v2930_v19 = vld [vmem:[%s5749_s0 + $0x2c6] ss:$16 sm:%s1699_s19]   ;;  %s1755_s10 = smov 3  ;;  %s2002_s19 = smov 192 }
  0xb9   :  { %2719 = vst.msk [vmem:[%s5750_s1 + $0x20] sm:$0x7f] %vm796_vm11, %v819_v55   ;;  %v2950_v11 = vld [vmem:[%s5749_s0 + $0x85] ss:$16 sm:%s1783_s26]   ;;  %v1702_v23 = vsel %vm6_vm0, %v2930_v19, %v2929_v17  ;;  %s1758_s26 = smov 12 }
  0xba   :  { %2720 = vst.msk [vmem:[%s5750_s1 + $0x21] sm:$0x80] %vm796_vm11, %v819_v55   ;;  %1663 = vrot.lane.b32.xlu0 %v1662_v57, %s3152_s2  ;;  %v2957_v14 = vld [vmem:[%s5749_s0 + $0x245] ss:$16 sm:%s1813_s6]   ;;  %s3153_s6 = smov 40   ;;  %v1786_v18 = vsel %vm6_vm0, %v2950_v11, %v2949_v9  ;;  %v1706_v26 = vsel %vm274_vm3, %v2931_v12, %v1702_v23 }
  0xbb   :  { %2699 = vst.msk [vmem:[%s5750_s1 + $0x12] sm:$0x1f] %vm637_vm10, %v735_v0   ;;  %v2951_v15 = vld [vmem:[%s5749_s0 + $0x85] ss:$16 sm:%s1788_s16]   ;;  %s1855_s16 = smov 3  ;;  %v1816_v21 = vsel %vm10_vm1, %v2957_v14, %v1811_v13 }
  0xbc   :  { %2700 = vst.msk [vmem:[%s5750_s1 + $0x13] sm:$0xe0] %vm637_vm10, %v735_v0   ;;  %v710_v5 = vpop.permute.xlu0 %709   ;;  %v2958_v16 = vld [vmem:[%s5749_s0 + $0x245] ss:$16 sm:%s1818_s29]   ;;  %v1791_v29 = vsel %vm10_vm1, %v2951_v15, %v1786_v18  ;;  %s1763_s29 = smov 48 }
  0xbd   :  { %2693 = vst.msk [vmem:[%s5750_s1 + $0x29] sm:$0x3f] %vm637_vm10, %v710_v5   ;;  %v2952_v22 = vld [vmem:[%s5749_s0 + $0x85] ss:$16 sm:%s1793_s22]   ;;  %v1821_v32 = vsel %vm14_vm2, %v2958_v16, %v1816_v21  ;;  %s1914_s22 = smov 3 }
  0xbe   :  { %1638 = vrot.lane.b32.xlu2 %v1637_v3, %s3152_s2  ;;  %2694 = vst.msk [vmem:[%s5750_s1 + $0x2a] sm:$0xc0] %vm637_vm10, %v710_v5   ;;  %1748 = vrot.lane.b32.xlu1 %v1747_v7, %s3153_s6  ;;  %v1796_v38 = vsel %vm14_vm2, %v2952_v22, %v1791_v29  ;;  %v2974_v53 = vld [vmem:[%s5749_s0 + $0x1b5] sm:$0x1]  }
  0xbf   :  { %v2932_v24 = vld [vmem:[%s5749_s0 + $0x136] ss:$16 sm:%s1708_s4]   ;;  %v2967_v27 = vld [vmem:[%s5749_s0 + $0x2c5] ss:$16 sm:%s1855_s16]   ;;  %s1917_s4 = smov 12  ;;  %s2076_s16 = smov 12 }
  0xc0   :  { %v894_v10 = vpop.permute.xlu2 %893   ;;  %v795_v20 = vpop.permute.xlu1 %794   ;;  %v1711_v30 = vsel %vm279_vm4, %v2932_v24, %v1706_v26  ;;  %v2968_v31 = vld [vmem:[%s5749_s0 + $0x2c5] ss:$16 sm:%s1858_s7]   ;;  %v2987_v48 = vld [vmem:[%s5749_s0 + $0x84] ss:$16 sm:%s1939_s5]   ;;  %s2014_s7 = smov 3  ;;  %s1989_s5 = smov 3 }
  0xc1   :  { %2737 = vst.msk [vmem:[%s5750_s1 + $0x12] sm:$0x1f] %vm796_vm11, %v894_v10   ;;  %v1715_v33 = vsel %vm283_vm5, %v2933_v25, %v1711_v30  ;;  %v1861_v36 = vsel %vm6_vm0, %v2968_v31, %v2967_v27  ;;  %v2943_v37 = vld [vmem:[%s5749_s0 + $0x1c5] ss:$16 sm:%s1755_s10]  }
  0xc2   :  { %2738 = vst.msk [vmem:[%s5750_s1 + $0x13] sm:$0xe0] %vm796_vm11, %v894_v10   ;;  %1725 = vrot.lane.b32.xlu0 %v2936_v8, %s3152_s2  ;;  %v2944_v39 = vld [vmem:[%s5749_s0 + $0x1c5] ss:$16 sm:%s1758_s26]   ;;  %v1865_v42 = vsel %vm274_vm3, %v2969_v34, %v1861_v36  ;;  %s1927_s26 = smov 192 }
  0xc3   :  { %797 = vst.msk [vmem:[%s5750_s1] sm:$0x7f] %vm796_vm11, %v795_v20   ;;  %v1761_v40 = vsel %vm6_vm0, %v2944_v39, %v2943_v37  ;;  %v2945_v41 = vld [vmem:[%s5749_s0 + $0x1c5] ss:$16 sm:%s1763_s29]   ;;  %s1830_s29 = smov 3 }
  0xc4   :  { %2714 = vst.msk [vmem:[%s5750_s1 + $0x1] sm:$0x80] %vm796_vm11, %v795_v20   ;;  %v772_v28 = vpop.permute.xlu0 %771   ;;  %v1766_v44 = vsel %vm10_vm1, %v2945_v41, %v1761_v40  ;;  %v2946_v45 = vld [vmem:[%s5749_s0 + $0x1c5] ss:$16 sm:%s1768_s9]   ;;  %v3007_v8 = vld [vmem:[%s5749_s0 + $0x300] sm:$0x10]  }
  0xc5   :  { %2709 = vst.msk [vmem:[%s5750_s1 + $0x1e] sm:$0x1] %vm637_vm10, %v772_v28   ;;  %v1771_v47 = vsel %vm14_vm2, %v2946_v45, %v1766_v44  ;;  %v2988_v52 = vld [vmem:[%s5749_s0 + $0x84] ss:$16 sm:%s1942_s14]   ;;  %s2161_s9 = smov 192  ;;  %s3155_s14 = smov 24  }
  0xc6   :  { %1716 = vrot.lane.b32.xlu2 %v1715_v33, %s3152_s2  ;;  %s1867_s2 = smov 96  ;;  %1822 = vrot.lane.b32.xlu1 %v1821_v32, %s3153_s6  ;;  %v2981_v54 = vld [vmem:[%s5749_s0 + $0x1c4] ss:$16 sm:%s1914_s22]   ;;  %v1945_v58 = vsel %vm6_vm0, %v2988_v52, %v2987_v48  ;;  %s2086_s22 = smov 192 }
  0xc7   :  { %v2970_v43 = vld [vmem:[%s5749_s0 + $0x135] ss:$16 sm:%s1867_s2]   ;;  %v2982_v56 = vld [vmem:[%s5749_s0 + $0x1c4] ss:$16 sm:%s1917_s4]   ;;  %s1997_s2 = smov 48  ;;  %s2375_s4 = smov 48 }
  0xc8   :  { %v954_v35 = vpop.permute.xlu2 %953   ;;  %v869_v46 = vpop.permute.xlu1 %868   ;;  %v1870_v50 = vsel %vm279_vm4, %v2970_v43, %v1865_v42  ;;  %v2989_v59 = vld [vmem:[%s5749_s0 + $0x84] ss:$16 sm:%s1947_s20]   ;;  %v2961_v62 = vld [vmem:[%s5749_s0 + $0x105] ss:$16 sm:%s1830_s29]   ;;  %s1843_s29 = smov 192  ;;  %v1920_v63 = vsel %vm6_vm0, %v2982_v56, %v2981_v54  ;;  %s2057_s20 = smov 48 }
  0xc9   :  { %956 = vst.msk [vmem:[%s5750_s1] sm:$0x7f] %vm955_vm12, %v954_v35   ;;  %v1874_v57 = vsel %vm283_vm5, %v2971_v51, %v1870_v50  ;;  %v2983_v60 = vld [vmem:[%s5749_s0 + $0x1c4] ss:$16 sm:%s1922_s15]   ;;  %v1950_v2 = vsel %vm10_vm1, %v2989_v59, %v1945_v58  ;;  %s2208_s15 = smov 3 }
  0xca   :  { %2752 = vst.msk [vmem:[%s5750_s1 + $0x1] sm:$0x80] %vm955_vm12, %v954_v35   ;;  %1797 = vrot.lane.b32.xlu0 %v1796_v38, %s3153_s6  ;;  %v2990_v61 = vld [vmem:[%s5749_s0 + $0x84] ss:$16 sm:%s4761_s17]   ;;  %v1925_v10 = vsel %vm10_vm1, %v2983_v60, %v1920_v63  ;;  %s1964_s17 = smov 3 }
  0xcb   :  { %2731 = vst.msk [vmem:[%s5750_s1 + $0x29] sm:$0x3f] %vm796_vm11, %v869_v46   ;;  %v2962_v0 = vld [vmem:[%s5749_s0 + $0x105] ss:$16 sm:%s1833_s11]   ;;  %v1955_v14 = vsel %vm14_vm2, %v2990_v61, %v1950_v2  ;;  %s1903_s11 = smov 192 }
  0xcc   :  { %2732 = vst.msk [vmem:[%s5750_s1 + $0x2a] sm:$0xc0] %vm796_vm11, %v869_v46   ;;  %v844_v49 = vpop.permute.xlu0 %843   ;;  %v2984_v3 = vld [vmem:[%s5749_s0 + $0x1c4] ss:$16 sm:%s1927_s26]   ;;  %v1836_v4 = vsel %vm6_vm0, %v2962_v0, %v2961_v62  ;;  %s2073_s26 = smov 3 }
  0xcd   :  { %2725 = vst.msk [vmem:[%s5750_s1 + $0x9] sm:$0x3f] %vm796_vm11, %v844_v49   ;;  %v2963_v5 = vld [vmem:[%s5749_s0 + $0x105] ss:$16 sm:%s1838_s13]   ;;  %v1930_v18 = vsel %vm14_vm2, %v2984_v3, %v1925_v10  ;;  %v3009_v28 = vld [vmem:[%s5749_s0 + $0x19d] sm:$0x80]  }
  0xce   :  { %2726 = vst.msk [vmem:[%s5750_s1 + $0xa] sm:$0xc0] %vm796_vm11, %v844_v49   ;;  %1772 = vrot.lane.b32.xlu2 %v1771_v47, %s3153_s6  ;;  %1884 = vrot.lane.b32.xlu1 %v2974_v53, %s3153_s6  ;;  %v1841_v6 = vsel %vm10_vm1, %v2963_v5, %v1836_v4  ;;  %s2101_s13 = smov 12 }
  0xcf   :  { %v2964_v7 = vld [vmem:[%s5749_s0 + $0x105] ss:$16 sm:%s1843_s29]   ;;  %v3005_v12 = vld [vmem:[%s5749_s0 + $0x2c4] ss:$16 sm:%s2014_s7]   ;;  %s1972_s7 = smov 48  ;;  %s2156_s29 = smov 48 }
  0xd0   :  { %v1028_v55 = vpop.permute.xlu2 %1027   ;;  %v931_v1 = vpop.permute.xlu1 %930   ;;  %v1846_v11 = vsel %vm14_vm2, %v2964_v7, %v1841_v6  ;;  %v3006_v13 = vld [vmem:[%s5749_s0 + $0x2c4] ss:$16 sm:%s2017_s25]   ;;  %v3019_v37 = vld [vmem:[%s5749_s0 + $0x1c3] ss:$16 sm:%s2073_s26]   ;;  %s2098_s26 = smov 3  ;;  %s2282_s25 = smov 3 }
  0xd1   :  { %2769 = vst.msk [vmem:[%s5750_s1 + $0x29] sm:$0x3f] %vm955_vm12, %v1028_v55   ;;  %v2020_v15 = vsel %vm6_vm0, %v3006_v13, %v3005_v12  ;;  %v2999_v17 = vld [vmem:[%s5749_s0 + $0x104] ss:$16 sm:%s1989_s5]   ;;  %s2503_s5 = smov 96 }
  0xd2   :  { %2770 = vst.msk [vmem:[%s5750_s1 + $0x2a] sm:$0xc0] %vm955_vm12, %v1028_v55   ;;  %1875 = vrot.lane.b32.xlu0 %v1874_v57, %s3153_s6  ;;  %v2024_v19 = vsel %vm274_vm3, %v3007_v8, %v2020_v15  ;;  %v3008_v20 = vld [vmem:[%s5749_s0 + $0x134] ss:$16 sm:%s2026_s28]   ;;  %s2136_s28 = smov 192 }
  0xd3   :  { %2747 = vst.msk [vmem:[%s5750_s1 + $0x1e] sm:$0x1] %vm796_vm11, %v931_v1   ;;  %v3000_v21 = vld [vmem:[%s5749_s0 + $0x104] ss:$16 sm:%s1992_s12]   ;;  %v2029_v27 = vsel %vm279_vm4, %v3008_v20, %v2024_v19  ;;  %s2062_s12 = smov 192 }
  0xd4   :  { %v922_v9 = vpop.permute.xlu0 %921   ;;  %v3001_v22 = vld [vmem:[%s5749_s0 + $0x104] ss:$16 sm:%s1997_s2]   ;;  %v1995_v23 = vsel %vm6_vm0, %v3000_v21, %v2999_v17  ;;  %v2033_v38 = vsel %vm283_vm5, %v3009_v28, %v2029_v27  ;;  %v3020_v39 = vld [vmem:[%s5749_s0 + $0x1c3] ss:$16 sm:%s2076_s16]   ;;  %s2211_s2 = smov 12 }
  0xd5   :  { %2744 = vst.msk [vmem:[%s5750_s1 + $0x32] sm:$0x1f] %vm796_vm11, %v922_v9   ;;  %v2976_v24 = vld [vmem:[%s5749_s0 + $0x4] ss:$16 sm:%s1890_s3]   ;;  %v2000_v35 = vsel %vm10_vm1, %v3001_v22, %v1995_v23  ;;  %v2079_v42 = vsel %vm6_vm0, %v3020_v39, %v3019_v37  ;;  %v3050_v37 = vld [vmem:[%s5749_s0 + $0x1b3] sm:$0x1]  }
  0xd6   :  { %2745 = vst.msk [vmem:[%s5750_s1 + $0x16] sm:$0xe0] %vm796_vm11, %v922_v9   ;;  %1847 = vrot.lane.b32.xlu2 %v1846_v11, %s3153_s6  ;;  %1956 = vrot.lane.b32.xlu1 %v1955_v14, %s3154_s24  ;;  %s1967_s6 = smov 12  ;;  %v3012_v11 = vld [vmem:[%s5749_s0 + $0x1b4] sm:$0x1]   ;;  %s2265_s3 = smov 48 }
  0xd7   :  { %v2977_v25 = vld [vmem:[%s5749_s0 + $0x4] ss:$16 sm:%s1893_s21]   ;;  %v3021_v43 = vld [vmem:[%s5749_s0 + $0x1c3] ss:$16 sm:%s2081_s30]   ;;  %s2416_s30 = smov 3  ;;  %s2479_s21 = smov 192 }
  0xd8   :  { %v1090_v16 = vpop.permute.xlu2 %1089   ;;  %v1003_v26 = vpop.permute.xlu1 %1002   ;;  %v3002_v29 = vld [vmem:[%s5749_s0 + $0x104] ss:$16 sm:%s2002_s19]   ;;  %v1896_v30 = vsel %vm6_vm0, %v2977_v25, %v2976_v24  ;;  %s2049_s19 = smov 3  ;;  %v3015_v45 = vld [vmem:[%s5749_s0 + $0x3] ss:$16 sm:%s2052_s8]   ;;  %v2084_v50 = vsel %vm10_vm1, %v3021_v43, %v2079_v42  ;;  %s2232_s8 = smov 3 }
  0xd9   :  { %2785 = vst.msk [vmem:[%s5750_s1 + $0x1e] sm:$0x1] %vm955_vm12, %v1090_v16   ;;  %v2978_v31 = vld [vmem:[%s5749_s0 + $0x4] ss:$16 sm:%s1898_s23]   ;;  %v2005_v41 = vsel %vm14_vm2, %v3002_v29, %v2000_v35  ;;  %s2285_s23 = smov 12 }
  0xda   :  { %1931 = vrot.lane.b32.xlu0 %v1930_v18, %s3154_s24  ;;  %2763 = vst.msk [vmem:[%s5750_s1 + $0x9] sm:$0x3f] %vm955_vm12, %v1003_v26   ;;  %v1901_v32 = vsel %vm10_vm1, %v2978_v31, %v1896_v30  ;;  %v2979_v33 = vld [vmem:[%s5749_s0 + $0x4] ss:$16 sm:%s1903_s11]   ;;  %s2131_s11 = smov 48 }
  0xdb   :  { %2764 = vst.msk [vmem:[%s5750_s1 + $0xa] sm:$0xc0] %vm955_vm12, %v1003_v26   ;;  %v1906_v36 = vsel %vm14_vm2, %v2979_v33, %v1901_v32  ;;  %v3014_v44 = vld [vmem:[%s5749_s0 + $0x3] ss:$16 sm:%s2049_s19]   ;;  %s2126_s19 = smov 12 }
  0xdc   :  { %v978_v34 = vpop.permute.xlu0 %977   ;;  %v3022_v46 = vld [vmem:[%s5749_s0 + $0x1c3] ss:$16 sm:%s2086_s22]   ;;  %v2055_v47 = vsel %vm6_vm0, %v3015_v45, %v3014_v44  ;;  %v2993_v52 = vld [vmem:[%s5749_s0 + $0x244] ss:$16 sm:%s1964_s17]   ;;  %s2295_s17 = smov 192  ;;  %s2173_s22 = smov 3 }
  0xdd   :  { %2757 = vst.msk [vmem:[%s5750_s1 + $0x20] sm:$0x7f] %vm955_vm12, %v978_v34   ;;  %v3016_v48 = vld [vmem:[%s5749_s0 + $0x3] ss:$16 sm:%s2057_s20]   ;;  %s2148_s20 = smov 3  ;;  %v2089_v58 = vsel %vm14_vm2, %v3022_v46, %v2084_v50 }
  0xde   :  { %2758 = vst.msk [vmem:[%s5750_s1 + $0x21] sm:$0x80] %vm955_vm12, %v978_v34   ;;  %1907 = vrot.lane.b32.xlu2 %v1906_v36, %s3154_s24  ;;  %2034 = vrot.lane.b32.xlu1 %v2033_v38, %s3154_s24  ;;  %v2060_v55 = vsel %vm10_vm1, %v3016_v48, %v2055_v47  ;;  %v3045_v48 = vld [vmem:[%s5749_s0 + $0x2ff] sm:$0x10]  }
  0xdf   :  { %v3017_v51 = vld [vmem:[%s5749_s0 + $0x3] ss:$16 sm:%s2062_s12]   ;;  %v2994_v53 = vld [vmem:[%s5749_s0 + $0x244] ss:$16 sm:%s1967_s6]   ;;  %s2151_s12 = smov 12  ;;  %s2344_s6 = smov 96 }
  0xe0   :  { %v1162_v40 = vpop.permute.xlu2 %1161   ;;  %v1081_v49 = vpop.permute.xlu1 %1080   ;;  %v1970_v56 = vsel %vm6_vm0, %v2994_v53, %v2993_v52  ;;  %v2995_v57 = vld [vmem:[%s5749_s0 + $0x244] ss:$16 sm:%s1972_s7]   ;;  %v3037_v63 = vld [vmem:[%s5749_s0 + $0x103] ss:$16 sm:%s2148_s20]   ;;  %s2123_s7 = smov 3  ;;  %v2065_v0 = vsel %vm14_vm2, %v3017_v51, %v2060_v55  ;;  %s2176_s20 = smov 12 }
  0xe1   :  { %2801 = vst.msk [vmem:[%s5750_s1 + $0x9] sm:$0x3f] %vm1114_vm13, %v1162_v40   ;;  %v1975_v59 = vsel %vm10_vm1, %v2995_v57, %v1970_v56  ;;  %v2996_v60 = vld [vmem:[%s5749_s0 + $0x244] ss:$16 sm:%s1977_s27]   ;;  %v3047_v50 = vld [vmem:[%s5749_s0 + $0x19c] sm:$0x80]  }
  0xe2   :  { %2006 = vrot.lane.b32.xlu0 %v2005_v41, %s3154_s24  ;;  %2802 = vst.msk [vmem:[%s5750_s1 + $0xa] sm:$0xc0] %vm1114_vm13, %v1162_v40   ;;  %v1980_v62 = vsel %vm14_vm2, %v2996_v60, %v1975_v59  ;;  %v3038_v1 = vld [vmem:[%s5749_s0 + $0x103] ss:$16 sm:%s2151_s12]   ;;  %s2332_s12 = smov 3  ;;  %s2404_s27 = smov 192 }
  0xe3   :  { %2782 = vst.msk [vmem:[%s5750_s1 + $0x32] sm:$0x1f] %vm955_vm12, %v1081_v49   ;;  %v2154_v2 = vsel %vm6_vm0, %v3038_v1, %v3037_v63  ;;  %v3039_v3 = vld [vmem:[%s5749_s0 + $0x103] ss:$16 sm:%s2156_s29]   ;;  %s2335_s29 = smov 12 }
  0xe4   :  { %2783 = vst.msk [vmem:[%s5750_s1 + $0x16] sm:$0xe0] %vm955_vm12, %v1081_v49   ;;  %v1053_v54 = vpop.permute.xlu0 %1052   ;;  %v3040_v4 = vld [vmem:[%s5749_s0 + $0x103] ss:$16 sm:%s2161_s9]   ;;  %v2159_v7 = vsel %vm10_vm1, %v3039_v3, %v2154_v2  ;;  %v3083_v57 = vld [vmem:[%s5749_s0 + $0x2fe] sm:$0x10]  }
  0xe5   :  { %2775 = vst.msk [vmem:[%s5750_s1 + $0x12] sm:$0x1f] %vm955_vm12, %v1053_v54   ;;  %v3031_v5 = vld [vmem:[%s5749_s0 + $0x243] ss:$16 sm:%s2123_s7]   ;;  %v2164_v15 = vsel %vm14_vm2, %v3040_v4, %v2159_v7  ;;  %s2270_s7 = smov 192  ;;  %s2491_s9 = smov 3 }
  0xe6   :  { %2776 = vst.msk [vmem:[%s5750_s1 + $0x13] sm:$0xe0] %vm955_vm12, %v1053_v54   ;;  %1981 = vrot.lane.b32.xlu2 %v1980_v62, %s3154_s24  ;;  %2090 = vrot.lane.b32.xlu1 %v2089_v58, %s3155_s14 }
  0xe7   :  { %v3032_v8 = vld [vmem:[%s5749_s0 + $0x243] ss:$16 sm:%s2126_s19]   ;;  %s2216_s19 = smov 48  ;;  %v3052_v16 = vld [vmem:[%s5749_s0 + $0x2] ss:$16 sm:%s2208_s15]   ;;  %s2106_s15 = smov 48 }
  0xe8   :  { %v1240_v61 = vpop.permute.xlu2 %1239   ;;  %v1137_v6 = vpop.permute.xlu1 %1136   ;;  %v2129_v9 = vsel %vm6_vm0, %v3032_v8, %v3031_v5  ;;  %v3033_v10 = vld [vmem:[%s5749_s0 + $0x243] ss:$16 sm:%s2131_s11]   ;;  %s2221_s11 = smov 192  ;;  %v3053_v18 = vld [vmem:[%s5749_s0 + $0x2] ss:$16 sm:%s2211_s2]  }
  0xe9   :  { %2820 = vst.msk [vmem:[%s5750_s1 + $0x32] sm:$0x1f] %vm1114_vm13, %v1240_v61   ;;  %v2134_v13 = vsel %vm10_vm1, %v3033_v10, %v2129_v9  ;;  %v3034_v14 = vld [vmem:[%s5749_s0 + $0x243] ss:$16 sm:%s2136_s28]   ;;  %v2214_v20 = vsel %vm6_vm0, %v3053_v18, %v3052_v16  ;;  %s2185_s28 = smov 96 }
  0xea   :  { %2821 = vst.msk [vmem:[%s5750_s1 + $0x16] sm:$0xe0] %vm1114_vm13, %v1240_v61   ;;  %2066 = vrot.lane.b32.xlu0 %v2065_v0, %s3155_s14  ;;  %v2139_v19 = vsel %vm14_vm2, %v3034_v14, %v2134_v13  ;;  %v3054_v21 = vld [vmem:[%s5749_s0 + $0x2] ss:$16 sm:%s2216_s19]   ;;  %s3156_s19 = smov 16  }
  0xeb   :  { %2795 = vst.msk [vmem:[%s5750_s1 + $0x20] sm:$0x7f] %vm1114_vm13, %v1137_v6   ;;  %v3055_v22 = vld [vmem:[%s5749_s0 + $0x2] ss:$16 sm:%s2221_s11]   ;;  %v2219_v26 = vsel %vm10_vm1, %v3054_v21, %v2214_v20  ;;  %s2429_s11 = smov 192 }
  0xec   :  { %2796 = vst.msk [vmem:[%s5750_s1 + $0x21] sm:$0x80] %vm1114_vm13, %v1137_v6   ;;  %v1113_v12 = vpop.permute.xlu0 %1112   ;;  %v3025_v23 = vld [vmem:[%s5749_s0 + $0x83] ss:$16 sm:%s2098_s26]   ;;  %s2290_s26 = smov 48  ;;  %v2224_v34 = vsel %vm14_vm2, %v3055_v22, %v2219_v26 }
  0xed   :  { %1115 = vst.msk [vmem:[%s5750_s1] sm:$0x7f] %vm1114_vm13, %v1113_v12   ;;  %v3026_v24 = vld [vmem:[%s5749_s0 + $0x83] ss:$16 sm:%s2101_s13]   ;;  %s2394_s13 = smov 12 }
  0xee   :  { %2790 = vst.msk [vmem:[%s5750_s1 + $0x1] sm:$0x80] %vm1114_vm13, %v1113_v12   ;;  %2043 = vrot.lane.b32.xlu2 %v3012_v11, %s3154_s24  ;;  %2165 = vrot.lane.b32.xlu1 %v2164_v15, %s3155_s14  ;;  %v2104_v27 = vsel %vm6_vm0, %v3026_v24, %v3025_v23  ;;  %v3085_v13 = vld [vmem:[%s5749_s0 + $0x19b] sm:$0x80]  }
  0xef   :  { %v3027_v28 = vld [vmem:[%s5749_s0 + $0x83] ss:$16 sm:%s2106_s15]   ;;  %v3069_v33 = vld [vmem:[%s5749_s0 + $0x242] ss:$16 sm:%s2282_s25]   ;;  %s2257_s15 = smov 3  ;;  %s2367_s25 = smov 3 }
  0xf0   :  { %v1296_v17 = vpop.permute.xlu2 %1295   ;;  %v1212_v25 = vpop.permute.xlu1 %1211   ;;  %v2109_v29 = vsel %vm10_vm1, %v3027_v28, %v2104_v27  ;;  %v3028_v30 = vld [vmem:[%s5749_s0 + $0x83] ss:$16 sm:%s2111_s18]   ;;  %v3070_v35 = vld [vmem:[%s5749_s0 + $0x242] ss:$16 sm:%s2285_s23]   ;;  %s2260_s18 = smov 12  ;;  %s2419_s23 = smov 12 }
  0xf1   :  { %2833 = vst.msk [vmem:[%s5750_s1 + $0x20] sm:$0x7f] %vm1273_vm14, %v1296_v17   ;;  %v2114_v32 = vsel %vm14_vm2, %v3028_v30, %v2109_v29  ;;  %v2288_v38 = vsel %vm6_vm0, %v3070_v35, %v3069_v33  ;;  %v3071_v39 = vld [vmem:[%s5749_s0 + $0x242] ss:$16 sm:%s2290_s26]   ;;  %s2391_s26 = smov 3 }
  0xf2   :  { %2834 = vst.msk [vmem:[%s5750_s1 + $0x21] sm:$0x80] %vm1273_vm14, %v1296_v17   ;;  %2140 = vrot.lane.b32.xlu0 %v2139_v19, %s3155_s14  ;;  %v3072_v40 = vld [vmem:[%s5749_s0 + $0x242] ss:$16 sm:%s2295_s17]   ;;  %v2293_v45 = vsel %vm10_vm1, %v3071_v39, %v2288_v38  ;;  %s2235_s17 = smov 12 }
  0xf3   :  { %2813 = vst.msk [vmem:[%s5750_s1 + $0x12] sm:$0x1f] %vm1114_vm13, %v1212_v25   ;;  %v3063_v41 = vld [vmem:[%s5749_s0 + $0x82] ss:$16 sm:%s2257_s15]   ;;  %v2298_v54 = vsel %vm14_vm2, %v3072_v40, %v2293_v45  ;;  %s2315_s15 = smov 48 }
  0xf4   :  { %2814 = vst.msk [vmem:[%s5750_s1 + $0x13] sm:$0xe0] %vm1114_vm13, %v1212_v25   ;;  %v1187_v31 = vpop.permute.xlu0 %1186   ;;  %v3064_v42 = vld [vmem:[%s5749_s0 + $0x82] ss:$16 sm:%s2260_s18]   ;;  %v3121_v40 = vld [vmem:[%s5749_s0 + $0x2fd] sm:$0x10]  }
  0xf5   :  { %2807 = vst.msk [vmem:[%s5750_s1 + $0x29] sm:$0x3f] %vm1114_vm13, %v1187_v31   ;;  %v3065_v43 = vld [vmem:[%s5749_s0 + $0x82] ss:$16 sm:%s2265_s3]   ;;  %v2263_v46 = vsel %vm6_vm0, %v3064_v42, %v3063_v41  ;;  %s2444_s18 = smov 12 }
  0xf6   :  { %2808 = vst.msk [vmem:[%s5750_s1 + $0x2a] sm:$0xc0] %vm1114_vm13, %v1187_v31   ;;  %2115 = vrot.lane.b32.xlu2 %v2114_v32, %s3155_s14  ;;  %2225 = vrot.lane.b32.xlu1 %v2224_v34, %s3156_s19  ;;  %v2268_v52 = vsel %vm10_vm1, %v3065_v43, %v2263_v46  ;;  %v3088_v15 = vld [vmem:[%s5749_s0 + $0x1b2] sm:$0x1]  }
  0xf7   :  { %v3066_v47 = vld [vmem:[%s5749_s0 + $0x82] ss:$16 sm:%s2270_s7]   ;;  %v3043_v49 = vld [vmem:[%s5749_s0 + $0x2c3] ss:$16 sm:%s2173_s22]   ;;  %s2245_s7 = smov 192  ;;  %s2466_s22 = smov 3 }
  0xf8   :  { %v1371_v36 = vpop.permute.xlu2 %1370   ;;  %v1272_v44 = vpop.permute.xlu1 %1271   ;;  %v3044_v53 = vld [vmem:[%s5749_s0 + $0x2c3] ss:$16 sm:%s2176_s20]   ;;  %v3081_v60 = vld [vmem:[%s5749_s0 + $0x2c2] ss:$16 sm:%s2332_s12]   ;;  %v2273_v62 = vsel %vm14_vm2, %v3066_v47, %v2268_v52  ;;  %s2469_s20 = smov 12  ;;  %s2380_s12 = smov 192 }
  0xf9   :  { %2851 = vst.msk [vmem:[%s5750_s1 + $0x12] sm:$0x1f] %vm1273_vm14, %v1371_v36   ;;  %v2179_v55 = vsel %vm6_vm0, %v3044_v53, %v3043_v49  ;;  %v3046_v56 = vld [vmem:[%s5749_s0 + $0x133] ss:$16 sm:%s2185_s28]   ;;  %v3123_v52 = vld [vmem:[%s5749_s0 + $0x19a] sm:$0x80]  }
  0xfa   :  { %2852 = vst.msk [vmem:[%s5750_s1 + $0x13] sm:$0xe0] %vm1273_vm14, %v1371_v36   ;;  %2202 = vrot.lane.b32.xlu0 %v3050_v37, %s3155_s14  ;;  %v2183_v59 = vsel %vm274_vm3, %v3045_v48, %v2179_v55  ;;  %v3082_v61 = vld [vmem:[%s5749_s0 + $0x2c2] ss:$16 sm:%s2335_s29]   ;;  %s2320_s29 = smov 192 }
  0xfb   :  { %1274 = vst.msk [vmem:[%s5750_s1] sm:$0x7f] %vm1273_vm14, %v1272_v44   ;;  %v2188_v63 = vsel %vm279_vm4, %v3046_v56, %v2183_v59  ;;  %v2338_v0 = vsel %vm6_vm0, %v3082_v61, %v3081_v60  ;;  %v3084_v1 = vld [vmem:[%s5749_s0 + $0x132] ss:$16 sm:%s2344_s6]   ;;  %s2240_s6 = smov 48 }
  0xfc   :  { %2828 = vst.msk [vmem:[%s5750_s1 + $0x1] sm:$0x80] %vm1273_vm14, %v1272_v44   ;;  %v1249_v51 = vpop.permute.xlu0 %1248   ;;  %v2192_v2 = vsel %vm283_vm5, %v3047_v50, %v2188_v63  ;;  %v3057_v3 = vld [vmem:[%s5749_s0 + $0x1c2] ss:$16 sm:%s2232_s8]   ;;  %v2342_v4 = vsel %vm274_vm3, %v3083_v57, %v2338_v0  ;;  %s2424_s8 = smov 48 }
  0xfd   :  { %2823 = vst.msk [vmem:[%s5750_s1 + $0x1e] sm:$0x1] %vm1114_vm13, %v1249_v51   ;;  %v3058_v5 = vld [vmem:[%s5749_s0 + $0x1c2] ss:$16 sm:%s2235_s17]   ;;  %v2347_v12 = vsel %vm279_vm4, %v3084_v1, %v2342_v4  ;;  %s2310_s17 = smov 12 }
  0xfe   :  { %2299 = vrot.lane.b32.xlu1 %v2298_v54, %s3156_s19  ;;  %2193 = vrot.lane.b32.xlu2 %v2192_v2, %s3155_s14  ;;  %v2238_v7 = vsel %vm6_vm0, %v3058_v5, %v3057_v3  ;;  %v3059_v8 = vld [vmem:[%s5749_s0 + $0x1c2] ss:$16 sm:%s2240_s6]   ;;  %s2399_s14 = smov 48  ;;  %v2351_v18 = vsel %vm283_vm5, %v3085_v13, %v2347_v12  ;;  %s3157_s6 = smov 8  }
  0xff   :  { %v2243_v9 = vsel %vm10_vm1, %v3059_v8, %v2238_v7  ;;  %v3060_v10 = vld [vmem:[%s5749_s0 + $0x1c2] ss:$16 sm:%s2245_s7]   ;;  %v3101_v14 = vld [vmem:[%s5749_s0 + $0x81] ss:$16 sm:%s2416_s30]  }
 0x100   :  { %v1431_v58 = vpop.permute.xlu2 %1430   ;;  %v1346_v6 = vpop.permute.xlu1 %1345   ;;  %v3102_v16 = vld [vmem:[%s5749_s0 + $0x81] ss:$16 sm:%s2419_s23]   ;;  %v2248_v17 = vsel %vm14_vm2, %v3060_v10, %v2243_v9  ;;  %v3076_v33 = vld [vmem:[%s5749_s0 + $0x102] ss:$16 sm:%s2310_s17]   ;;  %s2494_s23 = smov 12  ;;  %s2441_s17 = smov 3 }
 0x101   :  { %1433 = vst.msk [vmem:[%s5750_s1] sm:$0x7f] %vm1432_vm15, %v1431_v58   ;;  %v2422_v19 = vsel %vm6_vm0, %v3102_v16, %v3101_v14  ;;  %v3103_v20 = vld [vmem:[%s5749_s0 + $0x81] ss:$16 sm:%s2424_s8]   ;;  %s2370_s8 = smov 12 }
 0x102   :  { %2866 = vst.msk [vmem:[%s5750_s1 + $0x1] sm:$0x80] %vm1432_vm15, %v1431_v58   ;;  %2274 = vrot.lane.b32.xlu0 %v2273_v62, %s3156_s19  ;;  %v3095_v21 = vld [vmem:[%s5749_s0 + $0x1c1] ss:$16 sm:%s2391_s26]   ;;  %s2307_s26 = smov 3  ;;  %v2427_v28 = vsel %vm10_vm1, %v3103_v20, %v2422_v19 }
 0x103   :  { %2845 = vst.msk [vmem:[%s5750_s1 + $0x29] sm:$0x3f] %vm1273_vm14, %v1346_v6   ;;  %v3104_v23 = vld [vmem:[%s5749_s0 + $0x81] ss:$16 sm:%s2429_s11]   ;;  %s2454_s11 = smov 192 }
 0x104   :  { %2846 = vst.msk [vmem:[%s5750_s1 + $0x2a] sm:$0xc0] %vm1273_vm14, %v1346_v6   ;;  %v1321_v11 = vpop.permute.xlu0 %1320   ;;  %v3096_v24 = vld [vmem:[%s5749_s0 + $0x1c1] ss:$16 sm:%s2394_s13]   ;;  %v2432_v35 = vsel %vm14_vm2, %v3104_v23, %v2427_v28 }
 0x105   :  { %2839 = vst.msk [vmem:[%s5750_s1 + $0x9] sm:$0x3f] %vm1273_vm14, %v1321_v11   ;;  %v2397_v25 = vsel %vm6_vm0, %v3096_v24, %v3095_v21  ;;  %v3097_v26 = vld [vmem:[%s5749_s0 + $0x1c1] ss:$16 sm:%s2399_s14]  }
 0x106   :  { %2840 = vst.msk [vmem:[%s5750_s1 + $0xa] sm:$0xc0] %vm1273_vm14, %v1321_v11   ;;  %2361 = vrot.lane.b32.xlu1 %v3088_v15, %s3156_s19  ;;  %2249 = vrot.lane.b32.xlu2 %v2248_v17, %s3156_s19  ;;  %v2402_v32 = vsel %vm10_vm1, %v3097_v26, %v2397_v25  ;;  %v3126_v16 = vld [vmem:[%s5749_s0 + $0x1b1] sm:$0x1]  }
 0x107   :  { %v3098_v29 = vld [vmem:[%s5749_s0 + $0x1c1] ss:$16 sm:%s2404_s27]   ;;  %v3075_v30 = vld [vmem:[%s5749_s0 + $0x102] ss:$16 sm:%s2307_s26]  }
 0x108   :  { %v1505_v22 = vpop.permute.xlu2 %1504   ;;  %v1408_v27 = vpop.permute.xlu1 %1407   ;;  %v3077_v34 = vld [vmem:[%s5749_s0 + $0x102] ss:$16 sm:%s2315_s15]   ;;  %v2313_v36 = vsel %vm6_vm0, %v3076_v33, %v3075_v30  ;;  %v3119_v39 = vld [vmem:[%s5749_s0 + $0x2c1] ss:$16 sm:%s2491_s9]   ;;  %v2407_v41 = vsel %vm14_vm2, %v3098_v29, %v2402_v32 }
 0x109   :  { %2883 = vst.msk [vmem:[%s5750_s1 + $0x29] sm:$0x3f] %vm1432_vm15, %v1505_v22   ;;  %v3078_v37 = vld [vmem:[%s5749_s0 + $0x102] ss:$16 sm:%s2320_s29]   ;;  %v2318_v38 = vsel %vm10_vm1, %v3077_v34, %v2313_v36  ;;  %s2474_s29 = smov 48 }
 0x10a   :  { %2884 = vst.msk [vmem:[%s5750_s1 + $0x2a] sm:$0xc0] %vm1432_vm15, %v1505_v22   ;;  %2352 = vrot.lane.b32.xlu0 %v2351_v18, %s3156_s19  ;;  %v2323_v42 = vsel %vm14_vm2, %v3078_v37, %v2318_v38  ;;  %v3120_v43 = vld [vmem:[%s5749_s0 + $0x2c1] ss:$16 sm:%s2494_s23]  }
 0x10b   :  { %2861 = vst.msk [vmem:[%s5750_s1 + $0x1e] sm:$0x1] %vm1273_vm14, %v1408_v27   ;;  %v3122_v44 = vld [vmem:[%s5749_s0 + $0x131] ss:$16 sm:%s2503_s5]   ;;  %v2497_v46 = vsel %vm6_vm0, %v3120_v43, %v3119_v39 }
 0x10c   :  { %v1399_v31 = vpop.permute.xlu0 %1398   ;;  %v3113_v47 = vld [vmem:[%s5749_s0 + $0x101] ss:$16 sm:%s2466_s22]   ;;  %v2501_v48 = vsel %vm274_vm3, %v3121_v40, %v2497_v46  ;;  %vm1591_vm3 = vcmask 458112  }
 0x10d   :  { %2858 = vst.msk [vmem:[%s5750_s1 + $0x32] sm:$0x1f] %vm1273_vm14, %v1399_v31   ;;  %v3114_v49 = vld [vmem:[%s5749_s0 + $0x101] ss:$16 sm:%s2469_s20]   ;;  %v2506_v51 = vsel %vm279_vm4, %v3122_v44, %v2501_v48  ;;  %vm2227_vm4 = vcmask 195712  }
 0x10e   :  { %2859 = vst.msk [vmem:[%s5750_s1 + $0x16] sm:$0xe0] %vm1273_vm14, %v1399_v31   ;;  %2433 = vrot.lane.b32.xlu1 %v2432_v35, %s3157_s6  ;;  %2324 = vrot.lane.b32.xlu2 %v2323_v42, %s3156_s19  ;;  %v2472_v53 = vsel %vm6_vm0, %v3114_v49, %v3113_v47  ;;  %v2510_v59 = vsel %vm283_vm5, %v3123_v52, %v2506_v51  ;;  %s2449_s19 = smov 48  ;;  %vm2386_vm5 = vcmask 130112  }
 0x10f   :  { %v3115_v54 = vld [vmem:[%s5749_s0 + $0x101] ss:$16 sm:%s2474_s29]  }
 0x110   :  { %v1567_v45 = vpop.permute.xlu2 %1566   ;;  %v1480_v50 = vpop.permute.xlu1 %1479   ;;  %v3116_v55 = vld [vmem:[%s5749_s0 + $0x101] ss:$16 sm:%s2479_s21]   ;;  %v2477_v57 = vsel %vm10_vm1, %v3115_v54, %v2472_v53 }
 0x111   :  { %2899 = vst.msk [vmem:[%s5750_s1 + $0x1e] sm:$0x1] %vm1432_vm15, %v1567_v45   ;;  %v3090_v58 = vld [vmem:[%s5749_s0 + $0x1] ss:$16 sm:%s2367_s25]   ;;  %v2482_v63 = vsel %vm14_vm2, %v3116_v55, %v2477_v57 }
 0x112   :  { %2408 = vrot.lane.b32.xlu0 %v2407_v41, %s3157_s6  ;;  %2877 = vst.msk [vmem:[%s5750_s1 + $0x9] sm:$0x3f] %vm1432_vm15, %v1480_v50   ;;  %v3091_v60 = vld [vmem:[%s5749_s0 + $0x1] ss:$16 sm:%s2370_s8]  }
 0x113   :  { %2878 = vst.msk [vmem:[%s5750_s1 + $0xa] sm:$0xc0] %vm1432_vm15, %v1480_v50   ;;  %v2373_v61 = vsel %vm6_vm0, %v3091_v60, %v3090_v58  ;;  %v3092_v62 = vld [vmem:[%s5749_s0 + $0x1] ss:$16 sm:%s2375_s4]  }
 0x114   :  { %v1455_v56 = vpop.permute.xlu0 %1454   ;;  %v2378_v0 = vsel %vm10_vm1, %v3092_v62, %v2373_v61  ;;  %v3093_v1 = vld [vmem:[%s5749_s0 + $0x1] ss:$16 sm:%s2380_s12]  }
 0x115   :  { %2871 = vst.msk [vmem:[%s5750_s1 + $0x20] sm:$0x7f] %vm1432_vm15, %v1455_v56   ;;  %v3107_v3 = vld [vmem:[%s5749_s0 + $0x241] ss:$16 sm:%s2441_s17]   ;;  %v2383_v4 = vsel %vm14_vm2, %v3093_v1, %v2378_v0 }
 0x116   :  { %2872 = vst.msk [vmem:[%s5750_s1 + $0x21] sm:$0x80] %vm1432_vm15, %v1455_v56   ;;  %2511 = vrot.lane.b32.xlu1 %v2510_v59, %s3157_s6  ;;  %v3108_v5 = vld [vmem:[%s5749_s0 + $0x241] ss:$16 sm:%s2444_s18]  }
 0x117   :  { %2384 = vrot.lane.b32.xlu2 %v2383_v4, %s3157_s6  ;;  %v2447_v6 = vsel %vm6_vm0, %v3108_v5, %v3107_v3  ;;  %v3109_v7 = vld [vmem:[%s5749_s0 + $0x241] ss:$16 sm:%s2449_s19]   ;;  %vm1750_vm0 = vcmask 392512  }
 0x118   :  { %v1639_v2 = vpop.permute.xlu2 %1638   ;;  %v1558_v8 = vpop.permute.xlu1 %1557   ;;  %v2452_v9 = vsel %vm10_vm1, %v3109_v7, %v2447_v6  ;;  %v3110_v10 = vld [vmem:[%s5749_s0 + $0x241] ss:$16 sm:%s2454_s11]   ;;  %vm1909_vm1 = vcmask 326912  }
 0x119   :  { %2915 = vst.msk [vmem:[%s5750_s1 + $0x9] sm:$0x3f] %vm1591_vm3, %v1639_v2   ;;  %v2457_v12 = vsel %vm14_vm2, %v3110_v10, %v2452_v9  ;;  %vm2068_vm2 = vcmask 261312  }
 0x11a   :  { %2916 = vst.msk [vmem:[%s5750_s1 + $0xa] sm:$0xc0] %vm1591_vm3, %v1639_v2   ;;  %2483 = vrot.lane.b32.xlu0 %v2482_v63, %s3157_s6 }
 0x11b   :  { %2896 = vst.msk [vmem:[%s5750_s1 + $0x32] sm:$0x1f] %vm1432_vm15, %v1558_v8  }
 0x11c   :  { %2897 = vst.msk [vmem:[%s5750_s1 + $0x16] sm:$0xe0] %vm1432_vm15, %v1558_v8   ;;  %v1530_v11 = vpop.permute.xlu0 %1529  }
 0x11d   :  { %2889 = vst.msk [vmem:[%s5750_s1 + $0x12] sm:$0x1f] %vm1432_vm15, %v1530_v11  }
 0x11e   :  { %2890 = vst.msk [vmem:[%s5750_s1 + $0x13] sm:$0xe0] %vm1432_vm15, %v1530_v11  }
 0x11f   :  { %2458 = vrot.lane.b32.xlu2 %v2457_v12, %s3157_s6 }
 0x120   :  { %v1717_v13 = vpop.permute.xlu2 %1716   ;;  %v1614_v14 = vpop.permute.xlu1 %1613  }
 0x121   :  { %2934 = vst.msk [vmem:[%s5750_s1 + $0x32] sm:$0x1f] %vm1591_vm3, %v1717_v13  }
 0x122   :  { %2935 = vst.msk [vmem:[%s5750_s1 + $0x16] sm:$0xe0] %vm1591_vm3, %v1717_v13  }
 0x123   :  { %2909 = vst.msk [vmem:[%s5750_s1 + $0x20] sm:$0x7f] %vm1591_vm3, %v1614_v14  }
 0x124   :  { %2910 = vst.msk [vmem:[%s5750_s1 + $0x21] sm:$0x80] %vm1591_vm3, %v1614_v14   ;;  %v1590_v15 = vpop.permute.xlu0 %1589  }
 0x125   :  { %1592 = vst.msk [vmem:[%s5750_s1] sm:$0x7f] %vm1591_vm3, %v1590_v15  }
 0x126   :  { %2904 = vst.msk [vmem:[%s5750_s1 + $0x1] sm:$0x80] %vm1591_vm3, %v1590_v15  }
 0x127   :  { %2520 = vrot.lane.b32.xlu2 %v3126_v16, %s3157_s6 }
 0x128   :  { %v1773_v17 = vpop.permute.xlu2 %1772   ;;  %v1689_v18 = vpop.permute.xlu1 %1688  }
 0x129   :  { %2947 = vst.msk [vmem:[%s5750_s1 + $0x20] sm:$0x7f] %vm1750_vm0, %v1773_v17  }
 0x12a   :  { %2948 = vst.msk [vmem:[%s5750_s1 + $0x21] sm:$0x80] %vm1750_vm0, %v1773_v17  }
 0x12b   :  { %2927 = vst.msk [vmem:[%s5750_s1 + $0x12] sm:$0x1f] %vm1591_vm3, %v1689_v18  }
 0x12c   :  { %2928 = vst.msk [vmem:[%s5750_s1 + $0x13] sm:$0xe0] %vm1591_vm3, %v1689_v18   ;;  %v1664_v19 = vpop.permute.xlu0 %1663  }
 0x12d   :  { %2921 = vst.msk [vmem:[%s5750_s1 + $0x29] sm:$0x3f] %vm1591_vm3, %v1664_v19  }
 0x12e   :  { %2922 = vst.msk [vmem:[%s5750_s1 + $0x2a] sm:$0xc0] %vm1591_vm3, %v1664_v19  }
 0x130   :  { %v1848_v20 = vpop.permute.xlu2 %1847   ;;  %v1749_v21 = vpop.permute.xlu1 %1748  }
 0x131   :  { %2965 = vst.msk [vmem:[%s5750_s1 + $0x12] sm:$0x1f] %vm1750_vm0, %v1848_v20  }
 0x132   :  { %2966 = vst.msk [vmem:[%s5750_s1 + $0x13] sm:$0xe0] %vm1750_vm0, %v1848_v20  }
 0x133   :  { %1751 = vst.msk [vmem:[%s5750_s1] sm:$0x7f] %vm1750_vm0, %v1749_v21  }
 0x134   :  { %2942 = vst.msk [vmem:[%s5750_s1 + $0x1] sm:$0x80] %vm1750_vm0, %v1749_v21   ;;  %v1726_v22 = vpop.permute.xlu0 %1725  }
 0x135   :  { %2937 = vst.msk [vmem:[%s5750_s1 + $0x1e] sm:$0x1] %vm1591_vm3, %v1726_v22  }
 0x138   :  { %v1908_v23 = vpop.permute.xlu2 %1907   ;;  %v1823_v24 = vpop.permute.xlu1 %1822  }
 0x139   :  { %1910 = vst.msk [vmem:[%s5750_s1] sm:$0x7f] %vm1909_vm1, %v1908_v23  }
 0x13a   :  { %2980 = vst.msk [vmem:[%s5750_s1 + $0x1] sm:$0x80] %vm1909_vm1, %v1908_v23  }
 0x13b   :  { %2959 = vst.msk [vmem:[%s5750_s1 + $0x29] sm:$0x3f] %vm1750_vm0, %v1823_v24  }
 0x13c   :  { %2960 = vst.msk [vmem:[%s5750_s1 + $0x2a] sm:$0xc0] %vm1750_vm0, %v1823_v24   ;;  %v1798_v25 = vpop.permute.xlu0 %1797  }
 0x13d   :  { %2953 = vst.msk [vmem:[%s5750_s1 + $0x9] sm:$0x3f] %vm1750_vm0, %v1798_v25  }
 0x13e   :  { %2954 = vst.msk [vmem:[%s5750_s1 + $0xa] sm:$0xc0] %vm1750_vm0, %v1798_v25  }
 0x140   :  { %v1982_v26 = vpop.permute.xlu2 %1981   ;;  %v1885_v27 = vpop.permute.xlu1 %1884  }
 0x141   :  { %2997 = vst.msk [vmem:[%s5750_s1 + $0x29] sm:$0x3f] %vm1909_vm1, %v1982_v26  }
 0x142   :  { %2975 = vst.msk [vmem:[%s5750_s1 + $0x1e] sm:$0x1] %vm1750_vm0, %v1885_v27  }
 0x143   :  { %2998 = vst.msk [vmem:[%s5750_s1 + $0x2a] sm:$0xc0] %vm1909_vm1, %v1982_v26  }
 0x144   :  { %v1876_v28 = vpop.permute.xlu0 %1875  }
 0x145   :  { %2972 = vst.msk [vmem:[%s5750_s1 + $0x32] sm:$0x1f] %vm1750_vm0, %v1876_v28  }
 0x146   :  { %2973 = vst.msk [vmem:[%s5750_s1 + $0x16] sm:$0xe0] %vm1750_vm0, %v1876_v28  }
 0x148   :  { %v2044_v29 = vpop.permute.xlu2 %2043   ;;  %v1957_v30 = vpop.permute.xlu1 %1956  }
 0x149   :  { %3013 = vst.msk [vmem:[%s5750_s1 + $0x1e] sm:$0x1] %vm1909_vm1, %v2044_v29  }
 0x14a   :  { %2991 = vst.msk [vmem:[%s5750_s1 + $0x9] sm:$0x3f] %vm1909_vm1, %v1957_v30  }
 0x14b   :  { %2992 = vst.msk [vmem:[%s5750_s1 + $0xa] sm:$0xc0] %vm1909_vm1, %v1957_v30  }
 0x14c   :  { %v1932_v31 = vpop.permute.xlu0 %1931  }
 0x14d   :  { %2985 = vst.msk [vmem:[%s5750_s1 + $0x20] sm:$0x7f] %vm1909_vm1, %v1932_v31  }
 0x14e   :  { %2986 = vst.msk [vmem:[%s5750_s1 + $0x21] sm:$0x80] %vm1909_vm1, %v1932_v31  }
 0x150   :  { %v2116_v32 = vpop.permute.xlu2 %2115   ;;  %v2035_v33 = vpop.permute.xlu1 %2034  }
 0x151   :  { %3029 = vst.msk [vmem:[%s5750_s1 + $0x9] sm:$0x3f] %vm2068_vm2, %v2116_v32  }
 0x152   :  { %3010 = vst.msk [vmem:[%s5750_s1 + $0x32] sm:$0x1f] %vm1909_vm1, %v2035_v33  }
 0x153   :  { %3011 = vst.msk [vmem:[%s5750_s1 + $0x16] sm:$0xe0] %vm1909_vm1, %v2035_v33  }
 0x154   :  { %v2007_v34 = vpop.permute.xlu0 %2006   ;;  %3030 = vst.msk [vmem:[%s5750_s1 + $0xa] sm:$0xc0] %vm2068_vm2, %v2116_v32  }
 0x155   :  { %3003 = vst.msk [vmem:[%s5750_s1 + $0x12] sm:$0x1f] %vm1909_vm1, %v2007_v34  }
 0x156   :  { %3004 = vst.msk [vmem:[%s5750_s1 + $0x13] sm:$0xe0] %vm1909_vm1, %v2007_v34  }
 0x158   :  { %v2091_v35 = vpop.permute.xlu1 %2090   ;;  %v2194_v36 = vpop.permute.xlu2 %2193  }
 0x159   :  { %3023 = vst.msk [vmem:[%s5750_s1 + $0x20] sm:$0x7f] %vm2068_vm2, %v2091_v35  }
 0x15a   :  { %3024 = vst.msk [vmem:[%s5750_s1 + $0x21] sm:$0x80] %vm2068_vm2, %v2091_v35  }
 0x15b   :  { %3048 = vst.msk [vmem:[%s5750_s1 + $0x32] sm:$0x1f] %vm2068_vm2, %v2194_v36  }
 0x15c   :  { %v2067_v37 = vpop.permute.xlu0 %2066   ;;  %3049 = vst.msk [vmem:[%s5750_s1 + $0x16] sm:$0xe0] %vm2068_vm2, %v2194_v36  }
 0x15d   :  { %2069 = vst.msk [vmem:[%s5750_s1] sm:$0x7f] %vm2068_vm2, %v2067_v37  }
 0x15e   :  { %3018 = vst.msk [vmem:[%s5750_s1 + $0x1] sm:$0x80] %vm2068_vm2, %v2067_v37  }
 0x160   :  { %v2166_v38 = vpop.permute.xlu1 %2165   ;;  %v2250_v39 = vpop.permute.xlu2 %2249  }
 0x161   :  { %3041 = vst.msk [vmem:[%s5750_s1 + $0x12] sm:$0x1f] %vm2068_vm2, %v2166_v38  }
 0x162   :  { %3042 = vst.msk [vmem:[%s5750_s1 + $0x13] sm:$0xe0] %vm2068_vm2, %v2166_v38  }
 0x163   :  { %3061 = vst.msk [vmem:[%s5750_s1 + $0x20] sm:$0x7f] %vm2227_vm4, %v2250_v39  }
 0x164   :  { %v2141_v40 = vpop.permute.xlu0 %2140   ;;  %3062 = vst.msk [vmem:[%s5750_s1 + $0x21] sm:$0x80] %vm2227_vm4, %v2250_v39  }
 0x165   :  { %3035 = vst.msk [vmem:[%s5750_s1 + $0x29] sm:$0x3f] %vm2068_vm2, %v2141_v40  }
 0x166   :  { %3036 = vst.msk [vmem:[%s5750_s1 + $0x2a] sm:$0xc0] %vm2068_vm2, %v2141_v40  }
 0x168   :  { %v2226_v41 = vpop.permute.xlu1 %2225   ;;  %v2325_v42 = vpop.permute.xlu2 %2324  }
 0x169   :  { %2228 = vst.msk [vmem:[%s5750_s1] sm:$0x7f] %vm2227_vm4, %v2226_v41  }
 0x16a   :  { %3056 = vst.msk [vmem:[%s5750_s1 + $0x1] sm:$0x80] %vm2227_vm4, %v2226_v41  }
 0x16b   :  { %3079 = vst.msk [vmem:[%s5750_s1 + $0x12] sm:$0x1f] %vm2227_vm4, %v2325_v42  }
 0x16c   :  { %v2203_v43 = vpop.permute.xlu0 %2202   ;;  %3080 = vst.msk [vmem:[%s5750_s1 + $0x13] sm:$0xe0] %vm2227_vm4, %v2325_v42  }
 0x16d   :  { %3051 = vst.msk [vmem:[%s5750_s1 + $0x1e] sm:$0x1] %vm2068_vm2, %v2203_v43  }
 0x170   :  { %v2300_v44 = vpop.permute.xlu1 %2299  }
 0x171   :  { %3073 = vst.msk [vmem:[%s5750_s1 + $0x29] sm:$0x3f] %vm2227_vm4, %v2300_v44   ;;  %v2385_v45 = vpop.permute.xlu2 %2384  }
 0x172   :  { %3074 = vst.msk [vmem:[%s5750_s1 + $0x2a] sm:$0xc0] %vm2227_vm4, %v2300_v44  }
 0x173   :  { %2387 = vst.msk [vmem:[%s5750_s1] sm:$0x7f] %vm2386_vm5, %v2385_v45  }
 0x174   :  { %v2275_v46 = vpop.permute.xlu0 %2274   ;;  %3094 = vst.msk [vmem:[%s5750_s1 + $0x1] sm:$0x80] %vm2386_vm5, %v2385_v45  }
 0x175   :  { %3067 = vst.msk [vmem:[%s5750_s1 + $0x9] sm:$0x3f] %vm2227_vm4, %v2275_v46  }
 0x176   :  { %3068 = vst.msk [vmem:[%s5750_s1 + $0xa] sm:$0xc0] %vm2227_vm4, %v2275_v46  }
 0x178   :  { %v2362_v47 = vpop.permute.xlu1 %2361  }
 0x179   :  { %3089 = vst.msk [vmem:[%s5750_s1 + $0x1e] sm:$0x1] %vm2227_vm4, %v2362_v47   ;;  %v2459_v48 = vpop.permute.xlu2 %2458  }
 0x17a   :  { %3111 = vst.msk [vmem:[%s5750_s1 + $0x29] sm:$0x3f] %vm2386_vm5, %v2459_v48  }
 0x17b   :  { %3112 = vst.msk [vmem:[%s5750_s1 + $0x2a] sm:$0xc0] %vm2386_vm5, %v2459_v48  }
 0x17c   :  { %v2353_v49 = vpop.permute.xlu0 %2352  }
 0x17d   :  { %3086 = vst.msk [vmem:[%s5750_s1 + $0x32] sm:$0x1f] %vm2227_vm4, %v2353_v49  }
 0x17e   :  { %3087 = vst.msk [vmem:[%s5750_s1 + $0x16] sm:$0xe0] %vm2227_vm4, %v2353_v49  }
 0x180   :  { %v2434_v50 = vpop.permute.xlu1 %2433  }
 0x181   :  { %3105 = vst.msk [vmem:[%s5750_s1 + $0x9] sm:$0x3f] %vm2386_vm5, %v2434_v50   ;;  %v2521_v51 = vpop.permute.xlu2 %2520  }
 0x182   :  { %3106 = vst.msk [vmem:[%s5750_s1 + $0xa] sm:$0xc0] %vm2386_vm5, %v2434_v50  }
 0x183   :  { %3127 = vst.msk [vmem:[%s5750_s1 + $0x1e] sm:$0x1] %vm2386_vm5, %v2521_v51  }
 0x184   :  { %v2409_v52 = vpop.permute.xlu0 %2408  }
 0x185   :  { %3099 = vst.msk [vmem:[%s5750_s1 + $0x20] sm:$0x7f] %vm2386_vm5, %v2409_v52  }
 0x186   :  { %3100 = vst.msk [vmem:[%s5750_s1 + $0x21] sm:$0x80] %vm2386_vm5, %v2409_v52  }
 0x188   :  { %v2512_v53 = vpop.permute.xlu1 %2511  }
 0x189   :  { %3124 = vst.msk [vmem:[%s5750_s1 + $0x32] sm:$0x1f] %vm2386_vm5, %v2512_v53  }
 0x18a   :  { %3125 = vst.msk [vmem:[%s5750_s1 + $0x16] sm:$0xe0] %vm2386_vm5, %v2512_v53  }
 0x18c   :  { %v2484_v54 = vpop.permute.xlu0 %2483  }
 0x18d   :  { %3117 = vst.msk [vmem:[%s5750_s1 + $0x12] sm:$0x1f] %vm2386_vm5, %v2484_v54  }
 0x18e   :  { %3118 = vst.msk [vmem:[%s5750_s1 + $0x13] sm:$0xe0] %vm2386_vm5, %v2484_v54  }

// kernel: tile.28
= control target key start
LH: loop header
LB: loop body
LE: loop exit
PB: predicated region body
PF: predicated region fallthrough
CT: control target
= control target key end

     0   :  { %s28_s0 = inlined_call_operand.vmem [shape: f32[8], index: 0, kind: input, shape index: {}]   ;;  %s29_s1 = inlined_call_operand.vmem [shape: f32[16,8], index: 1, kind: output, shape index: {}]  }
   0x1   :  { %v4_v0 = vld [vmem:[%s28_s0] ss:$0 sm:$0xff] }
   0x2   :  { %5 = vst [vmem:[%s29_s1] sm:$0xff] %v4_v0 }
   0x3   :  { %8 = vst [vmem:[%s29_s1 + $0x8] sm:$0xff] %v4_v0 }

// kernel: tile.29
= control target key start
LH: loop header
LB: loop body
LE: loop exit
PB: predicated region body
PF: predicated region fallthrough
CT: control target
= control target key end

     0   :  { %s131_s10 = smov 120   ;;  %s132_s11 = smov 104   ;;  %vm3_vm0 = vcmask 64512   ;;  %vm9_vm1 = vcmask 1048512   ;;  %vm15_vm2 = vcmask 982912   ;;  %vm21_vm3 = vcmask 917312   ;;  %s207_s0 = inlined_call_operand.vmem [shape: f32[16,8], index: 0, kind: input, shape index: {}]   ;;  %s208_s1 = inlined_call_operand.vmem [shape: f32[1,128], index: 1, kind: output, shape index: {}]  }
   0x1   :  { %v101_v0 = vld [vmem:[%s207_s0 + $0xf] sm:$0x1]   ;;  %v103_v1 = vld [vmem:[%s207_s0 + $0xd] sm:$0x1]   ;;  %v105_v2 = vld [vmem:[%s207_s0 + $0xb] sm:$0x1]  }
   0x2   :  { %7 = vrot.lane.b32.xlu0 %v101_v0, %s131_s10  ;;  %19 = vrot.lane.b32.xlu1 %v103_v1, %s132_s11  ;;  %s133_s14 = smov 88   ;;  %v102_v3 = vld [vmem:[%s207_s0 + $0xe] sm:$0x1]   ;;  %v104_v4 = vld [vmem:[%s207_s0 + $0xc] sm:$0x1]   ;;  %s134_s19 = smov 112  }
   0x3   :  { %31 = vrot.lane.b32.xlu2 %v105_v2, %s133_s14  ;;  %s135_s20 = smov 96   ;;  %v106_v5 = vld [vmem:[%s207_s0 + $0xa] sm:$0x1]   ;;  %s136_s23 = smov 80   ;;  %v107_v6 = vld [vmem:[%s207_s0 + $0x9] sm:$0x1]  }
   0x4   :  { %v108_v7 = vld [vmem:[%s207_s0 + $0x8] sm:$0x1]   ;;  %s137_s28 = smov 72   ;;  %s138_s29 = smov 64   ;;  %v109_v8 = vld [vmem:[%s207_s0 + $0x7] sm:$0x1]  }
   0x5   :  { %s139_s3 = smov 56   ;;  %v110_v9 = vld [vmem:[%s207_s0 + $0x6] sm:$0x1]   ;;  %v111_v10 = vld [vmem:[%s207_s0 + $0x5] sm:$0x1]   ;;  %s140_s8 = smov 48  }
   0x6   :  { %s141_s9 = smov 40   ;;  %v112_v11 = vld [vmem:[%s207_s0 + $0x4] sm:$0x1]   ;;  %s142_s12 = smov 32   ;;  %v113_v12 = vld [vmem:[%s207_s0 + $0x3] sm:$0x1]  }
   0x7   :  { %v114_v13 = vld [vmem:[%s207_s0 + $0x2] sm:$0x1]   ;;  %s143_s17 = smov 24   ;;  %s144_s18 = smov 16   ;;  %v115_v14 = vld [vmem:[%s207_s0 + $0x1] sm:$0x1]  }
   0x8   :  { %s145_s21 = smov 8   ;;  %v2_v15 = vld [vmem:[%s207_s0] sm:$0x1]   ;;  %vm27_vm4 = vcmask 851712   ;;  %vm33_vm5 = vcmask 786112   ;;  %vm39_vm6 = vcmask 720512  }
   0x9   :  { %4 = vst.msk [vmem:[#allocation0] sm:$0x1] %vm3_vm0, %v2_v15   ;;  %vm45_vm7 = vcmask 654912   ;;  %vm51_vm8 = vcmask 589312   ;;  %vm57_vm9 = vcmask 523712   ;;  %vm63_vm10 = vcmask 458112  }
   0xa   :  { %13 = vrot.lane.b32.xlu0 %v102_v3, %s134_s19  ;;  %25 = vrot.lane.b32.xlu1 %v104_v4, %s135_s20  ;;  %vm69_vm11 = vcmask 392512   ;;  %vm75_vm12 = vcmask 326912   ;;  %vm81_vm13 = vcmask 261312   ;;  %vm87_vm14 = vcmask 195712  }
   0xb   :  { %37 = vrot.lane.b32.xlu2 %v106_v5, %s136_s23  ;;  %vm93_vm15 = vcmask 130112  }
  0x12   :  { %43 = vrot.lane.b32.xlu0 %v107_v6, %s137_s28  ;;  %49 = vrot.lane.b32.xlu1 %v108_v7, %s138_s29 }
  0x13   :  { %55 = vrot.lane.b32.xlu2 %v109_v8, %s139_s3 }
  0x1a   :  { %61 = vrot.lane.b32.xlu0 %v110_v9, %s140_s8  ;;  %67 = vrot.lane.b32.xlu1 %v111_v10, %s141_s9 }
  0x1b   :  { %73 = vrot.lane.b32.xlu2 %v112_v11, %s142_s12 }
  0x22   :  { %79 = vrot.lane.b32.xlu0 %v113_v12, %s143_s17  ;;  %85 = vrot.lane.b32.xlu1 %v114_v13, %s144_s18 }
  0x23   :  { %91 = vrot.lane.b32.xlu2 %v115_v14, %s145_s21 }
  0x5d   :  { %v32_v16 = vpop.permute.xlu2 %31  }
  0x65   :  { %v38_v17 = vpop.permute.xlu2 %37  }
  0x6d   :  { %v56_v18 = vpop.permute.xlu2 %55  }
  0x74   :  { %v8_v19 = vpop.permute.xlu0 %7   ;;  %v20_v20 = vpop.permute.xlu1 %19  }
  0x75   :  { %10 = vst.msk [vmem:[#allocation0] sm:$0x1] %vm9_vm1, %v8_v19   ;;  %v74_v21 = vpop.permute.xlu2 %73  }
  0x7c   :  { %v14_v22 = vpop.permute.xlu0 %13   ;;  %v26_v23 = vpop.permute.xlu1 %25  }
  0x7d   :  { %16 = vst.msk [vmem:[#allocation0] sm:$0x1] %vm15_vm2, %v14_v22   ;;  %v92_v24 = vpop.permute.xlu2 %91  }
  0x7e   :  { %22 = vst.msk [vmem:[#allocation0] sm:$0x1] %vm21_vm3, %v20_v20  }
  0x7f   :  { %28 = vst.msk [vmem:[#allocation0] sm:$0x1] %vm27_vm4, %v26_v23  }
  0x80   :  { %34 = vst.msk [vmem:[#allocation0] sm:$0x1] %vm33_vm5, %v32_v16  }
  0x81   :  { %40 = vst.msk [vmem:[#allocation0] sm:$0x1] %vm39_vm6, %v38_v17  }
  0x84   :  { %v44_v25 = vpop.permute.xlu0 %43   ;;  %v50_v26 = vpop.permute.xlu1 %49  }
  0x85   :  { %46 = vst.msk [vmem:[#allocation0] sm:$0x1] %vm45_vm7, %v44_v25  }
  0x86   :  { %52 = vst.msk [vmem:[#allocation0] sm:$0x1] %vm51_vm8, %v50_v26  }
  0x87   :  { %58 = vst.msk [vmem:[#allocation0] sm:$0x1] %vm57_vm9, %v56_v18  }
  0x8c   :  { %v62_v27 = vpop.permute.xlu0 %61   ;;  %v68_v28 = vpop.permute.xlu1 %67  }
  0x8d   :  { %64 = vst.msk [vmem:[#allocation0] sm:$0x1] %vm63_vm10, %v62_v27  }
  0x8e   :  { %70 = vst.msk [vmem:[#allocation0] sm:$0x1] %vm69_vm11, %v68_v28  }
  0x8f   :  { %76 = vst.msk [vmem:[#allocation0] sm:$0x1] %vm75_vm12, %v74_v21  }
  0x94   :  { %v80_v29 = vpop.permute.xlu0 %79   ;;  %v86_v30 = vpop.permute.xlu1 %85  }
  0x95   :  { %82 = vst.msk [vmem:[#allocation0] sm:$0x1] %vm81_vm13, %v80_v29  }
  0x96   :  { %88 = vst.msk [vmem:[#allocation0] sm:$0x1] %vm87_vm14, %v86_v30  }
  0x97   :  { %94 = vst.msk [vmem:[#allocation0] sm:$0x1] %vm93_vm15, %v92_v24  }
  0x9e   :  { %v97_v31 = vld [vmem:[#allocation0] sm:$0x1] }
  0x9f   :  { %100 = vst [vmem:[%s208_s1] sm:$0x1] %v97_v31 }

// kernel: tile.23
= control target key start
LH: loop header
LB: loop body
LE: loop exit
PB: predicated region body
PF: predicated region fallthrough
CT: control target
= control target key end

     0   :  { %s28_s0 = inlined_call_operand.vmem [shape: f32[32], index: 0, kind: input, shape index: {}]   ;;  %s29_s1 = inlined_call_operand.vmem [shape: f32[16,32], index: 1, kind: output, shape index: {}]  }
   0x1   :  { %v4_v0 = vld [vmem:[%s28_s0] ss:$0 sm:$0xff] }
   0x2   :  { %5 = vst [vmem:[%s29_s1] sm:$0xff] %v4_v0 }
   0x3   :  { %8 = vst [vmem:[%s29_s1 + $0x8] sm:$0xff] %v4_v0 }

// kernel: tile.24
= control target key start
LH: loop header
LB: loop body
LE: loop exit
PB: predicated region body
PF: predicated region fallthrough
CT: control target
= control target key end

     0   :  { %s56_s8 = smov 96   ;;  %s57_s11 = smov 32   ;;  %vm3_vm0 = vcmask 261120   ;;  %vm9_vm1 = vcmask 1048320   ;;  %vm15_vm2 = vcmask 785920   ;;  %vm21_vm3 = vcmask 523520   ;;  %s93_s0 = inlined_call_operand.vmem [shape: f32[16,32], index: 0, kind: input, shape index: {}]   ;;  %s94_s1 = inlined_call_operand.vmem [shape: f32[1,512], index: 1, kind: output, shape index: {}]  }
   0x1   :  { %v47_v0 = vld [vmem:[%s93_s0 + $0x3] ss:$4 sm:$0xf]   ;;  %v49_v1 = vld [vmem:[%s93_s0 + $0x1] ss:$4 sm:$0xf]  }
   0x2   :  { %7 = vrot.lane.b32.xlu0 %v47_v0, %s56_s8  ;;  %19 = vrot.lane.b32.xlu1 %v49_v1, %s57_s11  ;;  %v48_v2 = vld [vmem:[%s93_s0 + $0x2] ss:$4 sm:$0xf]   ;;  %s58_s14 = smov 64  }
   0x3   :  { %v2_v3 = vld [vmem:[%s93_s0] ss:$4 sm:$0xf]  }
   0x4   :  { %4 = vst.msk [vmem:[#allocation0] ss:$8 sm:$0xf] %vm3_vm0, %v2_v3  }
   0xa   :  { %13 = vrot.lane.b32.xlu0 %v48_v2, %s58_s14 }
  0x74   :  { %v8_v4 = vpop.permute.xlu0 %7   ;;  %v20_v5 = vpop.permute.xlu1 %19  }
  0x75   :  { %10 = vst.msk [vmem:[#allocation0] ss:$8 sm:$0xf] %vm9_vm1, %v8_v4  }
  0x7c   :  { %v14_v6 = vpop.permute.xlu0 %13  }
  0x7d   :  { %16 = vst.msk [vmem:[#allocation0] ss:$8 sm:$0xf] %vm15_vm2, %v14_v6  }
  0x7e   :  { %22 = vst.msk [vmem:[#allocation0] ss:$8 sm:$0xf] %vm21_vm3, %v20_v5  }
  0x85   :  { %v25_v7 = vld [vmem:[#allocation0] sm:$0x1]  ;;  %v30_v8 = vld [vmem:[#allocation0 + $0x8] sm:$0x1]  ;;  %v36_v9 = vld [vmem:[#allocation0 + $0x10] sm:$0x1] }
  0x86   :  { %28 = vst [vmem:[%s94_s1] sm:$0x1] %v25_v7  ;;  %v42_v10 = vld [vmem:[#allocation0 + $0x18] sm:$0x1] }
  0x87   :  { %50 = vst [vmem:[%s94_s1 + $0x1] sm:$0x1] %v30_v8 }
  0x88   :  { %51 = vst [vmem:[%s94_s1 + $0x2] sm:$0x1] %v36_v9 }
  0x89   :  { %52 = vst [vmem:[%s94_s1 + $0x3] sm:$0x1] %v42_v10 }

// kernel: conv_encoder_bn_hs.1
= control target key start
LH: loop header
LB: loop body
LE: loop exit
PB: predicated region body
PF: predicated region fallthrough
CT: control target
= control target key end

     0   :  { %s1635_s21 = smov 0   ;;  %s1637_s22 = smov 0   ;;  %s2741_s0 = inlined_call_operand.vmem [shape: f32[2,22,128], index: 0, kind: input, shape index: {}]   ;;  %s2742_s1 = inlined_call_operand.vmem [shape: f32[7,7,128], index: 1, kind: input, shape index: {}]   ;;  %s2743_s2 = inlined_call_operand.vmem [shape: f32[128,512], index: 2, kind: input, shape index: {}]   ;;  %s2744_s3 = inlined_call_operand.vmem [shape: f32[1,512], index: 3, kind: input, shape index: {}]   ;;  %s2745_s4 = inlined_call_operand.vmem [shape: f32[512,128], index: 4, kind: input, shape index: {}]   ;;  %s2746_s5 = inlined_call_operand.vmem [shape: f32[1,128], index: 5, kind: input, shape index: {}]   ;;  %s2747_s6 = inlined_call_operand.vmem [shape: f32[2,16,128], index: 6, kind: output, shape index: {}]  }
   0x1   :  { %s1639_s23 = smov 0  }
   0x2 LB: > { %s28_s24 = sadd.s32 1, %s1588_s22  ;;  %p1521_p0 = scmp.ge.s32.totalorder %s1592_s23, 1  ;;  %s1592_s23 = sphi %s1639_s23, %s16_s23   ;;  %s1588_s22 = sphi %s1637_s22, %s2818_s22   ;;  %s1584_s21 = sphi %s1635_s21, %s2817_s21  }
   0x3   : > { %p30_p1 = scmp.ge.s32.totalorder %s28_s24, 2  ;;  %p226_p2 = scmp.lt.s32.totalorder %s1592_s23, 3 }
   0x5   : > { %s2820_s24 = smov (%p30_p1, %s28_s24), 0  ;;  %p227_p3 = pnand %p1521_p0, %p226_p2 }
   0x7   : > { %230 = sbr.rel (%p227_p3) target bundleno = 521 (0x209), region = 44 }
   0xc   : > { %p260_p4 = scmp.lt.s32.totalorder %s1584_s21, 1  ;;  %v1656_v0 = vld [vmem:[%s2742_s1] sm:$0x7f]  ;;  %v1661_v1 = vld [vmem:[%s2742_s1 + $0x8] sm:$0x7f]  ;;  %vm317_vm0 = vcmask 1046528  }
   0xd   : > { %v1666_v2 = vld [vmem:[%s2742_s1 + $0x10] sm:$0x7f]  ;;  %v1671_v3 = vld [vmem:[%s2742_s1 + $0x18] sm:$0x7f]  ;;  %v1676_v4 = vld [vmem:[%s2742_s1 + $0x20] sm:$0x7f] }
   0xe   : > { %s2822_s21 = smov (!%p260_p4, %s1584_s21), 1  ;;  %v1683_v5 = vld [vmem:[%s2742_s1 + $0x28] sm:$0x7f]  ;;  %v1688_v6 = vld [vmem:[%s2742_s1 + $0x30] sm:$0x7f]  ;;  %v2754_v7 = vperm.slane %v1656_v0, 2 }
   0xf   : > { %v1692_v8 = vperm.slane %v1661_v1, 2  ;;  %v1695_v9 = vperm.slane %v1666_v2, 2  ;;  %s1528_s15 = smul.u32 24, %s2822_s21  ;;  %v519_v10 = vperm.slane %v1671_v3, 2  ;;  %v1700_v11 = vperm.slane %v1676_v4, 2  ;;  %s1594_s19 = smov 8  }
  0x10   : > { %v527_v12 = vperm.slane %v1683_v5, 2  ;;  %v531_v13 = vperm.slane %v1688_v6, 2  ;;  %vm358_vm1 = vcmask 1045504   ;;  %v2767_v14 = vperm.slane %v1656_v0, 0  ;;  %s1595_s20 = smov 24   ;;  %s1596_s25 = smov 120  }
  0x11   : > { %2778 = vst [vmem:[#allocation2_spill] sm:$0xff] %v1692_v8  ;;  %v1706_v15 = vperm.slane %v1661_v1, 0  ;;  %v1709_v16 = vperm.slane %v1666_v2, 0  ;;  %v1712_v17 = vperm.slane %v1671_v3, 0  ;;  %s1717_s18 = scalar_lea.vmem %s2741_s0, %s1528_s15  ;;  %v1720_v18 = vperm.slane %v1676_v4, 0  ;;  %s1597_s26 = smov 16  }
  0x12   : > { %2779 = vst [vmem:[#allocation3_spill] sm:$0xff] %v1695_v9  ;;  %v1723_v19 = vperm.slane %v1683_v5, 0  ;;  %v1726_v20 = vperm.slane %v1688_v6, 0  ;;  %v2755_v21 = vperm.slane %v1656_v0, 4  ;;  %v1730_v22 = vld [vmem:[%s1717_s18] sm:$0xff]  ;;  %v1733_v23 = vld [vmem:[%s1717_s18 + $0x8] sm:$0xff] }
  0x13   : > { %2780 = vst [vmem:[#allocation4_spill] sm:$0xff] %v1700_v11  ;;  %v1736_v24 = vld [vmem:[%s1717_s18 + $0x10] sm:$0x3f]  ;;  %v1739_v25 = vperm.slane %v1661_v1, 4  ;;  %v1742_v26 = vperm.slane %v1666_v2, 4  ;;  %v509_v27 = vmul.f32 %v2754_v7, %v1730_v22  ;;  %v512_v28 = vmul.f32 %v1692_v8, %v1730_v22  ;;  %s1598_s27 = smov 112  }
  0x14   : > { %v1751_v29 = vmul.f32 %v1692_v8, %v1733_v23  ;;  %v516_v30 = vmul.f32 %v1695_v9, %v1730_v22  ;;  %v517_v31 = vmul.f32 %v1695_v9, %v1733_v23  ;;  %v520_v32 = vmul.f32 %v519_v10, %v1730_v22  ;;  %s1599_s12 = smov 104   ;;  %s1527_s8 = sshll.u32 %s2822_s21, 4 }
  0x15   : > { %v521_v33 = vmul.f32 %v519_v10, %v1733_v23  ;;  %v1760_v34 = vmul.f32 %v519_v10, %v1736_v24  ;;  %v524_v35 = vmul.f32 %v1700_v11, %v1730_v22  ;;  %v525_v36 = vmul.f32 %v1700_v11, %v1733_v23 }
  0x16   : > { %2781 = vst [vmem:[#allocation5_spill] sm:$0xff] %v1751_v29  ;;  %v528_v37 = vmul.f32 %v527_v12, %v1730_v22  ;;  %v529_v38 = vmul.f32 %v527_v12, %v1733_v23  ;;  %v1769_v39 = vmul.f32 %v527_v12, %v1736_v24  ;;  %v532_v40 = vmul.f32 %v531_v13, %v1730_v22 }
  0x17   : > { %2782 = vst [vmem:[#allocation6_spill] sm:$0xff] %v1760_v34  ;;  %v533_v41 = vmul.f32 %v531_v13, %v1733_v23  ;;  %v1774_v42 = vmul.f32 %v531_v13, %v1736_v24  ;;  %v538_v43 = vrot.slane %v512_v28, 1  ;;  %v2751_v44 = vrot.slane %v1751_v29, 1 }
  0x18   : > { %2783 = vst [vmem:[#allocation7_spill] sm:$0xff] %v1769_v39  ;;  %v550_v45 = vrot.slane %v520_v32, 1  ;;  %v551_v46 = vrot.slane %v521_v33, 1  ;;  %vm385_vm2 = vcmask 1043456   ;;  %v2753_v47 = vrot.slane %v1760_v34, 1 }
  0x19   : > { %2784 = vst [vmem:[#allocation8_spill] sm:$0xff] %v1774_v42  ;;  %v564_v48 = vrot.slane %v528_v37, 1  ;;  %v565_v49 = vrot.slane %v529_v38, 1  ;;  %v2752_v50 = vrot.slane %v1769_v39, 1  ;;  %v540_v51 = vsel %vm317_vm0, %v538_v43, %v2751_v44 }
  0x1a   : > { %v552_v52 = vsel %vm317_vm0, %v550_v45, %v551_v46  ;;  %v590_v53 = vrot.slane %v532_v40, 2  ;;  %v591_v54 = vrot.slane %v533_v41, 2  ;;  %v545_v55 = vadd.f32 %v540_v51, %v509_v27 }
  0x1b   : > { %v554_v56 = vsel %vm317_vm0, %v551_v46, %v2753_v47  ;;  %v558_v57 = vadd.f32 %v552_v52, %v516_v30  ;;  %v566_v58 = vsel %vm317_vm0, %v564_v48, %v565_v49  ;;  %v568_v60 = vsel %vm317_vm0, %v565_v49, %v2752_v50 }
  0x1c   : > { %v1787_v59 = vadd.f32 %v554_v56, %v517_v31  ;;  %v572_v61 = vadd.f32 %v566_v58, %v524_v35  ;;  %v592_v62 = vsel %vm358_vm1, %v590_v53, %v591_v54  ;;  %v573_v63 = vadd.f32 %v568_v60, %v525_v36 }
  0x1d   : > { %v578_v10 = vrot.slane %v558_v57, 2  ;;  %v2750_v12 = vrot.slane %v1774_v42, 2  ;;  %v288_v13 = vmul.f32 %v2767_v14, %v1730_v22  ;;  %v291_v30 = vmul.f32 %v1706_v15, %v1730_v22 }
  0x1e   : > { %2785 = vst [vmem:[#allocation9_spill] sm:$0xff] %v1787_v59  ;;  %v2749_v27 = vrot.slane %v1787_v59, 2  ;;  %v598_v28 = vadd.f32 %v592_v62, %v572_v61  ;;  %v1802_v31 = vmul.f32 %v1706_v15, %v1733_v23  ;;  %v295_v33 = vmul.f32 %v1709_v16, %v1730_v22 }
  0x1f   : > { %v594_v32 = vsel %vm358_vm1, %v591_v54, %v2750_v12  ;;  %v296_v35 = vmul.f32 %v1709_v16, %v1733_v23  ;;  %v299_v36 = vmul.f32 %v1712_v17, %v1730_v22  ;;  %v300_v41 = vmul.f32 %v1712_v17, %v1733_v23 }
  0x20   : > { %v580_v37 = vsel %vm358_vm1, %v578_v10, %v2749_v27  ;;  %v1816_v38 = vadd.f32 %v594_v32, %v573_v63  ;;  %v604_v40 = vrot.slane %v598_v28, 4  ;;  %v1822_v45 = vmul.f32 %v1712_v17, %v1736_v24 }
  0x21   : > { %v585_v43 = vadd.f32 %v580_v37, %v545_v55  ;;  %v303_v46 = vmul.f32 %v1720_v18, %v1730_v22  ;;  %v304_v48 = vmul.f32 %v1720_v18, %v1733_v23  ;;  %v307_v51 = vmul.f32 %v1723_v19, %v1730_v22 }
  0x22   : > { %2786 = vst [vmem:[#allocation10_spill] sm:$0xff] %v1816_v38  ;;  %v2748_v49 = vrot.slane %v1816_v38, 4  ;;  %v308_v52 = vmul.f32 %v1723_v19, %v1733_v23  ;;  %v1835_v53 = vmul.f32 %v1723_v19, %v1736_v24  ;;  %v311_v17 = vmul.f32 %v1726_v20, %v1730_v22 }
  0x23   : > { %v312_v54 = vmul.f32 %v1726_v20, %v1733_v23  ;;  %v1843_v55 = vmul.f32 %v1726_v20, %v1736_v24  ;;  %v318_v56 = vrot.slane %v291_v30, 1  ;;  %v2764_v58 = vrot.slane %v1802_v31, 1 }
  0x24   : > { %v606_v57 = vsel %vm385_vm2, %v604_v40, %v2748_v49  ;;  %v330_v60 = vrot.slane %v299_v36, 1  ;;  %v331_v19 = vrot.slane %v300_v41, 1  ;;  %v2766_v62 = vrot.slane %v1822_v45, 1 }
  0x25   : > { %v611_v61 = vadd.f32 %v606_v57, %v585_v43  ;;  %v344_v63 = vrot.slane %v307_v51, 1  ;;  %v345_v10 = vrot.slane %v308_v52, 1  ;;  %v320_v28 = vsel %vm317_vm0, %v318_v56, %v2764_v58 }
  0x26   : > { %v332_v20 = vsel %vm317_vm0, %v330_v60, %v331_v19  ;;  %v2765_v30 = vrot.slane %v1835_v53, 1  ;;  %v371_v32 = vrot.slane %v311_v17, 2  ;;  %v325_v37 = vadd.f32 %v320_v28, %v288_v13 }
  0x27   : > { %613 = vrot.lane.b32.xlu1 %v611_v61, %s1594_s19  ;;  %v334_v36 = vsel %vm317_vm0, %v331_v19, %v2766_v62  ;;  %v338_v40 = vadd.f32 %v332_v20, %v295_v33  ;;  %v346_v41 = vsel %vm317_vm0, %v344_v63, %v345_v10  ;;  %v372_v56 = vrot.slane %v312_v54, 2 }
  0x28   : > { %v1860_v43 = vadd.f32 %v334_v36, %v296_v35  ;;  %v348_v51 = vsel %vm317_vm0, %v345_v10, %v2765_v30  ;;  %v352_v52 = vadd.f32 %v346_v41, %v303_v46  ;;  %v2757_v60 = vrot.slane %v1843_v55, 2 }
  0x29   : > { %v353_v17 = vadd.f32 %v348_v51, %v304_v48  ;;  %v359_v57 = vrot.slane %v338_v40, 2  ;;  %v723_v13 = vmul.f32 %v2755_v21, %v1730_v22  ;;  %v373_v19 = vsel %vm358_vm1, %v371_v32, %v372_v56 }
  0x2a   : > { %v2756_v33 = vrot.slane %v1860_v43, 2  ;;  %v726_v35 = vmul.f32 %v1739_v25, %v1730_v22  ;;  %v1875_v61 = vmul.f32 %v1739_v25, %v1733_v23  ;;  %v375_v46 = vsel %vm358_vm1, %v372_v56, %v2757_v60 }
  0x2b   : > { %v379_v48 = vadd.f32 %v373_v19, %v352_v52  ;;  %v730_v54 = vmul.f32 %v1742_v26, %v1730_v22  ;;  %v731_v63 = vmul.f32 %v1742_v26, %v1733_v23  ;;  %v1887_v28 = vadd.f32 %v375_v46, %v353_v17 }
  0x2c   : > { %v361_v10 = vsel %vm358_vm1, %v359_v57, %v2756_v33  ;;  %v733_v20 = vperm.slane %v1671_v3, 4  ;;  %v1891_v32 = vperm.slane %v1676_v4, 4  ;;  %v741_v41 = vperm.slane %v1683_v5, 4 }
  0x2d   : > { %v366_v36 = vadd.f32 %v361_v10, %v325_v37  ;;  %v386_v40 = vrot.slane %v379_v48, 4  ;;  %v745_v51 = vperm.slane %v1688_v6, 4  ;;  %v2758_v52 = vrot.slane %v1887_v28, 4 }
  0x2e   : > { %v734_v56 = vmul.f32 %v733_v20, %v1730_v22  ;;  %v735_v19 = vmul.f32 %v733_v20, %v1733_v23  ;;  %v1899_v17 = vmul.f32 %v733_v20, %v1736_v24  ;;  %v738_v57 = vmul.f32 %v1891_v32, %v1730_v22 }
  0x2f   : > { %v739_v37 = vmul.f32 %v1891_v32, %v1733_v23  ;;  %v742_v46 = vmul.f32 %v741_v41, %v1730_v22  ;;  %v743_v48 = vmul.f32 %v741_v41, %v1733_v23  ;;  %v388_v10 = vsel %vm385_vm2, %v386_v40, %v2758_v52 }
  0x30   : > { %v1911_v49 = vmul.f32 %v741_v41, %v1736_v24  ;;  %v746_v20 = vmul.f32 %v745_v51, %v1730_v22  ;;  %v747_v27 = vmul.f32 %v745_v51, %v1733_v23  ;;  %v393_v12 = vadd.f32 %v388_v10, %v366_v36 }
  0x31   : > { %v1916_v44 = vmul.f32 %v745_v51, %v1736_v24  ;;  %v752_v50 = vrot.slane %v726_v35, 1  ;;  %v2759_v47 = vrot.slane %v1875_v61, 1  ;;  %v764_v7 = vrot.slane %v734_v56, 1 }
  0x32   : > { %v765_v21 = vrot.slane %v735_v19, 1  ;;  %v2763_v33 = vrot.slane %v1899_v17, 1  ;;  %v778_v60 = vrot.slane %v742_v46, 1  ;;  %395 = vrot.lane.b32.xlu0 %v393_v12, %s1595_s20  ;;  %v779_v41 = vrot.slane %v743_v48, 1 }
  0x33   : > { %v754_v40 = vsel %vm317_vm0, %v752_v50, %v2759_v47  ;;  %v2762_v36 = vrot.slane %v1911_v49, 1  ;;  %v804_v51 = vrot.slane %v746_v20, 2  ;;  %v805_v19 = vrot.slane %v747_v27, 2 }
  0x34   : > { %v759_v10 = vadd.f32 %v754_v40, %v723_v13  ;;  %v766_v35 = vsel %vm317_vm0, %v764_v7, %v765_v21  ;;  %v768_v56 = vsel %vm317_vm0, %v765_v21, %v2763_v33  ;;  %v780_v12 = vsel %vm317_vm0, %v778_v60, %v779_v41 }
  0x35   : > { %v772_v46 = vadd.f32 %v766_v35, %v730_v54  ;;  %v1929_v52 = vadd.f32 %v768_v56, %v731_v63  ;;  %v782_v50 = vsel %vm317_vm0, %v779_v41, %v2762_v36  ;;  %v786_v48 = vadd.f32 %v780_v12, %v738_v57 }
  0x36   : > { %v787_v47 = vadd.f32 %v782_v50, %v739_v37  ;;  %v806_v13 = vsel %vm358_vm1, %v804_v51, %v805_v19  ;;  %v2761_v7 = vrot.slane %v1916_v44, 2  ;;  %v399_v21 = vperm.slane %v1656_v0, 1 }
  0x37   : > { %v792_v20 = vrot.slane %v772_v46, 2  ;;  %v2760_v40 = vrot.slane %v1929_v52, 2  ;;  %v402_v27 = vperm.slane %v1661_v1, 1  ;;  %v812_v54 = vadd.f32 %v806_v13, %v786_v48 }
  0x38   : > { %v808_v60 = vsel %vm358_vm1, %v805_v19, %v2761_v7  ;;  %v406_v63 = vperm.slane %v1666_v2, 1  ;;  %v410_v57 = vperm.slane %v1671_v3, 1  ;;  %v400_v51 = vmul.f32 %v399_v21, %v1730_v22 }
  0x39   : > { %v794_v37 = vsel %vm358_vm1, %v792_v20, %v2760_v40  ;;  %v1948_v41 = vadd.f32 %v808_v60, %v787_v47  ;;  %v403_v35 = vmul.f32 %v402_v27, %v1730_v22  ;;  %v818_v46 = vrot.slane %v812_v54, 4 }
  0x3a   : > { %v799_v56 = vadd.f32 %v794_v37, %v759_v10  ;;  %v1953_v12 = vmul.f32 %v402_v27, %v1733_v23  ;;  %v407_v19 = vmul.f32 %v406_v63, %v1730_v22  ;;  %v408_v48 = vmul.f32 %v406_v63, %v1733_v23 }
  0x3b   : > { %v2770_v50 = vrot.slane %v1948_v41, 4  ;;  %v411_v13 = vmul.f32 %v410_v57, %v1730_v22  ;;  %v412_v47 = vmul.f32 %v410_v57, %v1733_v23  ;;  %v413_v20 = vmul.f32 %v410_v57, %v1736_v24 }
  0x3c   : > { %v414_v60 = vperm.slane %v1676_v4, 1  ;;  %v418_v10 = vperm.slane %v1683_v5, 1  ;;  %v422_v54 = vperm.slane %v1688_v6, 1  ;;  %v429_v40 = vrot.slane %v403_v35, 1 }
  0x3d   : > { %v820_v37 = vsel %vm385_vm2, %v818_v46, %v2770_v50  ;;  %v430_v7 = vrot.slane %v1953_v12, 1  ;;  %v441_v36 = vrot.slane %v411_v13, 1  ;;  %v442_v46 = vrot.slane %v412_v47, 1 }
  0x3e   : > { %v825_v33 = vadd.f32 %v820_v37, %v799_v56  ;;  %v415_v58 = vmul.f32 %v414_v60, %v1730_v22  ;;  %v416_v30 = vmul.f32 %v414_v60, %v1733_v23  ;;  %v419_v57 = vmul.f32 %v418_v10, %v1730_v22 }
  0x3f   : > { %v420_v62 = vmul.f32 %v418_v10, %v1733_v23  ;;  %v421_v14 = vmul.f32 %v418_v10, %v1736_v24  ;;  %v423_v38 = vmul.f32 %v422_v54, %v1730_v22  ;;  %v424_v59 = vmul.f32 %v422_v54, %v1733_v23 }
  0x40   : > { %827 = vrot.lane.b32.xlu1 %v825_v33, %s1596_s25  ;;  %v425_v35 = vmul.f32 %v422_v54, %v1736_v24  ;;  %v431_v56 = vsel %vm317_vm0, %v429_v40, %v430_v7  ;;  %v444_v12 = vrot.slane %v413_v20, 1  ;;  %v455_v37 = vrot.slane %v419_v57, 1 }
  0x41   : > { %v436_v13 = vadd.f32 %v431_v56, %v400_v51  ;;  %v456_v50 = vrot.slane %v420_v62, 1  ;;  %v458_v42 = vrot.slane %v421_v14, 1  ;;  %v443_v29 = vsel %vm317_vm0, %v441_v36, %v442_v46 }
  0x42   : > { %v445_v10 = vsel %vm317_vm0, %v442_v46, %v444_v12  ;;  %v481_v39 = vrot.slane %v423_v38, 2  ;;  %v482_v34 = vrot.slane %v424_v59, 2  ;;  %v449_v11 = vadd.f32 %v443_v29, %v407_v19 }
  0x43   : > { %v450_v9 = vadd.f32 %v445_v10, %v408_v48  ;;  %v457_v33 = vsel %vm317_vm0, %v455_v37, %v456_v50  ;;  %v459_v54 = vsel %vm317_vm0, %v456_v50, %v458_v42  ;;  %v484_v51 = vrot.slane %v425_v35, 2 }
  0x44   : > { %v463_v8 = vadd.f32 %v457_v33, %v415_v58  ;;  %v464_v40 = vadd.f32 %v459_v54, %v416_v30  ;;  %v483_v47 = vsel %vm358_vm1, %v481_v39, %v482_v34  ;;  %v469_v20 = vrot.slane %v449_v11, 2 }
  0x45   : > { %v470_v62 = vrot.slane %v450_v9, 2  ;;  %v401_v14 = vmul.f32 %v399_v21, %v1733_v23  ;;  %v405_v36 = vmul.f32 %v402_v27, %v1736_v24  ;;  %v485_v38 = vsel %vm358_vm1, %v482_v34, %v484_v51 }
  0x46   : > { %v489_v59 = vadd.f32 %v483_v47, %v463_v8  ;;  %v409_v29 = vmul.f32 %v406_v63, %v1736_v24  ;;  %v417_v19 = vmul.f32 %v414_v60, %v1736_v24  ;;  %v490_v58 = vadd.f32 %v485_v38, %v464_v40 }
  0x47   : > { %v471_v50 = vsel %vm358_vm1, %v469_v20, %v470_v62  ;;  %v432_v30 = vrot.slane %v405_v36, 1  ;;  %v2787_v39 = vperm.slane %v1656_v0, 0  ;;  %v293_v8 = vmul.f32 %v1706_v15, %v1736_v24 }
  0x48   : > { %v476_v9 = vadd.f32 %v471_v50, %v436_v13  ;;  %v495_v48 = vrot.slane %v489_v59, 4  ;;  %v451_v21 = vadd.f32 %v444_v12, %v409_v29  ;;  %v465_v57 = vadd.f32 %v458_v42, %v417_v19 }
  0x49   : > { %v289_v11 = vmul.f32 %v2787_v39, %v1733_v23  ;;  %v496_v27 = vrot.slane %v490_v58, 4  ;;  %v433_v34 = vsel %vm317_vm0, %v430_v7, %v432_v30  ;;  %v297_v63 = vmul.f32 %v1709_v16, %v1736_v24 }
  0x4a   : > { %v437_v60 = vadd.f32 %v433_v34, %v401_v14  ;;  %v472_v35 = vrot.slane %v451_v21, 2  ;;  %v491_v56 = vadd.f32 %v484_v51, %v465_v57  ;;  %v305_v46 = vmul.f32 %v1720_v18, %v1736_v24 }
  0x4b   : > { %v497_v13 = vsel %vm385_vm2, %v495_v48, %v496_v27  ;;  %v321_v37 = vrot.slane %v293_v8, 1  ;;  %v2788_v42 = vrot.slane %v1822_v45, 1  ;;  %v831_v7 = vperm.slane %v1656_v0, 5 }
  0x4c   : > { %v502_v10 = vadd.f32 %v497_v13, %v476_v9  ;;  %v473_v15 = vsel %vm358_vm1, %v470_v62, %v472_v35  ;;  %v498_v33 = vrot.slane %v491_v56, 4  ;;  %v2789_v16 = vrot.slane %v1835_v53, 1 }
  0x4d   : > { %v340_v12 = vadd.f32 %v2788_v42, %v297_v63  ;;  %v477_v40 = vadd.f32 %v473_v15, %v437_v60  ;;  %v2790_v47 = vrot.slane %v1802_v31, 1  ;;  %v832_v45 = vmul.f32 %v831_v7, %v1730_v22 }
  0x4e   : > { %v354_v54 = vadd.f32 %v2789_v16, %v305_v46  ;;  %504 = vrot.lane.b32.xlu0 %v502_v10, %s1597_s26  ;;  %v499_v20 = vsel %vm385_vm2, %v496_v27, %v498_v33  ;;  %v2791_v62 = vrot.slane %v1843_v55, 2  ;;  %v834_v53 = vperm.slane %v1661_v1, 5 }
  0x4f   : > { %v322_v18 = vsel %vm317_vm0, %v2790_v47, %v321_v37  ;;  %v362_v51 = vrot.slane %v340_v12, 2  ;;  %v503_v38 = vadd.f32 %v499_v20, %v477_v40  ;;  %v2792_v31 = vrot.slane %v1860_v43, 2 }
  0x50   : > { %v326_v14 = vadd.f32 %v322_v18, %v289_v11  ;;  %v381_v36 = vadd.f32 %v2791_v62, %v354_v54  ;;  %v838_v29 = vperm.slane %v1666_v2, 5  ;;  %v842_v19 = vperm.slane %v1671_v3, 5 }
  0x51   : > { %v363_v59 = vsel %vm358_vm1, %v2792_v31, %v362_v51  ;;  %v835_v30 = vmul.f32 %v834_v53, %v1730_v22  ;;  %v836_v39 = vmul.f32 %v834_v53, %v1733_v23  ;;  %506 = vrot.lane.b32.xlu1 %v503_v38, %s1597_s26  ;;  %v2793_v48 = vrot.slane %v1887_v28, 4 }
  0x52   : > { %v367_v50 = vadd.f32 %v363_v59, %v326_v14  ;;  %v389_v58 = vrot.slane %v381_v36, 4  ;;  %v839_v55 = vmul.f32 %v838_v29, %v1730_v22  ;;  %v840_v11 = vmul.f32 %v838_v29, %v1733_v23 }
  0x53   : > { %v843_v9 = vmul.f32 %v842_v19, %v1730_v22  ;;  %v844_v43 = vmul.f32 %v842_v19, %v1733_v23  ;;  %v845_v57 = vmul.f32 %v842_v19, %v1736_v24  ;;  %v846_v27 = vperm.slane %v1676_v4, 5 }
  0x54   : > { %v390_v21 = vsel %vm385_vm2, %v2793_v48, %v389_v58  ;;  %v850_v34 = vperm.slane %v1683_v5, 5  ;;  %v854_v63 = vperm.slane %v1688_v6, 5  ;;  %v861_v60 = vrot.slane %v835_v30, 1 }
  0x55   : > { %v394_v8 = vadd.f32 %v390_v21, %v367_v50  ;;  %v862_v35 = vrot.slane %v836_v39, 1  ;;  %v847_v56 = vmul.f32 %v846_v27, %v1730_v22  ;;  %v848_v46 = vmul.f32 %v846_v27, %v1733_v23 }
  0x56   : > { %v851_v13 = vmul.f32 %v850_v34, %v1730_v22  ;;  %v852_v28 = vmul.f32 %v850_v34, %v1733_v23  ;;  %v853_v37 = vmul.f32 %v850_v34, %v1736_v24  ;;  %v855_v42 = vmul.f32 %v854_v63, %v1730_v22 }
  0x57   : > { %v856_v12 = vmul.f32 %v854_v63, %v1733_v23  ;;  %v857_v10 = vmul.f32 %v854_v63, %v1736_v24  ;;  %397 = vrot.lane.b32.xlu0 %v394_v8, %s1595_s20  ;;  %v863_v15 = vsel %vm317_vm0, %v861_v60, %v862_v35  ;;  %v873_v33 = vrot.slane %v843_v9, 1 }
  0x58   : > { %v874_v16 = vrot.slane %v844_v43, 1  ;;  %v876_v54 = vrot.slane %v845_v57, 1  ;;  %v868_v40 = vadd.f32 %v863_v15, %v832_v45  ;;  %v887_v47 = vrot.slane %v851_v13, 1 }
  0x59   : > { %v888_v18 = vrot.slane %v852_v28, 1  ;;  %v890_v51 = vrot.slane %v853_v37, 1  ;;  %v913_v62 = vrot.slane %v855_v42, 2  ;;  %v914_v36 = vrot.slane %v856_v12, 2 }
  0x5a   : > { %v875_v20 = vsel %vm317_vm0, %v873_v33, %v874_v16  ;;  %v877_v14 = vsel %vm317_vm0, %v874_v16, %v876_v54  ;;  %v916_v45 = vrot.slane %v857_v10, 2  ;;  %v833_v43 = vmul.f32 %v831_v7, %v1733_v23 }
  0x5b   : > { %v881_v38 = vadd.f32 %v875_v20, %v839_v55  ;;  %v882_v31 = vadd.f32 %v877_v14, %v840_v11  ;;  %v889_v59 = vsel %vm317_vm0, %v887_v47, %v888_v18  ;;  %v891_v19 = vsel %vm317_vm0, %v888_v18, %v890_v51 }
  0x5c   : > { %v895_v50 = vadd.f32 %v889_v59, %v847_v56  ;;  %v896_v58 = vadd.f32 %v891_v19, %v848_v46  ;;  %v915_v30 = vsel %vm358_vm1, %v913_v62, %v914_v36  ;;  %v837_v48 = vmul.f32 %v834_v53, %v1736_v24 }
  0x5d   : > { %v901_v39 = vrot.slane %v881_v38, 2  ;;  %v902_v9 = vrot.slane %v882_v31, 2  ;;  %v917_v55 = vsel %vm358_vm1, %v914_v36, %v916_v45  ;;  %v841_v21 = vmul.f32 %v838_v29, %v1736_v24 }
  0x5e   : > { %v921_v11 = vadd.f32 %v915_v30, %v895_v50  ;;  %v849_v57 = vmul.f32 %v846_v27, %v1736_v24  ;;  %v922_v8 = vadd.f32 %v917_v55, %v896_v58  ;;  %v864_v63 = vrot.slane %v837_v48, 1 }
  0x5f   : > { %v903_v34 = vsel %vm358_vm1, %v901_v39, %v902_v9  ;;  %v2794_v60 = vperm.slane %v1656_v0, 4  ;;  %v883_v7 = vadd.f32 %v876_v54, %v841_v21  ;;  %v728_v29 = vmul.f32 %v1739_v25, %v1736_v24 }
  0x60   : > { %v908_v46 = vadd.f32 %v903_v34, %v868_v40  ;;  %v927_v13 = vrot.slane %v921_v11, 4  ;;  %v897_v28 = vadd.f32 %v890_v51, %v849_v57  ;;  %v928_v53 = vrot.slane %v922_v8, 4 }
  0x61   : > { %v724_v56 = vmul.f32 %v2794_v60, %v1733_v23  ;;  %v865_v37 = vsel %vm317_vm0, %v862_v35, %v864_v63  ;;  %v732_v27 = vmul.f32 %v1742_v26, %v1736_v24  ;;  %v904_v12 = vrot.slane %v883_v7, 2 }
  0x62   : > { %v869_v42 = vadd.f32 %v865_v37, %v833_v43  ;;  %v923_v10 = vadd.f32 %v916_v45, %v897_v28  ;;  %v740_v15 = vmul.f32 %v1891_v32, %v1736_v24  ;;  %v929_v33 = vsel %vm385_vm2, %v927_v13, %v928_v53  ;;  %v1124_v37 = vld [vmem:[%s2743_s2 + $0x1f8] sm:$0xff] }
  0x63   : > { %v755_v16 = vrot.slane %v728_v29, 1  ;;  %v2795_v54 = vrot.slane %v1899_v17, 1  ;;  %v940_v35 = vperm.slane %v1656_v0, 6  ;;  %v934_v47 = vadd.f32 %v929_v33, %v908_v46  ;;  %v1117_v29 = vld [vmem:[%s2743_s2 + $0x1c0] sm:$0xff]  ;;  %1204 = vmatpush.msra.mxu3 %v1124_v37 }
  0x64   : > { %v905_v25 = vsel %vm358_vm1, %v902_v9, %v904_v12  ;;  %v930_v18 = vrot.slane %v923_v10, 4  ;;  %v2796_v26 = vrot.slane %v1911_v49, 1  ;;  %v2797_v14 = vrot.slane %v1875_v61, 1 }
  0x65   : > { %v774_v40 = vadd.f32 %v2795_v54, %v732_v27  ;;  %v909_v20 = vadd.f32 %v905_v25, %v869_v42  ;;  %v941_v17 = vmul.f32 %v940_v35, %v1730_v22  ;;  %936 = vrot.lane.b32.xlu2 %v934_v47, %s1598_s27  ;;  %v2798_v31 = vrot.slane %v1916_v44, 2  ;;  %v1118_v27 = vld [vmem:[%s2743_s2 + $0x1c8] sm:$0xff]  ;;  %v1120_v47 = vld [vmem:[%s2743_s2 + $0x1d8] sm:$0xff]  ;;  %v1113_v25 = vld [vmem:[%s2743_s2 + $0x1a0] sm:$0xff] }
  0x66   : > { %v788_v51 = vadd.f32 %v2796_v26, %v740_v15  ;;  %v756_v32 = vsel %vm317_vm0, %v2797_v14, %v755_v16  ;;  %v931_v36 = vsel %vm385_vm2, %v928_v53, %v930_v18  ;;  %v2084_v49 = vperm.slane %v1661_v1, 6  ;;  %v1119_v15 = vld [vmem:[%s2743_s2 + $0x1d0] sm:$0xff]  ;;  %v1114_v14 = vld [vmem:[%s2743_s2 + $0x1a8] sm:$0xff]  ;;  %1205 = vmatpush.msra.mxu3 %v1120_v47 }
  0x67   : > { %v795_v62 = vrot.slane %v774_v40, 2  ;;  %v760_v38 = vadd.f32 %v756_v32, %v724_v56  ;;  %v935_v19 = vadd.f32 %v931_v36, %v909_v20  ;;  %v2799_v61 = vrot.slane %v1929_v52, 2  ;;  %v1115_v32 = vld [vmem:[%s2743_s2 + $0x1b0] sm:$0xff]  ;;  %v1102_v47 = vld [vmem:[%s2743_s2 + $0x148] sm:$0xff] }
  0x68   : > { %v814_v59 = vadd.f32 %v2798_v31, %v788_v51  ;;  %v2090_v58 = vperm.slane %v1666_v2, 6  ;;  %v951_v30 = vperm.slane %v1671_v3, 6  ;;  %v944_v9 = vmul.f32 %v2084_v49, %v1730_v22  ;;  %v1116_v31 = vld [vmem:[%s2743_s2 + $0x1b8] sm:$0xff] }
  0x69   : > { %v796_v50 = vsel %vm358_vm1, %v2799_v61, %v795_v62  ;;  %v2097_v44 = vmul.f32 %v2084_v49, %v1733_v23  ;;  %938 = vrot.lane.b32.xlu1 %v935_v19, %s1598_s27  ;;  %v2800_v43 = vrot.slane %v1948_v41, 4  ;;  %v2112_v11 = vperm.slane %v1676_v4, 6  ;;  %v1121_v4 = vld [vmem:[%s2743_s2 + $0x1e0] sm:$0xff]  ;;  %1206 = vmatpush.msra.mxu3 %v1116_v31 }
  0x6a   : > { %v800_v45 = vadd.f32 %v796_v50, %v760_v38  ;;  %v821_v39 = vrot.slane %v814_v59, 4  ;;  %v948_v1 = vmul.f32 %v2090_v58, %v1730_v22  ;;  %v949_v52 = vmul.f32 %v2090_v58, %v1733_v23  ;;  %1135 = vmatpush.msra.mxu0 %v1121_v4 }
  0x6b   : > { %v952_v2 = vmul.f32 %v951_v30, %v1730_v22  ;;  %v953_v3 = vmul.f32 %v951_v30, %v1733_v23  ;;  %v2109_v55 = vmul.f32 %v951_v30, %v1736_v24  ;;  %v959_v21 = vperm.slane %v1683_v5, 6  ;;  %v1122_v5 = vld [vmem:[%s2743_s2 + $0x1e8] sm:$0xff]  ;;  %v1109_v30 = vld [vmem:[%s2743_s2 + $0x180] sm:$0xff] }
  0x6c   : > { %v822_v48 = vsel %vm385_vm2, %v2800_v43, %v821_v39  ;;  %v963_v34 = vperm.slane %v1688_v6, 6  ;;  %v970_v8 = vrot.slane %v944_v9, 1  ;;  %v971_v63 = vrot.slane %v2097_v44, 1  ;;  %v1123_v6 = vld [vmem:[%s2743_s2 + $0x1f0] sm:$0xff]  ;;  %1158 = vmatpush.msra.mxu1 %v1122_v5  ;;  %1136 = vmatpush.msra.mxu0 %v1117_v29  ;;  %v1092_v44 = vld [vmem:[%s2743_s2 + $0xf8] sm:$0xff] }
  0x6d   : > { %v826_v57 = vadd.f32 %v822_v48, %v800_v45  ;;  %v956_v60 = vmul.f32 %v2112_v11, %v1730_v22  ;;  %v957_v41 = vmul.f32 %v2112_v11, %v1733_v23  ;;  %v960_v56 = vmul.f32 %v959_v21, %v1730_v22  ;;  %1181 = vmatpush.msra.mxu2 %v1123_v6  ;;  %v1110_v45 = vld [vmem:[%s2743_s2 + $0x188] sm:$0xff]  ;;  %v1111_v43 = vld [vmem:[%s2743_s2 + $0x190] sm:$0xff]  ;;  %v1112_v48 = vld [vmem:[%s2743_s2 + $0x198] sm:$0xff] }
  0x6e   : > { %v961_v46 = vmul.f32 %v959_v21, %v1733_v23  ;;  %v2134_v13 = vmul.f32 %v959_v21, %v1736_v24  ;;  %v964_v7 = vmul.f32 %v963_v34, %v1730_v22  ;;  %v965_v28 = vmul.f32 %v963_v34, %v1733_v23  ;;  %1159 = vmatpush.msra.mxu1 %v1118_v27  ;;  %v2805_v27 = vld [vmem:[#allocation6_spill] sm:$0xff] }
  0x6f   : > { %829 = vrot.lane.b32.xlu0 %v826_v57, %s1596_s25  ;;  %v2139_v53 = vmul.f32 %v963_v34, %v1736_v24  ;;  %v972_v22 = vsel %vm317_vm0, %v970_v8, %v971_v63  ;;  %v982_v42 = vrot.slane %v952_v2, 1  ;;  %v983_v12 = vrot.slane %v953_v3, 1  ;;  %1182 = vmatpush.msra.mxu2 %v1119_v15  ;;  %v2802_v2 = vld [vmem:[#allocation2_spill] sm:$0xff]  ;;  %v2803_v34 = vld [vmem:[#allocation3_spill] sm:$0xff] }
  0x70   : > { %v985_v10 = vrot.slane %v2109_v55, 1  ;;  %v977_v33 = vadd.f32 %v972_v22, %v941_v17  ;;  %v996_v16 = vrot.slane %v960_v56, 1  ;;  %v997_v54 = vrot.slane %v961_v46, 1  ;;  %1137 = vmatpush.msra.mxu0 %v1113_v25  ;;  %1160 = vmatpush.msra.mxu1 %v1114_v14  ;;  %v1105_v56 = vld [vmem:[%s2743_s2 + $0x160] sm:$0xff]  ;;  %v1106_v46 = vld [vmem:[%s2743_s2 + $0x168] sm:$0xff]  ;;  %v1103_v14 = vld [vmem:[%s2743_s2 + $0x150] sm:$0xff] }
  0x71   : > { %v999_v40 = vrot.slane %v2134_v13, 1  ;;  %v984_v18 = vsel %vm317_vm0, %v982_v42, %v983_v12  ;;  %v1022_v51 = vrot.slane %v964_v7, 2  ;;  %v1023_v20 = vrot.slane %v965_v28, 2  ;;  %1183 = vmatpush.msra.mxu2 %v1115_v32  ;;  %v1107_v7 = vld [vmem:[%s2743_s2 + $0x170] sm:$0xff]  ;;  %v1108_v28 = vld [vmem:[%s2743_s2 + $0x178] sm:$0xff]  ;;  %1207 = vmatpush.msra.mxu3 %v1112_v48 }
  0x72   : > { %v986_v26 = vsel %vm317_vm0, %v983_v12, %v985_v10  ;;  %v990_v62 = vadd.f32 %v984_v18, %v948_v1  ;;  %v998_v36 = vsel %vm317_vm0, %v996_v16, %v997_v54  ;;  %v1025_v50 = vrot.slane %v2139_v53, 2  ;;  %1138 = vmatpush.msra.mxu0 %v1109_v30  ;;  %1161 = vmatpush.msra.mxu1 %v1110_v45  ;;  %v2807_v12 = vld [vmem:[#allocation7_spill] sm:$0xff]  ;;  %v1104_v32 = vld [vmem:[%s2743_s2 + $0x158] sm:$0xff]  ;;  %v1095_v13 = vld [vmem:[%s2743_s2 + $0x110] sm:$0xff] }
  0x73   : > { %v2174_v17 = vadd.f32 %v986_v26, %v949_v52  ;;  %v1000_v38 = vsel %vm317_vm0, %v997_v54, %v999_v40  ;;  %v1004_v59 = vadd.f32 %v998_v36, %v956_v60  ;;  %v1024_v61 = vsel %vm358_vm1, %v1022_v51, %v1023_v20  ;;  %v2804_v60 = vld [vmem:[#allocation4_spill] sm:$0xff]  ;;  %1184 = vmatpush.msra.mxu2 %v1111_v43  ;;  %v1101_v54 = vld [vmem:[%s2743_s2 + $0x140] sm:$0xff]  ;;  %v1100_v55 = vld [vmem:[%s2743_s2 + $0x138] sm:$0xff] }
  0x74   : > { %v1005_v19 = vadd.f32 %v1000_v38, %v957_v41  ;;  %v1010_v39 = vrot.slane %v990_v62, 2  ;;  %v2801_v1 = vperm.slane %v1656_v0, 2  ;;  %v514_v3 = vmul.f32 %v2802_v2, %v1736_v24  ;;  %1139 = vmatpush.msra.mxu0 %v1105_v56  ;;  %1162 = vmatpush.msra.mxu1 %v1106_v46  ;;  %v2811_v38 = vld [vmem:[#allocation8_spill] sm:$0xff]  ;;  %v1094_v43 = vld [vmem:[%s2743_s2 + $0x108] sm:$0xff] }
  0x75   : > { %v1011_v9 = vrot.slane %v2174_v17, 2  ;;  %v1026_v21 = vsel %vm358_vm1, %v1023_v20, %v1025_v50  ;;  %v1030_v57 = vadd.f32 %v1024_v61, %v1004_v59  ;;  %v518_v8 = vmul.f32 %v2803_v34, %v1736_v24  ;;  %1185 = vmatpush.msra.mxu2 %v1107_v7  ;;  %1208 = vmatpush.msra.mxu3 %v1108_v28  ;;  %v2815_v34 = vld [vmem:[#allocation10_spill] sm:$0xff]  ;;  %v1086_v17 = vld [vmem:[%s2743_s2 + $0xc8] sm:$0xff] }
  0x76   : > { %v510_v52 = vmul.f32 %v2801_v1, %v1733_v23  ;;  %v526_v41 = vmul.f32 %v2804_v60, %v1736_v24  ;;  %v2219_v5 = vadd.f32 %v1026_v21, %v1005_v19  ;;  %v541_v6 = vrot.slane %v514_v3, 1  ;;  %v1098_v19 = vld [vmem:[%s2743_s2 + $0x128] sm:$0xff]  ;;  %1140 = vmatpush.msra.mxu0 %v1101_v54  ;;  %1163 = vmatpush.msra.mxu1 %v1102_v47  ;;  %v1096_v21 = vld [vmem:[%s2743_s2 + $0x118] sm:$0xff]  ;;  %v1085_v28 = vld [vmem:[%s2743_s2 + $0xc0] sm:$0xff] }
  0x77   : > { %v1012_v4 = vsel %vm358_vm1, %v1010_v39, %v1011_v9  ;;  %v1036_v29 = vrot.slane %v1030_v57, 4  ;;  %v2806_v22 = vrot.slane %v2805_v27, 1  ;;  %v2808_v15 = vrot.slane %v2807_v12, 1  ;;  %v2813_v39 = vld [vmem:[#allocation9_spill] sm:$0xff]  ;;  %1186 = vmatpush.msra.mxu2 %v1103_v14  ;;  %1209 = vmatpush.msra.mxu3 %v1104_v32  ;;  %v1089_v57 = vld [vmem:[%s2743_s2 + $0xe0] sm:$0xff]  ;;  %v1083_v27 = vld [vmem:[%s2743_s2 + $0xb0] sm:$0xff] }
  0x78   : > { %v1017_v37 = vadd.f32 %v1012_v4, %v977_v33  ;;  %v1037_v25 = vrot.slane %v2219_v5, 4  ;;  %v2809_v33 = vld [vmem:[#allocation5_spill] sm:$0xff]  ;;  %v946_v51 = vmul.f32 %v2084_v49, %v1736_v24  ;;  %v950_v20 = vmul.f32 %v2090_v58, %v1736_v24  ;;  %v1097_v58 = vld [vmem:[%s2743_s2 + $0x120] sm:$0xff]  ;;  %1164 = vmatpush.msra.mxu1 %v1098_v19  ;;  %v1078_v12 = vld [vmem:[%s2743_s2 + $0x88] sm:$0xff] }
  0x79   : > { %v560_v42 = vadd.f32 %v2806_v22, %v518_v8  ;;  %v574_v16 = vadd.f32 %v2808_v15, %v526_v41  ;;  %v2810_v18 = vrot.slane %v2809_v33, 1  ;;  %v2812_v31 = vrot.slane %v2811_v38, 2  ;;  %1141 = vmatpush.msra.mxu0 %v1097_v58  ;;  %1210 = vmatpush.msra.mxu3 %v1100_v55  ;;  %v1088_v5 = vld [vmem:[%s2743_s2 + $0xd8] sm:$0xff]  ;;  %v1079_v15 = vld [vmem:[%s2743_s2 + $0x90] sm:$0xff]  ;;  %v1073_v54 = vld [vmem:[%s2743_s2 + $0x60] sm:$0xff] }
  0x7a   : > { %v958_v49 = vmul.f32 %v2112_v11, %v1736_v24  ;;  %v1038_v61 = vsel %vm385_vm2, %v1036_v29, %v1037_v25  ;;  %v973_v30 = vrot.slane %v946_v51, 1  ;;  %v992_v45 = vadd.f32 %v985_v10, %v950_v20  ;;  %v1099_v24 = vld [vmem:[%s2743_s2 + $0x130] sm:$0xff]  ;;  %v1093_v10 = vld [vmem:[%s2743_s2 + $0x100] sm:$0xff]  ;;  %1165 = vmatpush.msra.mxu1 %v1094_v43  ;;  %v1082_v29 = vld [vmem:[%s2743_s2 + $0xa8] sm:$0xff] }
  0x7b   : > { %v542_v26 = vsel %vm317_vm0, %v2810_v18, %v541_v6  ;;  %v581_v36 = vrot.slane %v560_v42, 2  ;;  %v600_v59 = vadd.f32 %v2812_v31, %v574_v16  ;;  %v1043_v11 = vadd.f32 %v1038_v61, %v1017_v37  ;;  %1187 = vmatpush.msra.mxu2 %v1099_v24  ;;  %1142 = vmatpush.msra.mxu0 %v1093_v10  ;;  %v1081_v37 = vld [vmem:[%s2743_s2 + $0xa0] sm:$0xff]  ;;  %v1084_v22 = vld [vmem:[%s2743_s2 + $0xb8] sm:$0xff]  ;;  %v1074_v47 = vld [vmem:[%s2743_s2 + $0x68] sm:$0xff] }
  0x7c   : > { %v546_v62 = vadd.f32 %v542_v26, %v510_v52  ;;  %v2814_v1 = vrot.slane %v2813_v39, 2  ;;  %v1006_v3 = vadd.f32 %v999_v40, %v958_v49  ;;  %v942_v48 = vmul.f32 %v940_v35, %v1733_v23  ;;  %v1090_v23 = vld [vmem:[%s2743_s2 + $0xe8] sm:$0xff]  ;;  %v1091_v35 = vld [vmem:[%s2743_s2 + $0xf0] sm:$0xff]  ;;  %1211 = vmatpush.msra.mxu3 %v1096_v21  ;;  %v1077_v42 = vld [vmem:[%s2743_s2 + $0x80] sm:$0xff] }
  0x7d   : > { %v607_v2 = vrot.slane %v600_v59, 4  ;;  %1045 = vrot.lane.b32.xlu2 %v1043_v11, %s1599_s12  ;;  %v2816_v8 = vrot.slane %v2815_v34, 4  ;;  %v974_v41 = vsel %vm317_vm0, %v971_v63, %v973_v30  ;;  %v1013_v56 = vrot.slane %v992_v45, 2  ;;  %1188 = vmatpush.msra.mxu2 %v1095_v13  ;;  %v1080_v16 = vld [vmem:[%s2743_s2 + $0x98] sm:$0xff]  ;;  %v1561_v51 = vld [vmem:[%s2742_s1 + $0x28] sm:$0x7f] }
  0x7e   : > { %v582_v52 = vsel %vm358_vm1, %v2814_v1, %v581_v36  ;;  %v1032_v0 = vadd.f32 %v1025_v50, %v1006_v3  ;;  %1143 = vmatpush.msra.mxu0 %v1089_v57  ;;  %v978_v53 = vadd.f32 %v974_v41, %v942_v48  ;;  %1166 = vmatpush.msra.mxu1 %v1090_v23  ;;  %v1076_v33 = vld [vmem:[%s2743_s2 + $0x78] sm:$0xff]  ;;  %v636_v20 = vperm.slane %v1561_v51, 3  ;;  %v2376_v14 = vld [vmem:[%s1717_s18] sm:$0xff]  ;;  %v2384_v38 = vld [vmem:[%s1717_s18 + $0x10] sm:$0x3f] }
  0x7f   : > { %v586_v40 = vadd.f32 %v582_v52, %v546_v62  ;;  %v608_v60 = vsel %vm385_vm2, %v2816_v8, %v607_v2  ;;  %1189 = vmatpush.msra.mxu2 %v1091_v35  ;;  %v1014_v50 = vsel %vm358_vm1, %v1011_v9, %v1013_v56  ;;  %1212 = vmatpush.msra.mxu3 %v1092_v44  ;;  %v1087_v9 = vld [vmem:[%s2743_s2 + $0xd0] sm:$0xff]  ;;  %v1560_v18 = vld [vmem:[%s2742_s1 + $0x18] sm:$0x7f]  ;;  %v2380_v62 = vld [vmem:[%s1717_s18 + $0x8] sm:$0xff]  ;;  %vm1421_vm3 = vcmask 1042432  }
  0x80   : > { %v1039_v46 = vrot.slane %v1032_v0, 4  ;;  %v1018_v4 = vadd.f32 %v1014_v50, %v978_v53  ;;  %1144 = vmatpush.msra.mxu0 %v1085_v28  ;;  %1167 = vmatpush.msra.mxu1 %v1086_v17  ;;  %v628_v26 = vperm.slane %v1560_v18, 3  ;;  %v637_v59 = vmul.f32 %v2376_v14, %v636_v20  ;;  %v1565_v49 = vld [vmem:[%s2742_s1 + $0x30] sm:$0x7f]  ;;  %v1566_v30 = vld [vmem:[%s2742_s1 + $0x8] sm:$0x7f] }
  0x81   : > { %v612_v63 = vadd.f32 %v608_v60, %v586_v40  ;;  %1190 = vmatpush.msra.mxu2 %v1087_v9  ;;  %1213 = vmatpush.msra.mxu3 %v1088_v5  ;;  %v640_v58 = vperm.slane %v1565_v49, 3  ;;  %v638_v19 = vmul.f32 %v2380_v62, %v636_v20  ;;  %v2395_v61 = vmul.f32 %v2384_v38, %v636_v20  ;;  %v1567_v24 = vld [vmem:[%s2742_s1 + $0x10] sm:$0x7f]  ;;  %v1568_v39 = vld [vmem:[%s2742_s1 + $0x20] sm:$0x7f]  ;;  %v1070_v3 = vld [vmem:[%s2743_s2 + $0x48] sm:$0xff] }
  0x82   : > { %v1040_v6 = vsel %vm385_vm2, %v1037_v25, %v1039_v46  ;;  %1145 = vmatpush.msra.mxu0 %v1081_v37  ;;  %1168 = vmatpush.msra.mxu1 %v1082_v29  ;;  %v1075_v25 = vld [vmem:[%s2743_s2 + $0x70] sm:$0xff]  ;;  %v629_v32 = vmul.f32 %v2376_v14, %v628_v26  ;;  %v630_v36 = vmul.f32 %v2380_v62, %v628_v26  ;;  %v2400_v45 = vperm.slane %v1566_v30, 3  ;;  %v1069_v2 = vld [vmem:[%s2743_s2 + $0x40] sm:$0xff]  ;;  %v1072_v48 = vld [vmem:[%s2743_s2 + $0x58] sm:$0xff] }
  0x83   : > { %v1044_v7 = vadd.f32 %v1040_v6, %v1018_v4  ;;  %1191 = vmatpush.msra.mxu2 %v1083_v27  ;;  %1214 = vmatpush.msra.mxu3 %v1084_v22  ;;  %v2387_v31 = vmul.f32 %v2384_v38, %v628_v26  ;;  %v2405_v11 = vperm.slane %v1567_v24, 3  ;;  %v2410_v1 = vperm.slane %v1568_v39, 3  ;;  %v1071_v55 = vld [vmem:[%s2743_s2 + $0x50] sm:$0xff]  ;;  %v1065_v60 = vld [vmem:[%s2743_s2 + $0x20] sm:$0xff]  ;;  %v1066_v41 = vld [vmem:[%s2743_s2 + $0x28] sm:$0xff] }
  0x84   : > { %1146 = vmatpush.msra.mxu0 %v1077_v42  ;;  %1169 = vmatpush.msra.mxu1 %v1078_v12  ;;  %v659_v52 = vrot.slane %v629_v32, 1  ;;  %v641_v10 = vmul.f32 %v2376_v14, %v640_v58  ;;  %v660_v43 = vrot.slane %v630_v36, 1  ;;  %v673_v40 = vrot.slane %v637_v59, 1  ;;  %v1067_v56 = vld [vmem:[%s2743_s2 + $0x30] sm:$0xff]  ;;  %v1068_v35 = vld [vmem:[%s2743_s2 + $0x38] sm:$0xff]  ;;  %v1061_v44 = vld [vmem:[%s2743_s2] sm:$0xff] }
  0x85   : > { %615 = vrot.lane.b32.xlu2 %v612_v63, %s1594_s19  ;;  %1192 = vmatpush.msra.mxu2 %v1079_v15  ;;  %v662_v13 = vrot.slane %v2387_v31, 1  ;;  %v642_v21 = vmul.f32 %v2380_v62, %v640_v58  ;;  %v2428_v57 = vmul.f32 %v2384_v38, %v640_v58  ;;  %v674_v34 = vrot.slane %v638_v19, 1  ;;  %v1062_v63 = vld [vmem:[%s2743_s2 + $0x8] sm:$0xff]  ;;  %v1063_v4 = vld [vmem:[%s2743_s2 + $0x10] sm:$0xff]  ;;  %v1064_v6 = vld [vmem:[%s2743_s2 + $0x18] sm:$0xff]  ;;  %s273_s19 = scalar_lea.vmem %s2747_s6, %s1527_s8 }
  0x86   : > { %1215 = vmatpush.msra.mxu3 %v1080_v16  ;;  %1147 = vmatpush.msra.mxu0 %v1073_v54  ;;  %v676_v8 = vrot.slane %v2395_v61, 1  ;;  %v621_v0 = vmul.f32 %v2376_v14, %v2400_v45  ;;  %v2444_v23 = vmul.f32 %v2380_v62, %v2400_v45  ;;  %v625_v53 = vmul.f32 %v2376_v14, %v2405_v11  ;;  %v2481_v22 = vld [vmem:[%s2742_s1] sm:$0x7f]  ;;  %v1304_v31 = vld [vmem:[%s2745_s4 + $0x168] sm:$0xff] }
  0x87   : > { %1170 = vmatpush.msra.mxu1 %v1074_v47  ;;  %1193 = vmatpush.msra.mxu2 %v1075_v25  ;;  %v626_v50 = vmul.f32 %v2380_v62, %v2405_v11  ;;  %v633_v46 = vmul.f32 %v2376_v14, %v2410_v1  ;;  %v661_v28 = vsel %vm317_vm0, %v659_v52, %v660_v43  ;;  %v699_v9 = vrot.slane %v641_v10, 2  ;;  %v1320_v61 = vld [vmem:[%s2745_s4 + $0x1e8] sm:$0xff] }
  0x88   : > { %1216 = vmatpush.msra.mxu3 %v1076_v33  ;;  %1148 = vmatpush.msra.mxu0 %v1069_v2  ;;  %v663_v17 = vsel %vm317_vm0, %v660_v43, %v662_v13  ;;  %v675_v5 = vsel %vm317_vm0, %v673_v40, %v674_v34  ;;  %v677_v37 = vsel %vm317_vm0, %v674_v34, %v676_v8  ;;  %v700_v29 = vrot.slane %v642_v21, 2  ;;  %v1274_v21 = vld [vmem:[%s2745_s4 + $0x78] sm:$0xff] }
  0x89   : > { %1171 = vmatpush.msra.mxu1 %v1070_v3  ;;  %1194 = vmatpush.msra.mxu2 %v1071_v55  ;;  %v702_v27 = vrot.slane %v2428_v57, 2  ;;  %v617_v42 = vperm.slane %v2481_v22, 3  ;;  %v647_v12 = vrot.slane %v621_v0, 1  ;;  %v648_v15 = vrot.slane %v2444_v23, 1  ;;  %v1290_v34 = vld [vmem:[%s2745_s4 + $0xf8] sm:$0xff]  ;;  %v1271_v0 = vld [vmem:[%s2745_s4 + $0x60] sm:$0xff] }
  0x8a   : > { %1217 = vmatpush.msra.mxu3 %v1072_v48  ;;  %1149 = vmatpush.msra.mxu0 %v1065_v60  ;;  %v667_v16 = vadd.f32 %v661_v28, %v625_v53  ;;  %v2485_v54 = vadd.f32 %v663_v17, %v626_v50  ;;  %v681_v47 = vadd.f32 %v675_v5, %v633_v46  ;;  %v1273_v60 = vld [vmem:[%s2745_s4 + $0x70] sm:$0xff]  ;;  %v1287_v50 = vld [vmem:[%s2745_s4 + $0xe0] sm:$0xff]  ;;  %v1302_v23 = vld [vmem:[%s2745_s4 + $0x158] sm:$0xff] }
  0x8b   : > { %1172 = vmatpush.msra.mxu1 %v1066_v41  ;;  %1195 = vmatpush.msra.mxu2 %v1067_v56  ;;  %v701_v33 = vsel %vm358_vm1, %v699_v9, %v700_v29  ;;  %v703_v18 = vsel %vm358_vm1, %v700_v29, %v702_v27  ;;  %v618_v20 = vmul.f32 %v2376_v14, %v617_v42  ;;  %v1306_v41 = vld [vmem:[%s2745_s4 + $0x178] sm:$0xff]  ;;  %v1305_v46 = vld [vmem:[%s2745_s4 + $0x170] sm:$0xff]  ;;  %v1303_v9 = vld [vmem:[%s2745_s4 + $0x160] sm:$0xff] }
  0x8c   : > { %1218 = vmatpush.msra.mxu3 %v1068_v35  ;;  %1150 = vmatpush.msra.mxu0 %v1061_v44  ;;  %v649_v32 = vsel %vm317_vm0, %v647_v12, %v648_v15  ;;  %v687_v36 = vrot.slane %v667_v16, 2  ;;  %v688_v59 = vrot.slane %v2485_v54, 2  ;;  %v707_v49 = vadd.f32 %v701_v33, %v681_v47  ;;  %v1322_v35 = vld [vmem:[%s2745_s4 + $0x1f8] sm:$0xff]  ;;  %v1319_v5 = vld [vmem:[%s2745_s4 + $0x1e0] sm:$0xff]  ;;  %v1285_v12 = vld [vmem:[%s2745_s4 + $0xd0] sm:$0xff] }
  0x8d   : > { %1047 = vrot.lane.b32.xlu2 %v1044_v7, %s1599_s12  ;;  %v634_v7 = vmul.f32 %v2380_v62, %v2410_v1  ;;  %1173 = vmatpush.msra.mxu1 %v1062_v63  ;;  %v654_v19 = vadd.f32 %v649_v32, %v618_v20  ;;  %v623_v43 = vmul.f32 %v2384_v38, %v2400_v45  ;;  %v1289_v45 = vld [vmem:[%s2745_s4 + $0xf0] sm:$0xff]  ;;  %v1318_v57 = vld [vmem:[%s2745_s4 + $0x1d8] sm:$0xff]  ;;  %v1284_v33 = vld [vmem:[%s2745_s4 + $0xc8] sm:$0xff] }
  0x8e   : > { %1196 = vmatpush.msra.mxu2 %v1063_v4  ;;  %1219 = vmatpush.msra.mxu3 %v1064_v6  ;;  %v689_v30 = vsel %vm358_vm1, %v687_v36, %v688_v59  ;;  %v713_v24 = vrot.slane %v707_v49, 4  ;;  %v627_v40 = vmul.f32 %v2384_v38, %v2405_v11  ;;  %v635_v48 = vmul.f32 %v2384_v38, %v2410_v1  ;;  %v1272_v11 = vld [vmem:[%s2745_s4 + $0x68] sm:$0xff]  ;;  %v1321_v4 = vld [vmem:[%s2745_s4 + $0x1f0] sm:$0xff] }
  0x8f   : > { %v682_v25 = vadd.f32 %v677_v37, %v634_v7  ;;  %v694_v52 = vadd.f32 %v689_v30, %v654_v19  ;;  %1327 = vmatpush.msrb.mxu0 %v1274_v21  ;;  %1350 = vmatpush.msrb.mxu1 %v1290_v34  ;;  %v1288_v1 = vld [vmem:[%s2745_s4 + $0xe8] sm:$0xff]  ;;  %v650_v44 = vrot.slane %v623_v43, 1  ;;  %v619_v17 = vmul.f32 %v2380_v62, %v617_v42  ;;  %v1269_v42 = vld [vmem:[%s2745_s4 + $0x50] sm:$0xff]  ;;  %v1267_v19 = vld [vmem:[%s2745_s4 + $0x40] sm:$0xff] }
  0x90   : > { %v669_v63 = vadd.f32 %v662_v13, %v627_v40  ;;  %v683_v53 = vadd.f32 %v676_v8, %v635_v48  ;;  %1373 = vmatpush.msrb.mxu2 %v1306_v41  ;;  %1396 = vmatpush.msrb.mxu3 %v1322_v35  ;;  %v1270_v13 = vld [vmem:[%s2745_s4 + $0x58] sm:$0xff]  ;;  %v1317_v20 = vld [vmem:[%s2745_s4 + $0x1d0] sm:$0xff]  ;;  %v1283_v30 = vld [vmem:[%s2745_s4 + $0xc0] sm:$0xff] }
  0x91   : > { %v2496_v58 = vadd.f32 %v703_v18, %v682_v25  ;;  %1328 = vmatpush.msrb.mxu0 %v1273_v60  ;;  %1351 = vmatpush.msrb.mxu1 %v1289_v45  ;;  %v1286_v8 = vld [vmem:[%s2745_s4 + $0xd8] sm:$0xff]  ;;  %v651_v37 = vsel %vm317_vm0, %v648_v15, %v650_v44  ;;  %v1268_v25 = vld [vmem:[%s2745_s4 + $0x48] sm:$0xff]  ;;  %v1315_v35 = vld [vmem:[%s2745_s4 + $0x1c0] sm:$0xff] }
  0x92   : > { %1374 = vmatpush.msrb.mxu2 %v1305_v46  ;;  %1397 = vmatpush.msrb.mxu3 %v1321_v4  ;;  %v690_v29 = vrot.slane %v669_v63, 2  ;;  %v709_v22 = vadd.f32 %v702_v27, %v683_v53  ;;  %v1264_v41 = vld [vmem:[%s2745_s4 + $0x28] sm:$0xff]  ;;  %v1263_v44 = vld [vmem:[%s2745_s4 + $0x20] sm:$0xff]  ;;  %v1298_v53 = vld [vmem:[%s2745_s4 + $0x138] sm:$0xff] }
  0x93   : > { %v714_v39 = vrot.slane %v2496_v58, 4  ;;  %1329 = vmatpush.msrb.mxu0 %v1272_v11  ;;  %1352 = vmatpush.msrb.mxu1 %v1288_v1  ;;  %v1281_v58 = vld [vmem:[%s2745_s4 + $0xb0] sm:$0xff]  ;;  %v1279_v63 = vld [vmem:[%s2745_s4 + $0xa0] sm:$0xff]  ;;  %v1262_v46 = vld [vmem:[%s2745_s4 + $0x18] sm:$0xff] }
  0x94   : > { %1375 = vmatpush.msrb.mxu2 %v1304_v31  ;;  %1398 = vmatpush.msrb.mxu3 %v1320_v61  ;;  %v691_v32 = vsel %vm358_vm1, %v688_v59, %v690_v29  ;;  %v716_v36 = vrot.slane %v709_v22, 4  ;;  %v1300_v59 = vld [vmem:[%s2745_s4 + $0x148] sm:$0xff]  ;;  %v1278_v4 = vld [vmem:[%s2745_s4 + $0x98] sm:$0xff]  ;;  %v1313_v31 = vld [vmem:[%s2745_s4 + $0x1b0] sm:$0xff] }
  0x95   : > { %v715_v55 = vsel %vm385_vm2, %v713_v24, %v714_v39  ;;  %1330 = vmatpush.msrb.mxu0 %v1271_v0  ;;  %1353 = vmatpush.msrb.mxu1 %v1287_v50  ;;  %v1316_v24 = vld [vmem:[%s2745_s4 + $0x1c8] sm:$0xff]  ;;  %v1299_v0 = vld [vmem:[%s2745_s4 + $0x140] sm:$0xff]  ;;  %v1314_v50 = vld [vmem:[%s2745_s4 + $0x1b8] sm:$0xff] }
  0x96   : > { %v720_v56 = vadd.f32 %v715_v55, %v694_v52  ;;  %1376 = vmatpush.msrb.mxu2 %v1303_v9  ;;  %1399 = vmatpush.msrb.mxu3 %v1319_v5  ;;  %v717_v52 = vsel %vm385_vm2, %v714_v39, %v716_v36  ;;  %v1261_v61 = vld [vmem:[%s2745_s4 + $0x10] sm:$0xff]  ;;  %v1295_v9 = vld [vmem:[%s2745_s4 + $0x120] sm:$0xff]  ;;  %v1294_v22 = vld [vmem:[%s2745_s4 + $0x118] sm:$0xff] }
  0x97   : > { %1331 = vmatpush.msrb.mxu0 %v1270_v13  ;;  %1354 = vmatpush.msrb.mxu1 %v1286_v8  ;;  %v1277_v13 = vld [vmem:[%s2745_s4 + $0x90] sm:$0xff]  ;;  %v1296_v8 = vld [vmem:[%s2745_s4 + $0x128] sm:$0xff]  ;;  %v1311_v5 = vld [vmem:[%s2745_s4 + $0x1a0] sm:$0xff] }
  0x98   : > { %1377 = vmatpush.msrb.mxu2 %v1302_v23  ;;  %1400 = vmatpush.msrb.mxu3 %v1318_v57  ;;  %v1275_v29 = vld [vmem:[%s2745_s4 + $0x80] sm:$0xff]  ;;  %v1308_v23 = vld [vmem:[%s2745_s4 + $0x188] sm:$0xff] }
  0x99   : > { %v614_v26 = vpop.permute.xlu1 %613  ;;  %1332 = vmatpush.msrb.mxu0 %v1269_v42  ;;  %1355 = vmatpush.msrb.mxu1 %v1285_v12  ;;  %v1310_v42 = vld [vmem:[%s2745_s4 + $0x198] sm:$0xff]  ;;  %v1293_v12 = vld [vmem:[%s2745_s4 + $0x110] sm:$0xff]  ;;  %v1291_v57 = vld [vmem:[%s2745_s4 + $0x100] sm:$0xff] }
  0x9a   : > { %v1051_v7 = vadd.f32 %v720_v56, %v614_v26  ;;  %v655_v26 = vadd.f32 %v651_v37, %v619_v17  ;;  %1401 = vmatpush.msrb.mxu3 %v1317_v20  ;;  %v1280_v56 = vld [vmem:[%s2745_s4 + $0xa8] sm:$0xff]  ;;  %v1259_v37 = vld [vmem:[%s2745_s4] sm:$0xff] }
  0x9b   : > { %1333 = vmatpush.msrb.mxu0 %v1268_v25  ;;  %1356 = vmatpush.msrb.mxu1 %v1284_v33  ;;  %v1276_v17 = vld [vmem:[%s2745_s4 + $0x88] sm:$0xff] }
  0x9c   : > { %v695_v54 = vadd.f32 %v691_v32, %v655_v26  ;;  %1402 = vmatpush.msrb.mxu3 %v1316_v24 }
  0x9d   : > { %1334 = vmatpush.msrb.mxu0 %v1267_v19  ;;  %1357 = vmatpush.msrb.mxu1 %v1283_v30 }
  0x9e   : > { %v721_v39 = vadd.f32 %v717_v52, %v695_v54  ;;  %1403 = vmatpush.msrb.mxu3 %v1315_v35 }
  0xa0   : > { %1404 = vmatpush.msrb.mxu3 %v1314_v50 }
  0xa2   : > { %1405 = vmatpush.msrb.mxu3 %v1313_v31 }
  0xa4   : > { %v396_v51 = vpop.permute.xlu0 %395 }
  0xb2   : > { %v828_v2 = vpop.permute.xlu1 %827 }
  0xbf   : > { %v937_v3 = vpop.permute.xlu2 %936 }
  0xc0   : > { %v505_v10 = vpop.permute.xlu0 %504  ;;  %v1053_v28 = vadd.f32 %v937_v3, %v828_v2  ;;  %v1266_v2 = vld [vmem:[%s2745_s4 + $0x38] sm:$0xff] }
  0xc1   : > { %v1049_v6 = vadd.f32 %v505_v10, %v396_v51  ;;  %v1301_v51 = vld [vmem:[%s2745_s4 + $0x150] sm:$0xff]  ;;  %v1282_v3 = vld [vmem:[%s2745_s4 + $0xb8] sm:$0xff]  ;;  %1335 = vmatpush.msrb.mxu0 %v1266_v2 }
  0xc2   : > { %1378 = vmatpush.msrb.mxu2 %v1301_v51  ;;  %v1265_v10 = vld [vmem:[%s2745_s4 + $0x30] sm:$0xff]  ;;  %1358 = vmatpush.msrb.mxu1 %v1282_v3 }
  0xc3   : > { %v1055_v16 = vadd.f32 %v1051_v7, %v1049_v6  ;;  %v507_v47 = vpop.permute.xlu1 %506  ;;  %1336 = vmatpush.msrb.mxu0 %v1265_v10  ;;  %v1297_v6 = vld [vmem:[%s2745_s4 + $0x130] sm:$0xff]  ;;  %v1312_v7 = vld [vmem:[%s2745_s4 + $0x1a8] sm:$0xff] }
  0xc4   : > { %1379 = vmatpush.msrb.mxu2 %v1300_v59  ;;  %1359 = vmatpush.msrb.mxu1 %v1281_v58 }
  0xc5   : > { %1337 = vmatpush.msrb.mxu0 %v1264_v41  ;;  %1406 = vmatpush.msrb.mxu3 %v1312_v7 }
  0xc6   : > { %1360 = vmatpush.msrb.mxu1 %v1280_v56  ;;  %1380 = vmatpush.msrb.mxu2 %v1299_v0 }
  0xc7   : > { %1338 = vmatpush.msrb.mxu0 %v1263_v44  ;;  %1407 = vmatpush.msrb.mxu3 %v1311_v5 }
  0xc8   : > { %1361 = vmatpush.msrb.mxu1 %v1279_v63  ;;  %1381 = vmatpush.msrb.mxu2 %v1298_v53 }
  0xc9   : > { %v398_v15 = vpop.permute.xlu0 %397  ;;  %1339 = vmatpush.msrb.mxu0 %v1262_v46  ;;  %1408 = vmatpush.msrb.mxu3 %v1310_v42 }
  0xca   : > { %v1050_v21 = vadd.f32 %v507_v47, %v398_v15  ;;  %1362 = vmatpush.msrb.mxu1 %v1278_v4  ;;  %1382 = vmatpush.msrb.mxu2 %v1297_v6  ;;  %v1292_v47 = vld [vmem:[%s2745_s4 + $0x108] sm:$0xff]  ;;  %v1125_v15 = vld [vmem:[%s2744_s3] sm:$0xf] }
  0xcb   : > { %1340 = vmatpush.msrb.mxu0 %v1261_v61  ;;  %v1127_v25 = vperm.slane %v1125_v15, 0  ;;  %v1128_v33 = vperm.slane %v1125_v15, 1  ;;  %v1130_v19 = vperm.slane %v1125_v15, 3 }
  0xcc   : > { %1363 = vmatpush.msrb.mxu1 %v1277_v13  ;;  %1383 = vmatpush.msrb.mxu2 %v1296_v8 }
  0xce   : > { %1364 = vmatpush.msrb.mxu1 %v1276_v17  ;;  %1384 = vmatpush.msrb.mxu2 %v1295_v9 }
  0xd0   : > { %1365 = vmatpush.msrb.mxu1 %v1275_v29  ;;  %1385 = vmatpush.msrb.mxu2 %v1294_v22  ;;  %v1559_v22 = vld [vmem:[%s2746_s5] ss:$0 sm:$0xff] }
  0xd2   : > { %1386 = vmatpush.msrb.mxu2 %v1293_v12 }
  0xd4   : > { %1387 = vmatpush.msrb.mxu2 %v1292_v47 }
  0xd6   : > { %1388 = vmatpush.msrb.mxu2 %v1291_v57 }
  0xd7   : > { %v1046_v27 = vpop.permute.xlu2 %1045 }
  0xd8   : > { %v1057_v18 = vadd.f32 %v1053_v28, %v1046_v27  ;;  %v1260_v28 = vld [vmem:[%s2745_s4 + $0x8] sm:$0xff]  ;;  %v1307_v27 = vld [vmem:[%s2745_s4 + $0x180] sm:$0xff] }
  0xd9   : > { %1341 = vmatpush.msrb.mxu0 %v1260_v28 }
  0xda   : > { %v1059_v49 = vadd.f32 %v1057_v18, %v1055_v16  ;;  %v1309_v16 = vld [vmem:[%s2745_s4 + $0x190] sm:$0xff] }
  0xdb   : > { %v939_v43 = vpop.permute.xlu1 %938  ;;  %1342 = vmatpush.msrb.mxu0 %v1259_v37  ;;  %1409 = vmatpush.msrb.mxu3 %v1309_v16 }
  0xdc   : > { %1151 = vmatmul.f32.vlgmr.msra.gmra.mxu0 %v1059_v49  ;;  %1174 = vmatmul.f32.vlgmr.msra.gmra.mxu1 %v1059_v49 }
  0xdd   : > { %1197 = vmatmul.f32.vlgmr.msra.gmra.mxu2 %v1059_v49  ;;  %1220 = vmatmul.f32.vlgmr.msra.gmra.mxu3 %v1059_v49  ;;  %v1129_v49 = vperm.slane %v1125_v15, 2 }
  0xde   : > { %1410 = vmatpush.msrb.mxu3 %v1308_v23 }
  0xdf   : > { %v616_v55 = vpop.permute.xlu2 %615 }
  0xe0   : > { %v1052_v48 = vadd.f32 %v721_v39, %v616_v55  ;;  %1411 = vmatpush.msrb.mxu3 %v1307_v27 }
  0xe1   : > { %v830_v40 = vpop.permute.xlu0 %829 }
  0xe2   : > { %v1054_v34 = vadd.f32 %v939_v43, %v830_v40  ;;  %v1056_v45 = vadd.f32 %v1052_v48, %v1050_v21 }
  0xe7   : > { %v1048_v60 = vpop.permute.xlu2 %1047 }
  0xe8   : > { %v1058_v11 = vadd.f32 %v1054_v34, %v1048_v60 }
  0xea   : > { %v1060_v1 = vadd.f32 %v1058_v11, %v1056_v45 }
  0xec   : > { %1154 = vmatmul.f32.gmra.mxu0 %v1060_v1  ;;  %1177 = vmatmul.f32.gmra.mxu1 %v1060_v1 }
  0xed   : > { %1200 = vmatmul.f32.gmra.mxu2 %v1060_v1  ;;  %1223 = vmatmul.f32.gmra.mxu3 %v1060_v1 }
 0x159   : > { %v1152_v18 = vpop.f32.mrf.mxu0  ;;  %v1175_v26 = vpop.f32.mrf.mxu1 }
 0x15a   : > { %v1153_v51 = vadd.f32 %v1152_v18, %v1127_v25  ;;  %v1176_v20 = vadd.f32 %v1175_v26, %v1128_v33 }
 0x15c   : > { %v1227_v32 = vadd.f32 3.0, %v1153_v51  ;;  %v1228_v36 = vadd.f32 3.0, %v1176_v20 }
 0x15e   : > { %v1235_v30 = vmax.f32 %v1227_v32, 0.0  ;;  %v1236_v54 = vmax.f32 %v1228_v36, 0.0 }
 0x160   : > { %v1243_v59 = vmin.f32 %v1235_v30, 6.0  ;;  %v1244_v24 = vmin.f32 %v1236_v54, 6.0  ;;  %v1198_v52 = vpop.f32.mrf.mxu2  ;;  %v1221_v2 = vpop.f32.mrf.mxu3 }
 0x161   : > { %v1199_v3 = vadd.f32 %v1198_v52, %v1129_v49  ;;  %v1222_v55 = vadd.f32 %v1221_v2, %v1130_v19 }
 0x162   : > { %v1251_v10 = vmul.f32 %v1243_v59, %v1153_v51  ;;  %v1252_v58 = vmul.f32 %v1244_v24, %v1176_v20 }
 0x163   : > { %v1229_v39 = vadd.f32 3.0, %v1199_v3  ;;  %v1230_v43 = vadd.f32 3.0, %v1222_v55 }
 0x164   : > { %1343 = vmatmul.f32.vlgmr.msrb.gmra.mxu0 %v1251_v10  ;;  %1366 = vmatmul.f32.vlgmr.msrb.gmra.mxu1 %v1252_v58 }
 0x165   : > { %v1237_v40 = vmax.f32 %v1229_v39, 0.0  ;;  %v1238_v48 = vmax.f32 %v1230_v43, 0.0 }
 0x167   : > { %v1245_v21 = vmin.f32 %v1237_v40, 6.0  ;;  %v1246_v34 = vmin.f32 %v1238_v48, 6.0 }
 0x169   : > { %v1253_v60 = vmul.f32 %v1245_v21, %v1199_v3  ;;  %v1254_v45 = vmul.f32 %v1246_v34, %v1222_v55  ;;  %v1155_v11 = vpop.f32.mrf.mxu0  ;;  %v1178_v1 = vpop.f32.mrf.mxu1 }
 0x16a   : > { %v1156_v41 = vadd.f32 %v1155_v11, %v1127_v25  ;;  %v1179_v56 = vadd.f32 %v1178_v1, %v1128_v33 }
 0x16b   : > { %1389 = vmatmul.f32.vlgmr.msrb.gmra.mxu2 %v1253_v60  ;;  %1412 = vmatmul.f32.vlgmr.msrb.gmra.mxu3 %v1254_v45 }
 0x16c   : > { %v1231_v0 = vadd.f32 3.0, %v1156_v41  ;;  %v1232_v35 = vadd.f32 3.0, %v1179_v56 }
 0x16e   : > { %v1239_v44 = vmax.f32 %v1231_v0, 0.0  ;;  %v1240_v63 = vmax.f32 %v1232_v35, 0.0 }
 0x170   : > { %v1201_v53 = vpop.f32.mrf.mxu2  ;;  %v1224_v50 = vpop.f32.mrf.mxu3  ;;  %v1247_v46 = vmin.f32 %v1239_v44, 6.0  ;;  %v1248_v4 = vmin.f32 %v1240_v63, 6.0 }
 0x171   : > { %v1202_v6 = vadd.f32 %v1201_v53, %v1129_v49  ;;  %v1225_v31 = vadd.f32 %v1224_v50, %v1130_v19 }
 0x172   : > { %v1255_v61 = vmul.f32 %v1247_v46, %v1156_v41  ;;  %v1256_v13 = vmul.f32 %v1248_v4, %v1179_v56 }
 0x173   : > { %v1233_v8 = vadd.f32 3.0, %v1202_v6  ;;  %v1234_v7 = vadd.f32 3.0, %v1225_v31 }
 0x174   : > { %1346 = vmatmul.f32.gmra.mxu0 %v1255_v61  ;;  %1369 = vmatmul.f32.gmra.mxu1 %v1256_v13 }
 0x175   : > { %v1241_v28 = vmax.f32 %v1233_v8, 0.0  ;;  %v1242_v17 = vmax.f32 %v1234_v7, 0.0 }
 0x177   : > { %v1249_v9 = vmin.f32 %v1241_v28, 6.0  ;;  %v1250_v5 = vmin.f32 %v1242_v17, 6.0 }
 0x179   : > { %v1257_v37 = vmul.f32 %v1249_v9, %v1202_v6  ;;  %v1258_v29 = vmul.f32 %v1250_v5, %v1225_v31 }
 0x17b   : > { %1392 = vmatmul.f32.gmra.mxu2 %v1257_v37  ;;  %1415 = vmatmul.f32.gmra.mxu3 %v1258_v29 }
 0x1e1   : > { %v1344_v42 = vpop.f32.mrf.mxu0  ;;  %v1367_v16 = vpop.f32.mrf.mxu1 }
 0x1e2   : > { %v1345_v12 = vadd.f32 %v1559_v22, %v1344_v42 }
 0x1e4   : > { %v1368_v47 = vadd.f32 %v1367_v16, %v1345_v12 }
 0x1ee   : > { %v1390_v23 = vpop.f32.mrf.mxu2  ;;  %v1413_v27 = vpop.f32.mrf.mxu3 }
 0x1ef   : > { %v1391_v57 = vadd.f32 %v1390_v23, %v1368_v47 }
 0x1f1   : > { %v1414_v15 = vadd.f32 %v1413_v27, %v1391_v57  ;;  %v1347_v18 = vpop.f32.mrf.mxu0  ;;  %v1370_v51 = vpop.f32.mrf.mxu1 }
 0x1f2   : > { %v1348_v26 = vadd.f32 %v1559_v22, %v1347_v18 }
 0x1f3   : > { %v1422_v25 = vrot.slane %v1414_v15, 5 }
 0x1f4   : > { %v1371_v20 = vadd.f32 %v1370_v51, %v1348_v26 }
 0x1f5   : > { %v1428_v33 = vadd.f32 %v2376_v14, %v1422_v25 }
 0x1f7   : > { %1431 = vst [vmem:[%s273_s19 - $0x3] sm:$0xf8] %v1428_v33 }
 0x1fe   : > { %v1393_v32 = vpop.f32.mrf.mxu2  ;;  %v1416_v49 = vpop.f32.mrf.mxu3 }
 0x1ff   : > { %v1394_v36 = vadd.f32 %v1393_v32, %v1371_v20 }
 0x201   : > { %v1417_v19 = vadd.f32 %v1416_v49, %v1394_v36 }
 0x203   : > { %v1423_v30 = vrot.slane %v1417_v19, 5 }
 0x205   : > { %v1424_v54 = vsel %vm1421_vm3, %v1422_v25, %v1423_v30  ;;  %v1430_v59 = vadd.f32 %v2384_v38, %v1423_v30 }
 0x206   : > { %v1429_v24 = vadd.f32 %v2380_v62, %v1424_v54 }
 0x207   : > { %1433 = vst [vmem:[%s273_s19 + $0xd] sm:$0x7] %v1430_v59 }
 0x208   : > { %1432 = vst [vmem:[%s273_s19 + $0x5] sm:$0xff] %v1429_v24 }
 0x209 PF: > { %s16_s23 = sadd.s32 1, %s1592_s23   ;;  %s2817_s21 = smov %s1588_s22 }
 0x20a   : > { %p13_p5 = scmp.ge.s32.totalorder %s16_s23, 4   ;;  %s2818_s22 = smov %s2820_s24 }
 0x20c   :  { %15 = sbr.rel (!%p13_p5) target bundleno = 2 (0x2), region = 75 }

</bundles_post_ra>
